<compile_context>
chip_gen: v5e
topology: v5e:2x2
jax: 0.10.0
libtpu: 0.0.40
codegen_flags: <defaults>
</compile_context>

<pallas_src>
import numpy as np
import jax
import jax.numpy as jnp
from jax.experimental import pallas as pl
from jax.experimental.pallas import tpu as pltpu

# ----------------------------- static config --------------------------------
N_CONV = 6
N_BN = 5
BN_EPS = 1e-5
N_CLASSES = 11
LANE = 128                          # lane-dense slab width used everywhere
CONV_K = [7, 3, 3, 3, 3, 3]
CONV_S = [1, 2, 2, 2, 2, 2]
CONV_P = 1


def _layer_lengths(L):
    """Per-layer (input length, strided output length)."""
    lin, lout = [], []
    cur = L
    for i in range(N_CONV):
        lin.append(cur)
        lout.append((cur + 2 * CONV_P - CONV_K[i]) // CONV_S[i] + 1)
        cur = lout[-1]
    return lin, lout


# ------------------------------- kernel -------------------------------------
def _cnn1d_kernel(x_ref, bw0_ref, bwr_ref, s0_ref, sr_ref, shift_ref,
                  w1big_ref, cmask_ref, rowsum_ref, gsum_ref, fcw_ref, fcb_ref,
                  pred_ref, feat_ref):
    f32 = jnp.float32

    # Activations live in a lane-dense (BT*C, 128) f32 slab: batch*channel in
    # sublanes, length in lanes.  Columns beyond the valid length carry junk
    # that is killed by the zero rows of the next selection / flatten
    # operator.  Every matmul below is a plain 2D MXU dot on full-width
    # (128-lane) operands — no pads, slices, concats or masked stores.
    y = x_ref[...].astype(f32)                                   # (BT*cin0, 128)

    for i in range(N_CONV):
        acc = None
        for k in range(CONV_K[i]):
            if i == 0:
                bw = bw0_ref[k]                                  # (BT*8, BT*cin0)
                sk = s0_ref[k]                                   # (128, 128)
            else:
                bw = bwr_ref[i - 1, k]                           # (BT*8, BT*8)
                sk = sr_ref[i - 1, k]                            # (128, 128)
            z = jnp.dot(y, sk, preferred_element_type=f32)       # pad/shift/stride select
            t = jnp.dot(bw, z, preferred_element_type=f32)       # per-tap conv (scale folded)
            acc = t if acc is None else acc + t
        y = acc + shift_ref[i]                                   # conv bias + BN(eval) shift
        if i < N_BN:
            y = jnp.maximum(y, 0.0)                              # ReLU (layers 0..4)

    # ---- Flatten(8*4) + Linear(32, H): three small dense matmuls ------------
    # u[(b,c), c'*H+h] = sum_{l<4} y[(b,c), l] * W1[h, c'*4+l]; cmask keeps
    # c'==c; rowsum sums the 8 channel rows per example; gsum folds the 8
    # lane blocks into H columns (zero-padded to 128 lanes).
    u = jnp.dot(y, w1big_ref[...], preferred_element_type=f32) * cmask_ref[...]
    v = jnp.dot(rowsum_ref[...], u, preferred_element_type=f32)         # (BT, 8H)
    featw = jnp.dot(v, gsum_ref[...], preferred_element_type=f32) + fcb_ref[0:1, :]
    feat_ref[...] = featw                                                # (BT, 128)

    # ---- classifier: Linear -> ReLU -> (Dropout=id) x2 -> Linear ------------
    # fc weights are zero-padded to (128, 128) host-side; featw lanes >= H are
    # already zero, so everything stays lane-dense with no masking.
    h = jnp.maximum(jnp.dot(featw, fcw_ref[0], preferred_element_type=f32)
                    + fcb_ref[1:2, :], 0.0)
    h = jnp.maximum(jnp.dot(h, fcw_ref[1], preferred_element_type=f32)
                    + fcb_ref[2:3, :], 0.0)
    pred_ref[...] = (jnp.dot(h, fcw_ref[2], preferred_element_type=f32)
                     + fcb_ref[3:4, :])                                  # (BT, 128)


# ---------------------- host-side parameter packing --------------------------
def _prep_kernel_params(raw, input_dim, hidden_dim, BT, lengths):
    H = hidden_dim
    Hh = H // 2
    lin, lout = lengths
    eye_bt = np.eye(BT, dtype=np.float32)

    # fold conv bias + BN(eval) into per-output-channel scale / shift
    scales, shifts = [], []
    for i in range(N_CONV):
        b = np.asarray(raw["conv_b"][i], np.float32)
        if i < N_BN:
            g = np.asarray(raw["bn_gamma"][i], np.float32)
            be = np.asarray(raw["bn_beta"][i], np.float32)
            m = np.asarray(raw["bn_mean"][i], np.float32)
            v = np.asarray(raw["bn_var"][i], np.float32)
            s = g / np.sqrt(v + BN_EPS)
            t = be + (b - m) * s
        else:
            s = np.ones(8, np.float32)
            t = b
        scales.append(s)
        shifts.append(t)

    # per-tap block-diagonal conv weights (kron(I_BT, W_k)) with scale folded in
    bw0 = np.zeros((CONV_K[0], BT * 8, BT * input_dim), np.float32)
    w = np.asarray(raw["conv_w"][0], np.float32)                 # (8, cin0, 7)
    ws = w * scales[0][:, None, None]
    for k in range(CONV_K[0]):
        bw0[k] = np.kron(eye_bt, ws[:, :, k])

    bwr = np.zeros((N_CONV - 1, 3, BT * 8, BT * 8), np.float32)
    for i in range(1, N_CONV):
        w = np.asarray(raw["conv_w"][i], np.float32)             # (8, 8, 3)
        ws = w * scales[i][:, None, None]
        for k in range(CONV_K[i]):
            bwr[i - 1, k] = np.kron(eye_bt, ws[:, :, k])

    # per-tap 0/1 selection matrices (encode padding + stride), lane-dense 128x128
    s0 = np.zeros((CONV_K[0], LANE, LANE), np.float32)
    for k in range(CONV_K[0]):
        for j in range(lout[0]):
            src = CONV_S[0] * j + k - CONV_P
            if 0 <= src < lin[0]:
                s0[k, src, j] = 1.0
    sr = np.zeros((N_CONV - 1, 3, LANE, LANE), np.float32)
    for i in range(1, N_CONV):
        for k in range(CONV_K[i]):
            for j in range(lout[i]):
                src = CONV_S[i] * j + k - CONV_P
                if 0 <= src < lin[i]:
                    sr[i - 1, k, src, j] = 1.0

    # per-row shift pre-broadcast to full 128-lane width
    shift = np.zeros((N_CONV, BT * 8, LANE), np.float32)
    for i in range(N_CONV):
        shift[i] = np.tile(shifts[i], BT)[:, None]

    # Flatten(8x4) + Linear(32, H) operators (row dim padded to 128 lanes of y)
    W1 = np.asarray(raw["lin_w"][0], np.float32)                 # (H, 32)
    w1big = np.zeros((LANE, 8 * H), np.float32)
    w1big[:4, :] = np.transpose(W1.reshape(H, 8, 4), (2, 1, 0)).reshape(4, 8 * H)
    cmask = np.tile(np.kron(np.eye(8, dtype=np.float32),
                            np.ones((1, H), np.float32)), (BT, 1))      # (BT*8, 8H)
    rowsum = np.kron(eye_bt, np.ones((1, 8), np.float32))               # (BT, BT*8)
    gsum = np.zeros((8 * H, LANE), np.float32)
    gsum[:, :H] = np.tile(np.eye(H, dtype=np.float32), (8, 1))

    # classifier weights / biases, zero-padded to lane-dense (128, 128)
    fcw = np.zeros((3, LANE, LANE), np.float32)
    fcw[0, :H, :H] = np.asarray(raw["lin_w"][1], np.float32).T
    fcw[1, :H, :Hh] = np.asarray(raw["lin_w"][2], np.float32).T
    fcw[2, :Hh, :N_CLASSES] = np.asarray(raw["lin_w"][3], np.float32).T
    fcb = np.zeros((4, LANE), np.float32)
    fcb[0, :H] = np.asarray(raw["lin_b"][0], np.float32)
    fcb[1, :H] = np.asarray(raw["lin_b"][1], np.float32)
    fcb[2, :Hh] = np.asarray(raw["lin_b"][2], np.float32)
    fcb[3, :N_CLASSES] = np.asarray(raw["lin_b"][3], np.float32)

    return tuple(jnp.asarray(a) for a in
                 (bw0, bwr, s0, sr, shift, w1big, cmask, rowsum, gsum, fcw, fcb))


def _const_index_map(ndim):
    return lambda i, _n=ndim: (0,) * _n


# ------------------------------ wrapper --------------------------------------
def cnn1d_forward(x, raw, hidden_dim):
    B, cin, L = x.shape
    H = hidden_dim
    assert H <= LANE and H % 2 == 0, "lane-dense classifier requires hidden_dim <= 128"
    lengths = _layer_lengths(L)
    assert lengths[1][-1] * 8 == 32 and L == LANE, \
        "module requires seq_len=128 (final flatten width must be 32)"

    # Batch tiling: one grid step covers BT examples (BT*channels sublanes).
    # BT=16 -> conv matmul M dim = 128, exactly filling the 128-row MXU (v5e);
    # BT=32 only pays off once MXU-bound on the 256-wide MXUs (v6e/v7x).
    BT = B if B <= 16 else 16
    Bp = pl.cdiv(B, BT) * BT
    grid = (Bp // BT,)

    xp = x if Bp == B else jnp.concatenate(
        [x, jnp.zeros((Bp - B, cin, L), x.dtype)], axis=0)
    x2d = xp.reshape(Bp * cin, L).astype(jnp.float32)

    params = _prep_kernel_params(raw, cin, H, BT, lengths)

    in_specs = [pl.BlockSpec((BT * cin, L), lambda i: (i, 0))]
    for p in params:
        in_specs.append(pl.BlockSpec(p.shape, _const_index_map(p.ndim)))
    out_specs = [pl.BlockSpec((BT, LANE), lambda i: (i, 0)),
                 pl.BlockSpec((BT, LANE), lambda i: (i, 0))]
    out_shape = (jax.ShapeDtypeStruct((Bp, LANE), jnp.float32),
                 jax.ShapeDtypeStruct((Bp, LANE), jnp.float32))

    pred_w, feat_w = pl.pallas_call(
        _cnn1d_kernel,
        grid=grid,
        in_specs=in_specs,
        out_specs=out_specs,
        out_shape=out_shape,
        compiler_params=pltpu.CompilerParams(
            dimension_semantics=("parallel",),
            vmem_limit_bytes=32 * 1024 * 1024),
    )(x2d, *params)

    return pred_w[:B, :N_CLASSES], feat_w[:B, :H]


# --------------------- deterministic parameter init --------------------------
def init_params(key, input_dim, hidden_dim):
    raw = {}
    conv_io = [(input_dim, 8)] + [(8, 8)] * 5
    conv_w, conv_b = [], []
    for i, (ci, co) in enumerate(conv_io):
        k = CONV_K[i]
        key, kw, kb = jax.random.split(key, 3)
        bound = 1.0 / np.sqrt(ci * k)
        conv_w.append(jax.random.uniform(kw, (co, ci, k), jnp.float32, -bound, bound))
        conv_b.append(jax.random.uniform(kb, (co,), jnp.float32, -bound, bound))
    raw["conv_w"], raw["conv_b"] = conv_w, conv_b

    # use non-trivial BN(eval) running stats so the folded affine path is exercised
    gam, bet, mean, var = [], [], [], []
    for _ in range(N_BN):
        key, k1, k2, k3, k4 = jax.random.split(key, 5)
        gam.append(jax.random.uniform(k1, (8,), jnp.float32, 0.5, 1.5))
        bet.append(0.1 * jax.random.normal(k2, (8,), jnp.float32))
        mean.append(0.1 * jax.random.normal(k3, (8,), jnp.float32))
        var.append(jax.random.uniform(k4, (8,), jnp.float32, 0.5, 1.5))
    raw["bn_gamma"], raw["bn_beta"], raw["bn_mean"], raw["bn_var"] = gam, bet, mean, var

    lin_io = [(32, hidden_dim), (hidden_dim, hidden_dim),
              (hidden_dim, hidden_dim // 2), (hidden_dim // 2, N_CLASSES)]
    lin_w, lin_b = [], []
    for fin, fout in lin_io:
        key, kw, kb = jax.random.split(key, 3)
        bound = 1.0 / np.sqrt(fin)
        lin_w.append(jax.random.uniform(kw, (fout, fin), jnp.float32, -bound, bound))
        lin_b.append(jax.random.uniform(kb, (fout,), jnp.float32, -bound, bound))
    raw["lin_w"], raw["lin_b"] = lin_w, lin_b
    return raw


# --------------------------- pure-JAX reference ------------------------------
def ref_forward(x, raw):
    y = x
    for i in range(N_CONV):
        y = jax.lax.conv_general_dilated(
            y, raw["conv_w"][i], window_strides=(CONV_S[i],),
            padding=[(CONV_P, CONV_P)], dimension_numbers=("NCH", "OIH", "NCH"))
        y = y + raw["conv_b"][i][None, :, None]
        if i < N_BN:
            y = (y - raw["bn_mean"][i][None, :, None]) / jnp.sqrt(
                raw["bn_var"][i][None, :, None] + BN_EPS)
            y = y * raw["bn_gamma"][i][None, :, None] + raw["bn_beta"][i][None, :, None]
            y = jnp.maximum(y, 0.0)
    flat = y.reshape(y.shape[0], -1)
    feat = flat @ raw["lin_w"][0].T + raw["lin_b"][0]
    h = jnp.maximum(feat @ raw["lin_w"][1].T + raw["lin_b"][1], 0.0)
    h = jnp.maximum(h @ raw["lin_w"][2].T + raw["lin_b"][2], 0.0)
    pred = h @ raw["lin_w"][3].T + raw["lin_b"][3]
    return pred, feat


# --------------------------------- main ---------------------------------------
if __name__ == "__main__":
    B, INPUT_DIM, SEQ_LEN, HIDDEN = 2, 4, 128, 32   # 128 -> 124->62->31->16->8->4 -> flatten 32

    key = jax.random.PRNGKey(0)
    key, kx = jax.random.split(key)
    raw = init_params(key, INPUT_DIM, HIDDEN)
    x = jax.random.normal(kx, (B, INPUT_DIM, SEQ_LEN), jnp.float32)

    preds, feats = cnn1d_forward(x, raw, HIDDEN)
    jax.block_until_ready((preds, feats))

    ref_preds, ref_feats = ref_forward(x, raw)
    assert preds.shape == (B, N_CLASSES) and feats.shape == (B, HIDDEN)
    assert np.allclose(np.asarray(preds), np.asarray(ref_preds), rtol=1e-3, atol=1e-3)
    assert np.allclose(np.asarray(feats), np.asarray(ref_feats), rtol=1e-3, atol=1e-3)

    print("KERNEL_OK")
</pallas_src>

<mosaic_0001>
module attributes {stable_mosaic.version = 11 : i64} {
  func.func @_cnn1d_kernel(%arg0: i32, %arg1: memref<8x128xf32, #tpu.memory_space<vmem>>, %arg2: memref<7x16x8xf32, #tpu.memory_space<vmem>>, %arg3: memref<5x3x16x16xf32, #tpu.memory_space<vmem>>, %arg4: memref<7x128x128xf32, #tpu.memory_space<vmem>>, %arg5: memref<5x3x128x128xf32, #tpu.memory_space<vmem>>, %arg6: memref<6x16x128xf32, #tpu.memory_space<vmem>>, %arg7: memref<128x256xf32, #tpu.memory_space<vmem>>, %arg8: memref<16x256xf32, #tpu.memory_space<vmem>>, %arg9: memref<2x16xf32, #tpu.memory_space<vmem>>, %arg10: memref<256x128xf32, #tpu.memory_space<vmem>>, %arg11: memref<3x128x128xf32, #tpu.memory_space<vmem>>, %arg12: memref<4x128xf32, #tpu.memory_space<vmem>>, %arg13: memref<2x128xf32, #tpu.memory_space<vmem>>, %arg14: memref<2x128xf32, #tpu.memory_space<vmem>>) attributes {dimension_semantics = [#tpu.dimension_semantics<parallel>], iteration_bounds = array<i64: 1>, scalar_prefetch = 0 : i64, scratch_operands = 0 : i64, tpu.core_type = #tpu.core_type<tc>, window_params = [{transform_indices = @transform_0, window_bounds = array<i64: 8, 128>}, {pipeline_mode = #tpu.pipeline_mode<synchronous>, transform_indices = @transform_1, window_bounds = array<i64: 7, 16, 8>}, {pipeline_mode = #tpu.pipeline_mode<synchronous>, transform_indices = @transform_2, window_bounds = array<i64: 5, 3, 16, 16>}, {pipeline_mode = #tpu.pipeline_mode<synchronous>, transform_indices = @transform_3, window_bounds = array<i64: 7, 128, 128>}, {pipeline_mode = #tpu.pipeline_mode<synchronous>, transform_indices = @transform_4, window_bounds = array<i64: 5, 3, 128, 128>}, {pipeline_mode = #tpu.pipeline_mode<synchronous>, transform_indices = @transform_5, window_bounds = array<i64: 6, 16, 128>}, {pipeline_mode = #tpu.pipeline_mode<synchronous>, transform_indices = @transform_6, window_bounds = array<i64: 128, 256>}, {pipeline_mode = #tpu.pipeline_mode<synchronous>, transform_indices = @transform_7, window_bounds = array<i64: 16, 256>}, {pipeline_mode = #tpu.pipeline_mode<synchronous>, transform_indices = @transform_8, window_bounds = array<i64: 2, 16>}, {pipeline_mode = #tpu.pipeline_mode<synchronous>, transform_indices = @transform_9, window_bounds = array<i64: 256, 128>}, {pipeline_mode = #tpu.pipeline_mode<synchronous>, transform_indices = @transform_10, window_bounds = array<i64: 3, 128, 128>}, {pipeline_mode = #tpu.pipeline_mode<synchronous>, transform_indices = @transform_11, window_bounds = array<i64: 4, 128>}, {transform_indices = @transform_12, window_bounds = array<i64: 2, 128>}, {transform_indices = @transform_13, window_bounds = array<i64: 2, 128>}]} {
    %c0 = arith.constant 0 : index
    %c0_0 = arith.constant 0 : index
    %0 = vector.load %arg1[%c0, %c0_0] : memref<8x128xf32, #tpu.memory_space<vmem>>, vector<8x128xf32>
    %c0_1 = arith.constant 0 : index
    %c0_2 = arith.constant 0 : index
    %c0_3 = arith.constant 0 : index
    %1 = vector.load %arg2[%c0_1, %c0_2, %c0_3] : memref<7x16x8xf32, #tpu.memory_space<vmem>>, vector<1x16x8xf32>
    %2 = vector.shape_cast %1 : vector<1x16x8xf32> to vector<16x8xf32>
    %c0_4 = arith.constant 0 : index
    %c0_5 = arith.constant 0 : index
    %c0_6 = arith.constant 0 : index
    %3 = vector.load %arg4[%c0_4, %c0_5, %c0_6] : memref<7x128x128xf32, #tpu.memory_space<vmem>>, vector<1x128x128xf32>
    %4 = vector.shape_cast %3 : vector<1x128x128xf32> to vector<128x128xf32>
    %cst = arith.constant dense<0.000000e+00> : vector<8x128xf32>
    %5 = tpu.matmul %0, %4, %cst {dimension_numbers = #tpu.dot_dimension_numbers<[1], [0], [0], [1], [0, 0, 1, 1], [], []>} : vector<8x128xf32>, vector<128x128xf32>, vector<8x128xf32> -> vector<8x128xf32>
    %cst_7 = arith.constant dense<0.000000e+00> : vector<16x128xf32>
    %6 = tpu.matmul %2, %5, %cst_7 {dimension_numbers = #tpu.dot_dimension_numbers<[1], [0], [0], [1], [0, 0, 1, 1], [], []>} : vector<16x8xf32>, vector<8x128xf32>, vector<16x128xf32> -> vector<16x128xf32>
    %c1 = arith.constant 1 : index
    %c0_8 = arith.constant 0 : index
    %c0_9 = arith.constant 0 : index
    %7 = vector.load %arg2[%c1, %c0_8, %c0_9] : memref<7x16x8xf32, #tpu.memory_space<vmem>>, vector<1x16x8xf32>
    %8 = vector.shape_cast %7 : vector<1x16x8xf32> to vector<16x8xf32>
    %c1_10 = arith.constant 1 : index
    %c0_11 = arith.constant 0 : index
    %c0_12 = arith.constant 0 : index
    %9 = vector.load %arg4[%c1_10, %c0_11, %c0_12] : memref<7x128x128xf32, #tpu.memory_space<vmem>>, vector<1x128x128xf32>
    %10 = vector.shape_cast %9 : vector<1x128x128xf32> to vector<128x128xf32>
    %cst_13 = arith.constant dense<0.000000e+00> : vector<8x128xf32>
    %11 = tpu.matmul %0, %10, %cst_13 {dimension_numbers = #tpu.dot_dimension_numbers<[1], [0], [0], [1], [0, 0, 1, 1], [], []>} : vector<8x128xf32>, vector<128x128xf32>, vector<8x128xf32> -> vector<8x128xf32>
    %cst_14 = arith.constant dense<0.000000e+00> : vector<16x128xf32>
    %12 = tpu.matmul %8, %11, %cst_14 {dimension_numbers = #tpu.dot_dimension_numbers<[1], [0], [0], [1], [0, 0, 1, 1], [], []>} : vector<16x8xf32>, vector<8x128xf32>, vector<16x128xf32> -> vector<16x128xf32>
    %13 = arith.addf %6, %12 : vector<16x128xf32>
    %c2 = arith.constant 2 : index
    %c0_15 = arith.constant 0 : index
    %c0_16 = arith.constant 0 : index
    %14 = vector.load %arg2[%c2, %c0_15, %c0_16] : memref<7x16x8xf32, #tpu.memory_space<vmem>>, vector<1x16x8xf32>
    %15 = vector.shape_cast %14 : vector<1x16x8xf32> to vector<16x8xf32>
    %c2_17 = arith.constant 2 : index
    %c0_18 = arith.constant 0 : index
    %c0_19 = arith.constant 0 : index
    %16 = vector.load %arg4[%c2_17, %c0_18, %c0_19] : memref<7x128x128xf32, #tpu.memory_space<vmem>>, vector<1x128x128xf32>
    %17 = vector.shape_cast %16 : vector<1x128x128xf32> to vector<128x128xf32>
    %cst_20 = arith.constant dense<0.000000e+00> : vector<8x128xf32>
    %18 = tpu.matmul %0, %17, %cst_20 {dimension_numbers = #tpu.dot_dimension_numbers<[1], [0], [0], [1], [0, 0, 1, 1], [], []>} : vector<8x128xf32>, vector<128x128xf32>, vector<8x128xf32> -> vector<8x128xf32>
    %cst_21 = arith.constant dense<0.000000e+00> : vector<16x128xf32>
    %19 = tpu.matmul %15, %18, %cst_21 {dimension_numbers = #tpu.dot_dimension_numbers<[1], [0], [0], [1], [0, 0, 1, 1], [], []>} : vector<16x8xf32>, vector<8x128xf32>, vector<16x128xf32> -> vector<16x128xf32>
    %20 = arith.addf %13, %19 : vector<16x128xf32>
    %c3 = arith.constant 3 : index
    %c0_22 = arith.constant 0 : index
    %c0_23 = arith.constant 0 : index
    %21 = vector.load %arg2[%c3, %c0_22, %c0_23] : memref<7x16x8xf32, #tpu.memory_space<vmem>>, vector<1x16x8xf32>
    %22 = vector.shape_cast %21 : vector<1x16x8xf32> to vector<16x8xf32>
    %c3_24 = arith.constant 3 : index
    %c0_25 = arith.constant 0 : index
    %c0_26 = arith.constant 0 : index
    %23 = vector.load %arg4[%c3_24, %c0_25, %c0_26] : memref<7x128x128xf32, #tpu.memory_space<vmem>>, vector<1x128x128xf32>
    %24 = vector.shape_cast %23 : vector<1x128x128xf32> to vector<128x128xf32>
    %cst_27 = arith.constant dense<0.000000e+00> : vector<8x128xf32>
    %25 = tpu.matmul %0, %24, %cst_27 {dimension_numbers = #tpu.dot_dimension_numbers<[1], [0], [0], [1], [0, 0, 1, 1], [], []>} : vector<8x128xf32>, vector<128x128xf32>, vector<8x128xf32> -> vector<8x128xf32>
    %cst_28 = arith.constant dense<0.000000e+00> : vector<16x128xf32>
    %26 = tpu.matmul %22, %25, %cst_28 {dimension_numbers = #tpu.dot_dimension_numbers<[1], [0], [0], [1], [0, 0, 1, 1], [], []>} : vector<16x8xf32>, vector<8x128xf32>, vector<16x128xf32> -> vector<16x128xf32>
    %27 = arith.addf %20, %26 : vector<16x128xf32>
    %c4 = arith.constant 4 : index
    %c0_29 = arith.constant 0 : index
    %c0_30 = arith.constant 0 : index
    %28 = vector.load %arg2[%c4, %c0_29, %c0_30] : memref<7x16x8xf32, #tpu.memory_space<vmem>>, vector<1x16x8xf32>
    %29 = vector.shape_cast %28 : vector<1x16x8xf32> to vector<16x8xf32>
    %c4_31 = arith.constant 4 : index
    %c0_32 = arith.constant 0 : index
    %c0_33 = arith.constant 0 : index
    %30 = vector.load %arg4[%c4_31, %c0_32, %c0_33] : memref<7x128x128xf32, #tpu.memory_space<vmem>>, vector<1x128x128xf32>
    %31 = vector.shape_cast %30 : vector<1x128x128xf32> to vector<128x128xf32>
    %cst_34 = arith.constant dense<0.000000e+00> : vector<8x128xf32>
    %32 = tpu.matmul %0, %31, %cst_34 {dimension_numbers = #tpu.dot_dimension_numbers<[1], [0], [0], [1], [0, 0, 1, 1], [], []>} : vector<8x128xf32>, vector<128x128xf32>, vector<8x128xf32> -> vector<8x128xf32>
    %cst_35 = arith.constant dense<0.000000e+00> : vector<16x128xf32>
    %33 = tpu.matmul %29, %32, %cst_35 {dimension_numbers = #tpu.dot_dimension_numbers<[1], [0], [0], [1], [0, 0, 1, 1], [], []>} : vector<16x8xf32>, vector<8x128xf32>, vector<16x128xf32> -> vector<16x128xf32>
    %34 = arith.addf %27, %33 : vector<16x128xf32>
    %c5 = arith.constant 5 : index
    %c0_36 = arith.constant 0 : index
    %c0_37 = arith.constant 0 : index
    %35 = vector.load %arg2[%c5, %c0_36, %c0_37] : memref<7x16x8xf32, #tpu.memory_space<vmem>>, vector<1x16x8xf32>
    %36 = vector.shape_cast %35 : vector<1x16x8xf32> to vector<16x8xf32>
    %c5_38 = arith.constant 5 : index
    %c0_39 = arith.constant 0 : index
    %c0_40 = arith.constant 0 : index
    %37 = vector.load %arg4[%c5_38, %c0_39, %c0_40] : memref<7x128x128xf32, #tpu.memory_space<vmem>>, vector<1x128x128xf32>
    %38 = vector.shape_cast %37 : vector<1x128x128xf32> to vector<128x128xf32>
    %cst_41 = arith.constant dense<0.000000e+00> : vector<8x128xf32>
    %39 = tpu.matmul %0, %38, %cst_41 {dimension_numbers = #tpu.dot_dimension_numbers<[1], [0], [0], [1], [0, 0, 1, 1], [], []>} : vector<8x128xf32>, vector<128x128xf32>, vector<8x128xf32> -> vector<8x128xf32>
    %cst_42 = arith.constant dense<0.000000e+00> : vector<16x128xf32>
    %40 = tpu.matmul %36, %39, %cst_42 {dimension_numbers = #tpu.dot_dimension_numbers<[1], [0], [0], [1], [0, 0, 1, 1], [], []>} : vector<16x8xf32>, vector<8x128xf32>, vector<16x128xf32> -> vector<16x128xf32>
    %41 = arith.addf %34, %40 : vector<16x128xf32>
    %c6 = arith.constant 6 : index
    %c0_43 = arith.constant 0 : index
    %c0_44 = arith.constant 0 : index
    %42 = vector.load %arg2[%c6, %c0_43, %c0_44] : memref<7x16x8xf32, #tpu.memory_space<vmem>>, vector<1x16x8xf32>
    %43 = vector.shape_cast %42 : vector<1x16x8xf32> to vector<16x8xf32>
    %c6_45 = arith.constant 6 : index
    %c0_46 = arith.constant 0 : index
    %c0_47 = arith.constant 0 : index
    %44 = vector.load %arg4[%c6_45, %c0_46, %c0_47] : memref<7x128x128xf32, #tpu.memory_space<vmem>>, vector<1x128x128xf32>
    %45 = vector.shape_cast %44 : vector<1x128x128xf32> to vector<128x128xf32>
    %cst_48 = arith.constant dense<0.000000e+00> : vector<8x128xf32>
    %46 = tpu.matmul %0, %45, %cst_48 {dimension_numbers = #tpu.dot_dimension_numbers<[1], [0], [0], [1], [0, 0, 1, 1], [], []>} : vector<8x128xf32>, vector<128x128xf32>, vector<8x128xf32> -> vector<8x128xf32>
    %cst_49 = arith.constant dense<0.000000e+00> : vector<16x128xf32>
    %47 = tpu.matmul %43, %46, %cst_49 {dimension_numbers = #tpu.dot_dimension_numbers<[1], [0], [0], [1], [0, 0, 1, 1], [], []>} : vector<16x8xf32>, vector<8x128xf32>, vector<16x128xf32> -> vector<16x128xf32>
    %48 = arith.addf %41, %47 : vector<16x128xf32>
    %c0_50 = arith.constant 0 : index
    %c0_51 = arith.constant 0 : index
    %c0_52 = arith.constant 0 : index
    %49 = vector.load %arg6[%c0_50, %c0_51, %c0_52] : memref<6x16x128xf32, #tpu.memory_space<vmem>>, vector<1x16x128xf32>
    %50 = vector.shape_cast %49 : vector<1x16x128xf32> to vector<16x128xf32>
    %51 = arith.addf %48, %50 : vector<16x128xf32>
    %cst_53 = arith.constant 0.000000e+00 : f32
    %52 = vector.broadcast %cst_53 : f32 to vector<16x128xf32>
    %53 = arith.maximumf %51, %52 : vector<16x128xf32>
    %c0_54 = arith.constant 0 : index
    %c0_55 = arith.constant 0 : index
    %c0_56 = arith.constant 0 : index
    %c0_57 = arith.constant 0 : index
    %54 = vector.load %arg3[%c0_54, %c0_55, %c0_56, %c0_57] : memref<5x3x16x16xf32, #tpu.memory_space<vmem>>, vector<1x1x16x16xf32>
    %55 = vector.shape_cast %54 : vector<1x1x16x16xf32> to vector<16x16xf32>
    %c0_58 = arith.constant 0 : index
    %c0_59 = arith.constant 0 : index
    %c0_60 = arith.constant 0 : index
    %c0_61 = arith.constant 0 : index
    %56 = vector.load %arg5[%c0_58, %c0_59, %c0_60, %c0_61] : memref<5x3x128x128xf32, #tpu.memory_space<vmem>>, vector<1x1x128x128xf32>
    %57 = vector.shape_cast %56 : vector<1x1x128x128xf32> to vector<128x128xf32>
    %cst_62 = arith.constant dense<0.000000e+00> : vector<16x128xf32>
    %58 = tpu.matmul %53, %57, %cst_62 {dimension_numbers = #tpu.dot_dimension_numbers<[1], [0], [0], [1], [0, 0, 1, 1], [], []>} : vector<16x128xf32>, vector<128x128xf32>, vector<16x128xf32> -> vector<16x128xf32>
    %cst_63 = arith.constant dense<0.000000e+00> : vector<16x128xf32>
    %59 = tpu.matmul %55, %58, %cst_63 {dimension_numbers = #tpu.dot_dimension_numbers<[1], [0], [0], [1], [0, 0, 1, 1], [], []>} : vector<16x16xf32>, vector<16x128xf32>, vector<16x128xf32> -> vector<16x128xf32>
    %c0_64 = arith.constant 0 : index
    %c1_65 = arith.constant 1 : index
    %c0_66 = arith.constant 0 : index
    %c0_67 = arith.constant 0 : index
    %60 = vector.load %arg3[%c0_64, %c1_65, %c0_66, %c0_67] : memref<5x3x16x16xf32, #tpu.memory_space<vmem>>, vector<1x1x16x16xf32>
    %61 = vector.shape_cast %60 : vector<1x1x16x16xf32> to vector<16x16xf32>
    %c0_68 = arith.constant 0 : index
    %c1_69 = arith.constant 1 : index
    %c0_70 = arith.constant 0 : index
    %c0_71 = arith.constant 0 : index
    %62 = vector.load %arg5[%c0_68, %c1_69, %c0_70, %c0_71] : memref<5x3x128x128xf32, #tpu.memory_space<vmem>>, vector<1x1x128x128xf32>
    %63 = vector.shape_cast %62 : vector<1x1x128x128xf32> to vector<128x128xf32>
    %cst_72 = arith.constant dense<0.000000e+00> : vector<16x128xf32>
    %64 = tpu.matmul %53, %63, %cst_72 {dimension_numbers = #tpu.dot_dimension_numbers<[1], [0], [0], [1], [0, 0, 1, 1], [], []>} : vector<16x128xf32>, vector<128x128xf32>, vector<16x128xf32> -> vector<16x128xf32>
    %cst_73 = arith.constant dense<0.000000e+00> : vector<16x128xf32>
    %65 = tpu.matmul %61, %64, %cst_73 {dimension_numbers = #tpu.dot_dimension_numbers<[1], [0], [0], [1], [0, 0, 1, 1], [], []>} : vector<16x16xf32>, vector<16x128xf32>, vector<16x128xf32> -> vector<16x128xf32>
    %66 = arith.addf %59, %65 : vector<16x128xf32>
    %c0_74 = arith.constant 0 : index
    %c2_75 = arith.constant 2 : index
    %c0_76 = arith.constant 0 : index
    %c0_77 = arith.constant 0 : index
    %67 = vector.load %arg3[%c0_74, %c2_75, %c0_76, %c0_77] : memref<5x3x16x16xf32, #tpu.memory_space<vmem>>, vector<1x1x16x16xf32>
    %68 = vector.shape_cast %67 : vector<1x1x16x16xf32> to vector<16x16xf32>
    %c0_78 = arith.constant 0 : index
    %c2_79 = arith.constant 2 : index
    %c0_80 = arith.constant 0 : index
    %c0_81 = arith.constant 0 : index
    %69 = vector.load %arg5[%c0_78, %c2_79, %c0_80, %c0_81] : memref<5x3x128x128xf32, #tpu.memory_space<vmem>>, vector<1x1x128x128xf32>
    %70 = vector.shape_cast %69 : vector<1x1x128x128xf32> to vector<128x128xf32>
    %cst_82 = arith.constant dense<0.000000e+00> : vector<16x128xf32>
    %71 = tpu.matmul %53, %70, %cst_82 {dimension_numbers = #tpu.dot_dimension_numbers<[1], [0], [0], [1], [0, 0, 1, 1], [], []>} : vector<16x128xf32>, vector<128x128xf32>, vector<16x128xf32> -> vector<16x128xf32>
    %cst_83 = arith.constant dense<0.000000e+00> : vector<16x128xf32>
    %72 = tpu.matmul %68, %71, %cst_83 {dimension_numbers = #tpu.dot_dimension_numbers<[1], [0], [0], [1], [0, 0, 1, 1], [], []>} : vector<16x16xf32>, vector<16x128xf32>, vector<16x128xf32> -> vector<16x128xf32>
    %73 = arith.addf %66, %72 : vector<16x128xf32>
    %c1_84 = arith.constant 1 : index
    %c0_85 = arith.constant 0 : index
    %c0_86 = arith.constant 0 : index
    %74 = vector.load %arg6[%c1_84, %c0_85, %c0_86] : memref<6x16x128xf32, #tpu.memory_space<vmem>>, vector<1x16x128xf32>
    %75 = vector.shape_cast %74 : vector<1x16x128xf32> to vector<16x128xf32>
    %76 = arith.addf %73, %75 : vector<16x128xf32>
    %cst_87 = arith.constant 0.000000e+00 : f32
    %77 = vector.broadcast %cst_87 : f32 to vector<16x128xf32>
    %78 = arith.maximumf %76, %77 : vector<16x128xf32>
    %c1_88 = arith.constant 1 : index
    %c0_89 = arith.constant 0 : index
    %c0_90 = arith.constant 0 : index
    %c0_91 = arith.constant 0 : index
    %79 = vector.load %arg3[%c1_88, %c0_89, %c0_90, %c0_91] : memref<5x3x16x16xf32, #tpu.memory_space<vmem>>, vector<1x1x16x16xf32>
    %80 = vector.shape_cast %79 : vector<1x1x16x16xf32> to vector<16x16xf32>
    %c1_92 = arith.constant 1 : index
    %c0_93 = arith.constant 0 : index
    %c0_94 = arith.constant 0 : index
    %c0_95 = arith.constant 0 : index
    %81 = vector.load %arg5[%c1_92, %c0_93, %c0_94, %c0_95] : memref<5x3x128x128xf32, #tpu.memory_space<vmem>>, vector<1x1x128x128xf32>
    %82 = vector.shape_cast %81 : vector<1x1x128x128xf32> to vector<128x128xf32>
    %cst_96 = arith.constant dense<0.000000e+00> : vector<16x128xf32>
    %83 = tpu.matmul %78, %82, %cst_96 {dimension_numbers = #tpu.dot_dimension_numbers<[1], [0], [0], [1], [0, 0, 1, 1], [], []>} : vector<16x128xf32>, vector<128x128xf32>, vector<16x128xf32> -> vector<16x128xf32>
    %cst_97 = arith.constant dense<0.000000e+00> : vector<16x128xf32>
    %84 = tpu.matmul %80, %83, %cst_97 {dimension_numbers = #tpu.dot_dimension_numbers<[1], [0], [0], [1], [0, 0, 1, 1], [], []>} : vector<16x16xf32>, vector<16x128xf32>, vector<16x128xf32> -> vector<16x128xf32>
    %c1_98 = arith.constant 1 : index
    %c1_99 = arith.constant 1 : index
    %c0_100 = arith.constant 0 : index
    %c0_101 = arith.constant 0 : index
    %85 = vector.load %arg3[%c1_98, %c1_99, %c0_100, %c0_101] : memref<5x3x16x16xf32, #tpu.memory_space<vmem>>, vector<1x1x16x16xf32>
    %86 = vector.shape_cast %85 : vector<1x1x16x16xf32> to vector<16x16xf32>
    %c1_102 = arith.constant 1 : index
    %c1_103 = arith.constant 1 : index
    %c0_104 = arith.constant 0 : index
    %c0_105 = arith.constant 0 : index
    %87 = vector.load %arg5[%c1_102, %c1_103, %c0_104, %c0_105] : memref<5x3x128x128xf32, #tpu.memory_space<vmem>>, vector<1x1x128x128xf32>
    %88 = vector.shape_cast %87 : vector<1x1x128x128xf32> to vector<128x128xf32>
    %cst_106 = arith.constant dense<0.000000e+00> : vector<16x128xf32>
    %89 = tpu.matmul %78, %88, %cst_106 {dimension_numbers = #tpu.dot_dimension_numbers<[1], [0], [0], [1], [0, 0, 1, 1], [], []>} : vector<16x128xf32>, vector<128x128xf32>, vector<16x128xf32> -> vector<16x128xf32>
    %cst_107 = arith.constant dense<0.000000e+00> : vector<16x128xf32>
    %90 = tpu.matmul %86, %89, %cst_107 {dimension_numbers = #tpu.dot_dimension_numbers<[1], [0], [0], [1], [0, 0, 1, 1], [], []>} : vector<16x16xf32>, vector<16x128xf32>, vector<16x128xf32> -> vector<16x128xf32>
    %91 = arith.addf %84, %90 : vector<16x128xf32>
    %c1_108 = arith.constant 1 : index
    %c2_109 = arith.constant 2 : index
    %c0_110 = arith.constant 0 : index
    %c0_111 = arith.constant 0 : index
    %92 = vector.load %arg3[%c1_108, %c2_109, %c0_110, %c0_111] : memref<5x3x16x16xf32, #tpu.memory_space<vmem>>, vector<1x1x16x16xf32>
    %93 = vector.shape_cast %92 : vector<1x1x16x16xf32> to vector<16x16xf32>
    %c1_112 = arith.constant 1 : index
    %c2_113 = arith.constant 2 : index
    %c0_114 = arith.constant 0 : index
    %c0_115 = arith.constant 0 : index
    %94 = vector.load %arg5[%c1_112, %c2_113, %c0_114, %c0_115] : memref<5x3x128x128xf32, #tpu.memory_space<vmem>>, vector<1x1x128x128xf32>
    %95 = vector.shape_cast %94 : vector<1x1x128x128xf32> to vector<128x128xf32>
    %cst_116 = arith.constant dense<0.000000e+00> : vector<16x128xf32>
    %96 = tpu.matmul %78, %95, %cst_116 {dimension_numbers = #tpu.dot_dimension_numbers<[1], [0], [0], [1], [0, 0, 1, 1], [], []>} : vector<16x128xf32>, vector<128x128xf32>, vector<16x128xf32> -> vector<16x128xf32>
    %cst_117 = arith.constant dense<0.000000e+00> : vector<16x128xf32>
    %97 = tpu.matmul %93, %96, %cst_117 {dimension_numbers = #tpu.dot_dimension_numbers<[1], [0], [0], [1], [0, 0, 1, 1], [], []>} : vector<16x16xf32>, vector<16x128xf32>, vector<16x128xf32> -> vector<16x128xf32>
    %98 = arith.addf %91, %97 : vector<16x128xf32>
    %c2_118 = arith.constant 2 : index
    %c0_119 = arith.constant 0 : index
    %c0_120 = arith.constant 0 : index
    %99 = vector.load %arg6[%c2_118, %c0_119, %c0_120] : memref<6x16x128xf32, #tpu.memory_space<vmem>>, vector<1x16x128xf32>
    %100 = vector.shape_cast %99 : vector<1x16x128xf32> to vector<16x128xf32>
    %101 = arith.addf %98, %100 : vector<16x128xf32>
    %cst_121 = arith.constant 0.000000e+00 : f32
    %102 = vector.broadcast %cst_121 : f32 to vector<16x128xf32>
    %103 = arith.maximumf %101, %102 : vector<16x128xf32>
    %c2_122 = arith.constant 2 : index
    %c0_123 = arith.constant 0 : index
    %c0_124 = arith.constant 0 : index
    %c0_125 = arith.constant 0 : index
    %104 = vector.load %arg3[%c2_122, %c0_123, %c0_124, %c0_125] : memref<5x3x16x16xf32, #tpu.memory_space<vmem>>, vector<1x1x16x16xf32>
    %105 = vector.shape_cast %104 : vector<1x1x16x16xf32> to vector<16x16xf32>
    %c2_126 = arith.constant 2 : index
    %c0_127 = arith.constant 0 : index
    %c0_128 = arith.constant 0 : index
    %c0_129 = arith.constant 0 : index
    %106 = vector.load %arg5[%c2_126, %c0_127, %c0_128, %c0_129] : memref<5x3x128x128xf32, #tpu.memory_space<vmem>>, vector<1x1x128x128xf32>
    %107 = vector.shape_cast %106 : vector<1x1x128x128xf32> to vector<128x128xf32>
    %cst_130 = arith.constant dense<0.000000e+00> : vector<16x128xf32>
    %108 = tpu.matmul %103, %107, %cst_130 {dimension_numbers = #tpu.dot_dimension_numbers<[1], [0], [0], [1], [0, 0, 1, 1], [], []>} : vector<16x128xf32>, vector<128x128xf32>, vector<16x128xf32> -> vector<16x128xf32>
    %cst_131 = arith.constant dense<0.000000e+00> : vector<16x128xf32>
    %109 = tpu.matmul %105, %108, %cst_131 {dimension_numbers = #tpu.dot_dimension_numbers<[1], [0], [0], [1], [0, 0, 1, 1], [], []>} : vector<16x16xf32>, vector<16x128xf32>, vector<16x128xf32> -> vector<16x128xf32>
    %c2_132 = arith.constant 2 : index
    %c1_133 = arith.constant 1 : index
    %c0_134 = arith.constant 0 : index
    %c0_135 = arith.constant 0 : index
    %110 = vector.load %arg3[%c2_132, %c1_133, %c0_134, %c0_135] : memref<5x3x16x16xf32, #tpu.memory_space<vmem>>, vector<1x1x16x16xf32>
    %111 = vector.shape_cast %110 : vector<1x1x16x16xf32> to vector<16x16xf32>
    %c2_136 = arith.constant 2 : index
    %c1_137 = arith.constant 1 : index
    %c0_138 = arith.constant 0 : index
    %c0_139 = arith.constant 0 : index
    %112 = vector.load %arg5[%c2_136, %c1_137, %c0_138, %c0_139] : memref<5x3x128x128xf32, #tpu.memory_space<vmem>>, vector<1x1x128x128xf32>
    %113 = vector.shape_cast %112 : vector<1x1x128x128xf32> to vector<128x128xf32>
    %cst_140 = arith.constant dense<0.000000e+00> : vector<16x128xf32>
    %114 = tpu.matmul %103, %113, %cst_140 {dimension_numbers = #tpu.dot_dimension_numbers<[1], [0], [0], [1], [0, 0, 1, 1], [], []>} : vector<16x128xf32>, vector<128x128xf32>, vector<16x128xf32> -> vector<16x128xf32>
    %cst_141 = arith.constant dense<0.000000e+00> : vector<16x128xf32>
    %115 = tpu.matmul %111, %114, %cst_141 {dimension_numbers = #tpu.dot_dimension_numbers<[1], [0], [0], [1], [0, 0, 1, 1], [], []>} : vector<16x16xf32>, vector<16x128xf32>, vector<16x128xf32> -> vector<16x128xf32>
    %116 = arith.addf %109, %115 : vector<16x128xf32>
    %c2_142 = arith.constant 2 : index
    %c2_143 = arith.constant 2 : index
    %c0_144 = arith.constant 0 : index
    %c0_145 = arith.constant 0 : index
    %117 = vector.load %arg3[%c2_142, %c2_143, %c0_144, %c0_145] : memref<5x3x16x16xf32, #tpu.memory_space<vmem>>, vector<1x1x16x16xf32>
    %118 = vector.shape_cast %117 : vector<1x1x16x16xf32> to vector<16x16xf32>
    %c2_146 = arith.constant 2 : index
    %c2_147 = arith.constant 2 : index
    %c0_148 = arith.constant 0 : index
    %c0_149 = arith.constant 0 : index
    %119 = vector.load %arg5[%c2_146, %c2_147, %c0_148, %c0_149] : memref<5x3x128x128xf32, #tpu.memory_space<vmem>>, vector<1x1x128x128xf32>
    %120 = vector.shape_cast %119 : vector<1x1x128x128xf32> to vector<128x128xf32>
    %cst_150 = arith.constant dense<0.000000e+00> : vector<16x128xf32>
    %121 = tpu.matmul %103, %120, %cst_150 {dimension_numbers = #tpu.dot_dimension_numbers<[1], [0], [0], [1], [0, 0, 1, 1], [], []>} : vector<16x128xf32>, vector<128x128xf32>, vector<16x128xf32> -> vector<16x128xf32>
    %cst_151 = arith.constant dense<0.000000e+00> : vector<16x128xf32>
    %122 = tpu.matmul %118, %121, %cst_151 {dimension_numbers = #tpu.dot_dimension_numbers<[1], [0], [0], [1], [0, 0, 1, 1], [], []>} : vector<16x16xf32>, vector<16x128xf32>, vector<16x128xf32> -> vector<16x128xf32>
    %123 = arith.addf %116, %122 : vector<16x128xf32>
    %c3_152 = arith.constant 3 : index
    %c0_153 = arith.constant 0 : index
    %c0_154 = arith.constant 0 : index
    %124 = vector.load %arg6[%c3_152, %c0_153, %c0_154] : memref<6x16x128xf32, #tpu.memory_space<vmem>>, vector<1x16x128xf32>
    %125 = vector.shape_cast %124 : vector<1x16x128xf32> to vector<16x128xf32>
    %126 = arith.addf %123, %125 : vector<16x128xf32>
    %cst_155 = arith.constant 0.000000e+00 : f32
    %127 = vector.broadcast %cst_155 : f32 to vector<16x128xf32>
    %128 = arith.maximumf %126, %127 : vector<16x128xf32>
    %c3_156 = arith.constant 3 : index
    %c0_157 = arith.constant 0 : index
    %c0_158 = arith.constant 0 : index
    %c0_159 = arith.constant 0 : index
    %129 = vector.load %arg3[%c3_156, %c0_157, %c0_158, %c0_159] : memref<5x3x16x16xf32, #tpu.memory_space<vmem>>, vector<1x1x16x16xf32>
    %130 = vector.shape_cast %129 : vector<1x1x16x16xf32> to vector<16x16xf32>
    %c3_160 = arith.constant 3 : index
    %c0_161 = arith.constant 0 : index
    %c0_162 = arith.constant 0 : index
    %c0_163 = arith.constant 0 : index
    %131 = vector.load %arg5[%c3_160, %c0_161, %c0_162, %c0_163] : memref<5x3x128x128xf32, #tpu.memory_space<vmem>>, vector<1x1x128x128xf32>
    %132 = vector.shape_cast %131 : vector<1x1x128x128xf32> to vector<128x128xf32>
    %cst_164 = arith.constant dense<0.000000e+00> : vector<16x128xf32>
    %133 = tpu.matmul %128, %132, %cst_164 {dimension_numbers = #tpu.dot_dimension_numbers<[1], [0], [0], [1], [0, 0, 1, 1], [], []>} : vector<16x128xf32>, vector<128x128xf32>, vector<16x128xf32> -> vector<16x128xf32>
    %cst_165 = arith.constant dense<0.000000e+00> : vector<16x128xf32>
    %134 = tpu.matmul %130, %133, %cst_165 {dimension_numbers = #tpu.dot_dimension_numbers<[1], [0], [0], [1], [0, 0, 1, 1], [], []>} : vector<16x16xf32>, vector<16x128xf32>, vector<16x128xf32> -> vector<16x128xf32>
    %c3_166 = arith.constant 3 : index
    %c1_167 = arith.constant 1 : index
    %c0_168 = arith.constant 0 : index
    %c0_169 = arith.constant 0 : index
    %135 = vector.load %arg3[%c3_166, %c1_167, %c0_168, %c0_169] : memref<5x3x16x16xf32, #tpu.memory_space<vmem>>, vector<1x1x16x16xf32>
    %136 = vector.shape_cast %135 : vector<1x1x16x16xf32> to vector<16x16xf32>
    %c3_170 = arith.constant 3 : index
    %c1_171 = arith.constant 1 : index
    %c0_172 = arith.constant 0 : index
    %c0_173 = arith.constant 0 : index
    %137 = vector.load %arg5[%c3_170, %c1_171, %c0_172, %c0_173] : memref<5x3x128x128xf32, #tpu.memory_space<vmem>>, vector<1x1x128x128xf32>
    %138 = vector.shape_cast %137 : vector<1x1x128x128xf32> to vector<128x128xf32>
    %cst_174 = arith.constant dense<0.000000e+00> : vector<16x128xf32>
    %139 = tpu.matmul %128, %138, %cst_174 {dimension_numbers = #tpu.dot_dimension_numbers<[1], [0], [0], [1], [0, 0, 1, 1], [], []>} : vector<16x128xf32>, vector<128x128xf32>, vector<16x128xf32> -> vector<16x128xf32>
    %cst_175 = arith.constant dense<0.000000e+00> : vector<16x128xf32>
    %140 = tpu.matmul %136, %139, %cst_175 {dimension_numbers = #tpu.dot_dimension_numbers<[1], [0], [0], [1], [0, 0, 1, 1], [], []>} : vector<16x16xf32>, vector<16x128xf32>, vector<16x128xf32> -> vector<16x128xf32>
    %141 = arith.addf %134, %140 : vector<16x128xf32>
    %c3_176 = arith.constant 3 : index
    %c2_177 = arith.constant 2 : index
    %c0_178 = arith.constant 0 : index
    %c0_179 = arith.constant 0 : index
    %142 = vector.load %arg3[%c3_176, %c2_177, %c0_178, %c0_179] : memref<5x3x16x16xf32, #tpu.memory_space<vmem>>, vector<1x1x16x16xf32>
    %143 = vector.shape_cast %142 : vector<1x1x16x16xf32> to vector<16x16xf32>
    %c3_180 = arith.constant 3 : index
    %c2_181 = arith.constant 2 : index
    %c0_182 = arith.constant 0 : index
    %c0_183 = arith.constant 0 : index
    %144 = vector.load %arg5[%c3_180, %c2_181, %c0_182, %c0_183] : memref<5x3x128x128xf32, #tpu.memory_space<vmem>>, vector<1x1x128x128xf32>
    %145 = vector.shape_cast %144 : vector<1x1x128x128xf32> to vector<128x128xf32>
    %cst_184 = arith.constant dense<0.000000e+00> : vector<16x128xf32>
    %146 = tpu.matmul %128, %145, %cst_184 {dimension_numbers = #tpu.dot_dimension_numbers<[1], [0], [0], [1], [0, 0, 1, 1], [], []>} : vector<16x128xf32>, vector<128x128xf32>, vector<16x128xf32> -> vector<16x128xf32>
    %cst_185 = arith.constant dense<0.000000e+00> : vector<16x128xf32>
    %147 = tpu.matmul %143, %146, %cst_185 {dimension_numbers = #tpu.dot_dimension_numbers<[1], [0], [0], [1], [0, 0, 1, 1], [], []>} : vector<16x16xf32>, vector<16x128xf32>, vector<16x128xf32> -> vector<16x128xf32>
    %148 = arith.addf %141, %147 : vector<16x128xf32>
    %c4_186 = arith.constant 4 : index
    %c0_187 = arith.constant 0 : index
    %c0_188 = arith.constant 0 : index
    %149 = vector.load %arg6[%c4_186, %c0_187, %c0_188] : memref<6x16x128xf32, #tpu.memory_space<vmem>>, vector<1x16x128xf32>
    %150 = vector.shape_cast %149 : vector<1x16x128xf32> to vector<16x128xf32>
    %151 = arith.addf %148, %150 : vector<16x128xf32>
    %cst_189 = arith.constant 0.000000e+00 : f32
    %152 = vector.broadcast %cst_189 : f32 to vector<16x128xf32>
    %153 = arith.maximumf %151, %152 : vector<16x128xf32>
    %c4_190 = arith.constant 4 : index
    %c0_191 = arith.constant 0 : index
    %c0_192 = arith.constant 0 : index
    %c0_193 = arith.constant 0 : index
    %154 = vector.load %arg3[%c4_190, %c0_191, %c0_192, %c0_193] : memref<5x3x16x16xf32, #tpu.memory_space<vmem>>, vector<1x1x16x16xf32>
    %155 = vector.shape_cast %154 : vector<1x1x16x16xf32> to vector<16x16xf32>
    %c4_194 = arith.constant 4 : index
    %c0_195 = arith.constant 0 : index
    %c0_196 = arith.constant 0 : index
    %c0_197 = arith.constant 0 : index
    %156 = vector.load %arg5[%c4_194, %c0_195, %c0_196, %c0_197] : memref<5x3x128x128xf32, #tpu.memory_space<vmem>>, vector<1x1x128x128xf32>
    %157 = vector.shape_cast %156 : vector<1x1x128x128xf32> to vector<128x128xf32>
    %cst_198 = arith.constant dense<0.000000e+00> : vector<16x128xf32>
    %158 = tpu.matmul %153, %157, %cst_198 {dimension_numbers = #tpu.dot_dimension_numbers<[1], [0], [0], [1], [0, 0, 1, 1], [], []>} : vector<16x128xf32>, vector<128x128xf32>, vector<16x128xf32> -> vector<16x128xf32>
    %cst_199 = arith.constant dense<0.000000e+00> : vector<16x128xf32>
    %159 = tpu.matmul %155, %158, %cst_199 {dimension_numbers = #tpu.dot_dimension_numbers<[1], [0], [0], [1], [0, 0, 1, 1], [], []>} : vector<16x16xf32>, vector<16x128xf32>, vector<16x128xf32> -> vector<16x128xf32>
    %c4_200 = arith.constant 4 : index
    %c1_201 = arith.constant 1 : index
    %c0_202 = arith.constant 0 : index
    %c0_203 = arith.constant 0 : index
    %160 = vector.load %arg3[%c4_200, %c1_201, %c0_202, %c0_203] : memref<5x3x16x16xf32, #tpu.memory_space<vmem>>, vector<1x1x16x16xf32>
    %161 = vector.shape_cast %160 : vector<1x1x16x16xf32> to vector<16x16xf32>
    %c4_204 = arith.constant 4 : index
    %c1_205 = arith.constant 1 : index
    %c0_206 = arith.constant 0 : index
    %c0_207 = arith.constant 0 : index
    %162 = vector.load %arg5[%c4_204, %c1_205, %c0_206, %c0_207] : memref<5x3x128x128xf32, #tpu.memory_space<vmem>>, vector<1x1x128x128xf32>
    %163 = vector.shape_cast %162 : vector<1x1x128x128xf32> to vector<128x128xf32>
    %cst_208 = arith.constant dense<0.000000e+00> : vector<16x128xf32>
    %164 = tpu.matmul %153, %163, %cst_208 {dimension_numbers = #tpu.dot_dimension_numbers<[1], [0], [0], [1], [0, 0, 1, 1], [], []>} : vector<16x128xf32>, vector<128x128xf32>, vector<16x128xf32> -> vector<16x128xf32>
    %cst_209 = arith.constant dense<0.000000e+00> : vector<16x128xf32>
    %165 = tpu.matmul %161, %164, %cst_209 {dimension_numbers = #tpu.dot_dimension_numbers<[1], [0], [0], [1], [0, 0, 1, 1], [], []>} : vector<16x16xf32>, vector<16x128xf32>, vector<16x128xf32> -> vector<16x128xf32>
    %166 = arith.addf %159, %165 : vector<16x128xf32>
    %c4_210 = arith.constant 4 : index
    %c2_211 = arith.constant 2 : index
    %c0_212 = arith.constant 0 : index
    %c0_213 = arith.constant 0 : index
    %167 = vector.load %arg3[%c4_210, %c2_211, %c0_212, %c0_213] : memref<5x3x16x16xf32, #tpu.memory_space<vmem>>, vector<1x1x16x16xf32>
    %168 = vector.shape_cast %167 : vector<1x1x16x16xf32> to vector<16x16xf32>
    %c4_214 = arith.constant 4 : index
    %c2_215 = arith.constant 2 : index
    %c0_216 = arith.constant 0 : index
    %c0_217 = arith.constant 0 : index
    %169 = vector.load %arg5[%c4_214, %c2_215, %c0_216, %c0_217] : memref<5x3x128x128xf32, #tpu.memory_space<vmem>>, vector<1x1x128x128xf32>
    %170 = vector.shape_cast %169 : vector<1x1x128x128xf32> to vector<128x128xf32>
    %cst_218 = arith.constant dense<0.000000e+00> : vector<16x128xf32>
    %171 = tpu.matmul %153, %170, %cst_218 {dimension_numbers = #tpu.dot_dimension_numbers<[1], [0], [0], [1], [0, 0, 1, 1], [], []>} : vector<16x128xf32>, vector<128x128xf32>, vector<16x128xf32> -> vector<16x128xf32>
    %cst_219 = arith.constant dense<0.000000e+00> : vector<16x128xf32>
    %172 = tpu.matmul %168, %171, %cst_219 {dimension_numbers = #tpu.dot_dimension_numbers<[1], [0], [0], [1], [0, 0, 1, 1], [], []>} : vector<16x16xf32>, vector<16x128xf32>, vector<16x128xf32> -> vector<16x128xf32>
    %173 = arith.addf %166, %172 : vector<16x128xf32>
    %c5_220 = arith.constant 5 : index
    %c0_221 = arith.constant 0 : index
    %c0_222 = arith.constant 0 : index
    %174 = vector.load %arg6[%c5_220, %c0_221, %c0_222] : memref<6x16x128xf32, #tpu.memory_space<vmem>>, vector<1x16x128xf32>
    %175 = vector.shape_cast %174 : vector<1x16x128xf32> to vector<16x128xf32>
    %176 = arith.addf %173, %175 : vector<16x128xf32>
    %c0_223 = arith.constant 0 : index
    %c0_224 = arith.constant 0 : index
    %177 = vector.load %arg7[%c0_223, %c0_224] : memref<128x256xf32, #tpu.memory_space<vmem>>, vector<128x256xf32>
    %cst_225 = arith.constant dense<0.000000e+00> : vector<16x256xf32>
    %178 = tpu.matmul %176, %177, %cst_225 {dimension_numbers = #tpu.dot_dimension_numbers<[1], [0], [0], [1], [0, 0, 1, 1], [], []>} : vector<16x128xf32>, vector<128x256xf32>, vector<16x256xf32> -> vector<16x256xf32>
    %c0_226 = arith.constant 0 : index
    %c0_227 = arith.constant 0 : index
    %179 = vector.load %arg8[%c0_226, %c0_227] : memref<16x256xf32, #tpu.memory_space<vmem>>, vector<16x256xf32>
    %180 = arith.mulf %178, %179 : vector<16x256xf32>
    %c0_228 = arith.constant 0 : index
    %c0_229 = arith.constant 0 : index
    %181 = vector.load %arg9[%c0_228, %c0_229] : memref<2x16xf32, #tpu.memory_space<vmem>>, vector<2x16xf32>
    %cst_230 = arith.constant dense<0.000000e+00> : vector<2x256xf32>
    %182 = tpu.matmul %181, %180, %cst_230 {dimension_numbers = #tpu.dot_dimension_numbers<[1], [0], [0], [1], [0, 0, 1, 1], [], []>} : vector<2x16xf32>, vector<16x256xf32>, vector<2x256xf32> -> vector<2x256xf32>
    %c0_231 = arith.constant 0 : index
    %c0_232 = arith.constant 0 : index
    %183 = vector.load %arg10[%c0_231, %c0_232] : memref<256x128xf32, #tpu.memory_space<vmem>>, vector<256x128xf32>
    %cst_233 = arith.constant dense<0.000000e+00> : vector<2x128xf32>
    %184 = tpu.matmul %182, %183, %cst_233 {dimension_numbers = #tpu.dot_dimension_numbers<[1], [0], [0], [1], [0, 0, 1, 1], [], []>} : vector<2x256xf32>, vector<256x128xf32>, vector<2x128xf32> -> vector<2x128xf32>
    %c0_234 = arith.constant 0 : index
    %c0_235 = arith.constant 0 : index
    %185 = vector.load %arg12[%c0_234, %c0_235] : memref<4x128xf32, #tpu.memory_space<vmem>>, vector<1x128xf32>
    %186 = vector.broadcast %185 : vector<1x128xf32> to vector<2x128xf32>
    %187 = arith.addf %184, %186 : vector<2x128xf32>
    %c0_236 = arith.constant 0 : index
    %c0_237 = arith.constant 0 : index
    %188 = vector.load %arg14[%c0_236, %c0_237] : memref<2x128xf32, #tpu.memory_space<vmem>>, vector<2x128xf32>
    tpu.vector_store %arg14[%c0_236, %c0_237], %187 {strides = array<i32>} : memref<2x128xf32, #tpu.memory_space<vmem>>, vector<2x128xf32>,
    %c0_238 = arith.constant 0 : index
    %c0_239 = arith.constant 0 : index
    %c0_240 = arith.constant 0 : index
    %189 = vector.load %arg11[%c0_238, %c0_239, %c0_240] : memref<3x128x128xf32, #tpu.memory_space<vmem>>, vector<1x128x128xf32>
    %190 = vector.shape_cast %189 : vector<1x128x128xf32> to vector<128x128xf32>
    %cst_241 = arith.constant dense<0.000000e+00> : vector<2x128xf32>
    %191 = tpu.matmul %187, %190, %cst_241 {dimension_numbers = #tpu.dot_dimension_numbers<[1], [0], [0], [1], [0, 0, 1, 1], [], []>} : vector<2x128xf32>, vector<128x128xf32>, vector<2x128xf32> -> vector<2x128xf32>
    %c1_242 = arith.constant 1 : index
    %c0_243 = arith.constant 0 : index
    %192 = vector.load %arg12[%c1_242, %c0_243] : memref<4x128xf32, #tpu.memory_space<vmem>>, vector<1x128xf32>
    %193 = vector.broadcast %192 : vector<1x128xf32> to vector<2x128xf32>
    %194 = arith.addf %191, %193 : vector<2x128xf32>
    %cst_244 = arith.constant 0.000000e+00 : f32
    %195 = vector.broadcast %cst_244 : f32 to vector<2x128xf32>
    %196 = arith.maximumf %194, %195 : vector<2x128xf32>
    %c1_245 = arith.constant 1 : index
    %c0_246 = arith.constant 0 : index
    %c0_247 = arith.constant 0 : index
    %197 = vector.load %arg11[%c1_245, %c0_246, %c0_247] : memref<3x128x128xf32, #tpu.memory_space<vmem>>, vector<1x128x128xf32>
    %198 = vector.shape_cast %197 : vector<1x128x128xf32> to vector<128x128xf32>
    %cst_248 = arith.constant dense<0.000000e+00> : vector<2x128xf32>
    %199 = tpu.matmul %196, %198, %cst_248 {dimension_numbers = #tpu.dot_dimension_numbers<[1], [0], [0], [1], [0, 0, 1, 1], [], []>} : vector<2x128xf32>, vector<128x128xf32>, vector<2x128xf32> -> vector<2x128xf32>
    %c2_249 = arith.constant 2 : index
    %c0_250 = arith.constant 0 : index
    %200 = vector.load %arg12[%c2_249, %c0_250] : memref<4x128xf32, #tpu.memory_space<vmem>>, vector<1x128xf32>
    %201 = vector.broadcast %200 : vector<1x128xf32> to vector<2x128xf32>
    %202 = arith.addf %199, %201 : vector<2x128xf32>
    %cst_251 = arith.constant 0.000000e+00 : f32
    %203 = vector.broadcast %cst_251 : f32 to vector<2x128xf32>
    %204 = arith.maximumf %202, %203 : vector<2x128xf32>
    %c2_252 = arith.constant 2 : index
    %c0_253 = arith.constant 0 : index
    %c0_254 = arith.constant 0 : index
    %205 = vector.load %arg11[%c2_252, %c0_253, %c0_254] : memref<3x128x128xf32, #tpu.memory_space<vmem>>, vector<1x128x128xf32>
    %206 = vector.shape_cast %205 : vector<1x128x128xf32> to vector<128x128xf32>
    %cst_255 = arith.constant dense<0.000000e+00> : vector<2x128xf32>
    %207 = tpu.matmul %204, %206, %cst_255 {dimension_numbers = #tpu.dot_dimension_numbers<[1], [0], [0], [1], [0, 0, 1, 1], [], []>} : vector<2x128xf32>, vector<128x128xf32>, vector<2x128xf32> -> vector<2x128xf32>
    %c3_256 = arith.constant 3 : index
    %c0_257 = arith.constant 0 : index
    %208 = vector.load %arg12[%c3_256, %c0_257] : memref<4x128xf32, #tpu.memory_space<vmem>>, vector<1x128xf32>
    %209 = vector.broadcast %208 : vector<1x128xf32> to vector<2x128xf32>
    %210 = arith.addf %207, %209 : vector<2x128xf32>
    %c0_258 = arith.constant 0 : index
    %c0_259 = arith.constant 0 : index
    %211 = vector.load %arg13[%c0_258, %c0_259] : memref<2x128xf32, #tpu.memory_space<vmem>>, vector<2x128xf32>
    tpu.vector_store %arg13[%c0_258, %c0_259], %210 {strides = array<i32>} : memref<2x128xf32, #tpu.memory_space<vmem>>, vector<2x128xf32>,
    return
  }
  func.func @transform_0(%arg0: i32) -> (i32, i32) {
    %c0_i32 = arith.constant 0 : i32
    %c0_i32_0 = arith.constant 0 : i32
    return %arg0, %c0_i32 : i32, i32
  }
  func.func @transform_1(%arg0: i32) -> (i32, i32, i32) {
    %c0_i32 = arith.constant 0 : i32
    %c0_i32_0 = arith.constant 0 : i32
    %c0_i32_1 = arith.constant 0 : i32
    %c0_i32_2 = arith.constant 0 : i32
    return %c0_i32, %c0_i32_0, %c0_i32_1 : i32, i32, i32
  }
  func.func @transform_2(%arg0: i32) -> (i32, i32, i32, i32) {
    %c0_i32 = arith.constant 0 : i32
    %c0_i32_0 = arith.constant 0 : i32
    %c0_i32_1 = arith.constant 0 : i32
    %c0_i32_2 = arith.constant 0 : i32
    %c0_i32_3 = arith.constant 0 : i32
    return %c0_i32, %c0_i32_0, %c0_i32_1, %c0_i32_2 : i32, i32, i32, i32
  }
  func.func @transform_3(%arg0: i32) -> (i32, i32, i32) {
    %c0_i32 = arith.constant 0 : i32
    %c0_i32_0 = arith.constant 0 : i32
    %c0_i32_1 = arith.constant 0 : i32
    %c0_i32_2 = arith.constant 0 : i32
    return %c0_i32, %c0_i32_0, %c0_i32_1 : i32, i32, i32
  }
  func.func @transform_4(%arg0: i32) -> (i32, i32, i32, i32) {
    %c0_i32 = arith.constant 0 : i32
    %c0_i32_0 = arith.constant 0 : i32
    %c0_i32_1 = arith.constant 0 : i32
    %c0_i32_2 = arith.constant 0 : i32
    %c0_i32_3 = arith.constant 0 : i32
    return %c0_i32, %c0_i32_0, %c0_i32_1, %c0_i32_2 : i32, i32, i32, i32
  }
  func.func @transform_5(%arg0: i32) -> (i32, i32, i32) {
    %c0_i32 = arith.constant 0 : i32
    %c0_i32_0 = arith.constant 0 : i32
    %c0_i32_1 = arith.constant 0 : i32
    %c0_i32_2 = arith.constant 0 : i32
    return %c0_i32, %c0_i32_0, %c0_i32_1 : i32, i32, i32
  }
  func.func @transform_6(%arg0: i32) -> (i32, i32) {
    %c0_i32 = arith.constant 0 : i32
    %c0_i32_0 = arith.constant 0 : i32
    %c0_i32_1 = arith.constant 0 : i32
    return %c0_i32, %c0_i32_0 : i32, i32
  }
  func.func @transform_7(%arg0: i32) -> (i32, i32) {
    %c0_i32 = arith.constant 0 : i32
    %c0_i32_0 = arith.constant 0 : i32
    %c0_i32_1 = arith.constant 0 : i32
    return %c0_i32, %c0_i32_0 : i32, i32
  }
  func.func @transform_8(%arg0: i32) -> (i32, i32) {
    %c0_i32 = arith.constant 0 : i32
    %c0_i32_0 = arith.constant 0 : i32
    %c0_i32_1 = arith.constant 0 : i32
    return %c0_i32, %c0_i32_0 : i32, i32
  }
  func.func @transform_9(%arg0: i32) -> (i32, i32) {
    %c0_i32 = arith.constant 0 : i32
    %c0_i32_0 = arith.constant 0 : i32
    %c0_i32_1 = arith.constant 0 : i32
    return %c0_i32, %c0_i32_0 : i32, i32
  }
  func.func @transform_10(%arg0: i32) -> (i32, i32, i32) {
    %c0_i32 = arith.constant 0 : i32
    %c0_i32_0 = arith.constant 0 : i32
    %c0_i32_1 = arith.constant 0 : i32
    %c0_i32_2 = arith.constant 0 : i32
    return %c0_i32, %c0_i32_0, %c0_i32_1 : i32, i32, i32
  }
  func.func @transform_11(%arg0: i32) -> (i32, i32) {
    %c0_i32 = arith.constant 0 : i32
    %c0_i32_0 = arith.constant 0 : i32
    %c0_i32_1 = arith.constant 0 : i32
    return %c0_i32, %c0_i32_0 : i32, i32
  }
  func.func @transform_12(%arg0: i32) -> (i32, i32) {
    %c0_i32 = arith.constant 0 : i32
    %c0_i32_0 = arith.constant 0 : i32
    return %arg0, %c0_i32 : i32, i32
  }
  func.func @transform_13(%arg0: i32) -> (i32, i32) {
    %c0_i32 = arith.constant 0 : i32
    %c0_i32_0 = arith.constant 0 : i32
    return %arg0, %c0_i32 : i32, i32
  }
}

</mosaic_0001>

<bundles_post_ra>
// kernel: tpu_custom_call.1
= control target key start
LH: loop header
LB: loop body
LE: loop exit
PB: predicated region body
PF: predicated region fallthrough
CT: control target
= control target key end

     0   :  { %19 = vsyncpa [#allocation3], 0  ;;  %s2740_s0 = inlined_call_operand.vmem [shape: f32[8,128], index: 0, kind: input, shape index: {}]   ;;  %s2741_s1 = inlined_call_operand.vmem [shape: f32[7,16,8], index: 1, kind: input, shape index: {}]   ;;  %s2742_s2 = inlined_call_operand.hbm [shape: f32[5,3,16,16], index: 2, kind: input, shape index: {}]   ;;  %s2743_s3 = inlined_call_operand.hbm [shape: f32[7,128,128], index: 3, kind: input, shape index: {}]   ;;  %s2744_s4 = inlined_call_operand.hbm [shape: f32[5,3,128,128], index: 4, kind: input, shape index: {}]   ;;  %s2745_s5 = inlined_call_operand.vmem [shape: f32[6,16,128], index: 5, kind: input, shape index: {}]   ;;  %s2746_s6 = inlined_call_operand.hbm [shape: f32[128,256], index: 6, kind: input, shape index: {}]   ;;  %s2747_s7 = inlined_call_operand.vmem [shape: f32[16,256], index: 7, kind: input, shape index: {}]   ;;  %s2748_s8 = inlined_call_operand.vmem [shape: f32[2,16], index: 8, kind: input, shape index: {}]   ;;  %s2749_s9 = inlined_call_operand.hbm [shape: f32[256,128], index: 9, kind: input, shape index: {}]   ;;  %s2750_s10 = inlined_call_operand.hbm [shape: f32[3,128,128], index: 10, kind: input, shape index: {}]   ;;  %s2751_s11 = inlined_call_operand.vmem [shape: f32[4,128], index: 11, kind: input, shape index: {}]   ;;  %s2752_s12 = inlined_call_operand.hbm [shape: f32[2,128], index: 12, kind: output, shape index: {0}]   ;;  %s2753_s13 = inlined_call_operand.hbm [shape: f32[2,128], index: 13, kind: output, shape index: {1}]  }
   0x1   :  { %20 = vsyncpa [#allocation6], 0 }
   0x2   :  { %21 = vsyncpa [#allocation9], 0 }
   0x3   :  { %22 = vsyncpa [#allocation12], 0 }
   0x4   :  { %23 = vsyncpa [#allocation4], 0 }
   0x5   :  { %24 = vsyncpa [#allocation15], 0  ;;  %s46_s27 = sshll.u32 %s2743_s3, 4  ;;  %s2408_s28 = smov [#allocation5]   ;;  %s47_s27 = int_to_ptr.hbm [resolvable:$true] %s46_s27 }
   0x6   :  { %s48_s29 = sshll.u32 %s2408_s28, 4  ;;  %s74_s15 = sshll.u32 %s2746_s6, 4  ;;  %s49_s29 = int_to_ptr.vmem [resolvable:$true] %s48_s29  ;;  %s75_s15 = int_to_ptr.hbm [resolvable:$true] %s74_s15 }
   0x7   :  { %s2409_s16 = smov 128   ;;  %s2410_s17 = smov 8  }
   0x8   :  { %54 = dma.hbm_to_vmem [thread:$0]  %s47_s27, 14336, %s49_s29, [#allocation6], %s2409_s16, %s2409_s16, %s2410_s17  }
   0x9   :  { %s2411_s18 = smov [#allocation8]   ;;  %s2412_s20 = smov 256  }
   0xa   :  { %s76_s19 = sshll.u32 %s2411_s18, 4  ;;  %s2413_s3 = smov 16   ;;  %s77_s19 = int_to_ptr.vmem [resolvable:$true] %s76_s19 }
   0xb   :  { %82 = dma.hbm_to_vmem [thread:$0]  %s75_s15, 4096, %s77_s19, [#allocation9], %s2412_s20, %s2412_s20, %s2413_s3  }
   0xc   :  { %s33_s23 = sshll.u32 %s2742_s2, 4  ;;  %s2414_s24 = smov [#allocation2]   ;;  %s34_s23 = int_to_ptr.hbm [resolvable:$true] %s33_s23 }
   0xd   :  { %s35_s6 = sshll.u32 %s2414_s24, 4  ;;  %s59_s28 = sshll.u32 %s2744_s4, 4  ;;  %s36_s6 = int_to_ptr.vmem [resolvable:$true] %s35_s6  ;;  %s60_s28 = int_to_ptr.hbm [resolvable:$true] %s59_s28 }
   0xe   :  { %41 = dma.hbm_to_vmem [thread:$0]  %s34_s23, 3840, %s36_s6, [#allocation3], %s2409_s16, %s2409_s16, %s2410_s17  }
   0xf   :  { %s2415_s27 = smov [#allocation7]   ;;  %s91_s15 = sshll.u32 %s2749_s9, 4  ;;  %s92_s15 = int_to_ptr.hbm [resolvable:$true] %s91_s15 }
  0x10   :  { %s61_s29 = sshll.u32 %s2415_s27, 4  ;;  %s104_s4 = sshll.u32 %s2750_s10, 4  ;;  %s62_s29 = int_to_ptr.vmem [resolvable:$true] %s61_s29  ;;  %s105_s4 = int_to_ptr.hbm [resolvable:$true] %s104_s4 }
  0x11   :  { %67 = dma.hbm_to_vmem [thread:$0]  %s60_s28, 30720, %s62_s29, [#allocation6], %s2409_s16, %s2409_s16, %s2410_s17  }
  0x12   :  { %s2416_s19 = smov [#allocation10]   ;;  %s2417_s3 = smov [#allocation11]  }
  0x13   :  { %s93_s20 = sshll.u32 %s2416_s19, 4  ;;  %s106_s9 = sshll.u32 %s2417_s3, 4  ;;  %s94_s20 = int_to_ptr.vmem [resolvable:$true] %s93_s20  ;;  %s107_s9 = int_to_ptr.vmem [resolvable:$true] %s106_s9 }
  0x14   :  { %99 = dma.hbm_to_vmem [thread:$0]  %s92_s15, 4096, %s94_s20, [#allocation9], %s2409_s16, %s2409_s16, %s2410_s17  }
  0x15   :  { %112 = dma.hbm_to_vmem [thread:$0]  %s105_s4, 6144, %s107_s9, [#allocation12], %s2409_s16, %s2409_s16, %s2410_s17  }
  0x16   :  { %2396 = dma.done.wait [#allocation3], 3840  }
  0x17   :  { %2397 = vsyncadd [#allocation3], 4294963456 }
  0x18   :  { %2398 = dma.done.wait [#allocation6], 45056  }
  0x19   :  { %2399 = vsyncadd [#allocation6], 4294922240 }
  0x1a   :  { %2400 = dma.done.wait [#allocation9], 8192  }
  0x1b   :  { %2401 = vsyncadd [#allocation9], 4294959104 }
  0x1c   :  { %2402 = dma.done.wait [#allocation12], 6144  }
  0x1d   :  { %2403 = vsyncadd [#allocation12], 4294961152  ;;  %v197_v0 = vld [vmem:[#allocation5 + $0xf8] sm:$0xff]  ;;  %v196_v1 = vld [vmem:[#allocation5 + $0xf0] sm:$0xff]  ;;  %vm218_vm0 = vcmask 64512   ;;  %vm722_vm1 = vcmask 130048  }
  0x1e   :  { %198 = vmatpush.msra.mxu1 %v197_v0  ;;  %v195_v2 = vld [vmem:[#allocation5 + $0xe8] sm:$0xff]  ;;  %v157_v3 = vld [vmem:[#allocation5 + $0x78] sm:$0xff]  ;;  %v156_v4 = vld [vmem:[#allocation5 + $0x70] sm:$0xff]  ;;  %s2418_s2 = smov [#allocation14]   ;;  %s2102_s20 = sshll.u32 %s2753_s13, 4  ;;  %s2103_s20 = int_to_ptr.hbm [resolvable:$true] %s2102_s20 }
  0x1f   :  { %158 = vmatpush.msra.mxu0 %v157_v3  ;;  %v194_v5 = vld [vmem:[#allocation5 + $0xe0] sm:$0xff]  ;;  %v155_v6 = vld [vmem:[#allocation5 + $0x68] sm:$0xff]  ;;  %v193_v7 = vld [vmem:[#allocation5 + $0xd8] sm:$0xff]  ;;  %s2100_s18 = sshll.u32 %s2418_s2, 4  ;;  %s2419_s10 = smov [#allocation13]   ;;  %s2101_s18 = int_to_ptr.vmem [resolvable:$true] %s2100_s18 }
  0x20   :  { %199 = vmatpush.msra.mxu1 %v196_v1  ;;  %v154_v8 = vld [vmem:[#allocation5 + $0x60] sm:$0xff]  ;;  %v192_v9 = vld [vmem:[#allocation5 + $0xd0] sm:$0xff]  ;;  %v153_v10 = vld [vmem:[#allocation5 + $0x58] sm:$0xff]  ;;  %s2089_s16 = sshll.u32 %s2419_s10, 4  ;;  %s2090_s16 = int_to_ptr.vmem [resolvable:$true] %s2089_s16 }
  0x21   :  { %159 = vmatpush.msra.mxu0 %v156_v4  ;;  %v191_v11 = vld [vmem:[#allocation5 + $0xc8] sm:$0xff]  ;;  %v152_v12 = vld [vmem:[#allocation5 + $0x50] sm:$0xff]  ;;  %v190_v13 = vld [vmem:[#allocation5 + $0xc0] sm:$0xff] }
  0x22   :  { %200 = vmatpush.msra.mxu1 %v195_v2  ;;  %v151_v14 = vld [vmem:[#allocation5 + $0x48] sm:$0xff]  ;;  %v189_v15 = vld [vmem:[#allocation5 + $0xb8] sm:$0xff]  ;;  %v150_v16 = vld [vmem:[#allocation5 + $0x40] sm:$0xff] }
  0x23   :  { %160 = vmatpush.msra.mxu0 %v155_v6  ;;  %v188_v17 = vld [vmem:[#allocation5 + $0xb0] sm:$0xff]  ;;  %v149_v18 = vld [vmem:[#allocation5 + $0x38] sm:$0xff]  ;;  %v187_v19 = vld [vmem:[#allocation5 + $0xa8] sm:$0xff] }
  0x24   :  { %201 = vmatpush.msra.mxu1 %v194_v5  ;;  %v148_v20 = vld [vmem:[#allocation5 + $0x30] sm:$0xff]  ;;  %v186_v21 = vld [vmem:[#allocation5 + $0xa0] sm:$0xff]  ;;  %v147_v22 = vld [vmem:[#allocation5 + $0x28] sm:$0xff] }
  0x25   :  { %161 = vmatpush.msra.mxu0 %v154_v8  ;;  %v185_v23 = vld [vmem:[#allocation5 + $0x98] sm:$0xff]  ;;  %v146_v24 = vld [vmem:[#allocation5 + $0x20] sm:$0xff]  ;;  %v184_v25 = vld [vmem:[#allocation5 + $0x90] sm:$0xff] }
  0x26   :  { %202 = vmatpush.msra.mxu1 %v193_v7  ;;  %v145_v26 = vld [vmem:[#allocation5 + $0x18] sm:$0xff]  ;;  %v183_v27 = vld [vmem:[#allocation5 + $0x88] sm:$0xff]  ;;  %v144_v28 = vld [vmem:[#allocation5 + $0x10] sm:$0xff] }
  0x27   :  { %162 = vmatpush.msra.mxu0 %v153_v10  ;;  %v182_v29 = vld [vmem:[#allocation5 + $0x80] sm:$0xff]  ;;  %v143_v30 = vld [vmem:[#allocation5 + $0x8] sm:$0xff]  ;;  %v2526_v31 = vld [vmem:[%s2740_s0] sm:$0xff]  ;;  %s2091_s0 = sshll.u32 %s2752_s12, 4  ;;  %s2092_s0 = int_to_ptr.hbm [resolvable:$true] %s2091_s0 }
  0x28   :  { %203 = vmatpush.msra.mxu1 %v192_v9  ;;  %v142_v32 = vld [vmem:[#allocation5] sm:$0xff]  ;;  %v296_v33 = vld [vmem:[#allocation5 + $0x178] sm:$0xff]  ;;  %v295_v36 = vld [vmem:[#allocation5 + $0x170] sm:$0xff] }
  0x29   :  { %163 = vmatpush.msra.mxu0 %v152_v12  ;;  %v2120_v35 = vld [vmem:[%s2741_s1 + $0x10] sm:$0xff]  ;;  %v140_v37 = vld [vmem:[%s2741_s1] sm:$0xff]  ;;  %v294_v39 = vld [vmem:[#allocation5 + $0x168] sm:$0xff] }
  0x2a   :  { %204 = vmatpush.msra.mxu1 %v191_v11  ;;  %v293_v40 = vld [vmem:[#allocation5 + $0x160] sm:$0xff]  ;;  %v292_v41 = vld [vmem:[#allocation5 + $0x158] sm:$0xff]  ;;  %v2121_v42 = vld [vmem:[%s2741_s1 + $0x18] sm:$0xff] }
  0x2b   :  { %164 = vmatpush.msra.mxu0 %v151_v14  ;;  %v291_v43 = vld [vmem:[#allocation5 + $0x150] sm:$0xff]  ;;  %v141_v44 = vld [vmem:[%s2741_s1 + $0x8] sm:$0xff]  ;;  %v290_v45 = vld [vmem:[#allocation5 + $0x148] sm:$0xff] }
  0x2c   :  { %205 = vmatpush.msra.mxu1 %v190_v13  ;;  %v289_v46 = vld [vmem:[#allocation5 + $0x140] sm:$0xff]  ;;  %v288_v47 = vld [vmem:[#allocation5 + $0x138] sm:$0xff]  ;;  %v287_v48 = vld [vmem:[#allocation5 + $0x130] sm:$0xff] }
  0x2d   :  { %165 = vmatpush.msra.mxu0 %v150_v16  ;;  %v286_v49 = vld [vmem:[#allocation5 + $0x128] sm:$0xff]  ;;  %v285_v50 = vld [vmem:[#allocation5 + $0x120] sm:$0xff]  ;;  %v284_v51 = vld [vmem:[#allocation5 + $0x118] sm:$0xff] }
  0x2e   :  { %206 = vmatpush.msra.mxu1 %v189_v15  ;;  %v283_v52 = vld [vmem:[#allocation5 + $0x110] sm:$0xff]  ;;  %v282_v53 = vld [vmem:[#allocation5 + $0x108] sm:$0xff]  ;;  %v281_v54 = vld [vmem:[#allocation5 + $0x100] sm:$0xff] }
  0x2f   :  { %166 = vmatpush.msra.mxu0 %v149_v18  ;;  %v438_v55 = vld [vmem:[#allocation5 + $0x278] sm:$0xff]  ;;  %v437_v56 = vld [vmem:[#allocation5 + $0x270] sm:$0xff]  ;;  %v436_v57 = vld [vmem:[#allocation5 + $0x268] sm:$0xff] }
  0x30   :  { %207 = vmatpush.msra.mxu1 %v188_v17  ;;  %v435_v58 = vld [vmem:[#allocation5 + $0x260] sm:$0xff]  ;;  %v434_v60 = vld [vmem:[#allocation5 + $0x258] sm:$0xff]  ;;  %v433_v61 = vld [vmem:[#allocation5 + $0x250] sm:$0xff] }
  0x31   :  { %167 = vmatpush.msra.mxu0 %v148_v20  ;;  %v432_v62 = vld [vmem:[#allocation5 + $0x248] sm:$0xff]  ;;  %v431_v63 = vld [vmem:[#allocation5 + $0x240] sm:$0xff]  ;;  %v430_v0 = vld [vmem:[#allocation5 + $0x238] sm:$0xff] }
  0x32   :  { %208 = vmatpush.msra.mxu1 %v187_v19  ;;  %v429_v2 = vld [vmem:[#allocation5 + $0x230] sm:$0xff]  ;;  %v428_v3 = vld [vmem:[#allocation5 + $0x228] sm:$0xff]  ;;  %v427_v4 = vld [vmem:[#allocation5 + $0x220] sm:$0xff] }
  0x33   :  { %168 = vmatpush.msra.mxu0 %v147_v22  ;;  %v426_v5 = vld [vmem:[#allocation5 + $0x218] sm:$0xff]  ;;  %v425_v6 = vld [vmem:[#allocation5 + $0x210] sm:$0xff]  ;;  %v424_v10 = vld [vmem:[#allocation5 + $0x208] sm:$0xff] }
  0x34   :  { %209 = vmatpush.msra.mxu1 %v186_v21  ;;  %v2126_v7 = vld [vmem:[%s2741_s1 + $0x20] sm:$0xff]  ;;  %v367_v9 = vld [vmem:[#allocation5 + $0x1f8] sm:$0xff]  ;;  %v423_v12 = vld [vmem:[#allocation5 + $0x200] sm:$0xff] }
  0x35   :  { %169 = vmatpush.msra.mxu0 %v146_v24  ;;  %v366_v11 = vld [vmem:[#allocation5 + $0x1f0] sm:$0xff]  ;;  %v365_v13 = vld [vmem:[#allocation5 + $0x1e8] sm:$0xff]  ;;  %v364_v14 = vld [vmem:[#allocation5 + $0x1e0] sm:$0xff] }
  0x36   :  { %210 = vmatpush.msra.mxu1 %v185_v23  ;;  %v2127_v15 = vld [vmem:[%s2741_s1 + $0x28] sm:$0xff]  ;;  %v362_v17 = vld [vmem:[#allocation5 + $0x1d0] sm:$0xff]  ;;  %v361_v18 = vld [vmem:[#allocation5 + $0x1c8] sm:$0xff] }
  0x37   :  { %170 = vmatpush.msra.mxu0 %v145_v26  ;;  %v363_v16 = vld [vmem:[#allocation5 + $0x1d8] sm:$0xff]  ;;  %v360_v19 = vld [vmem:[#allocation5 + $0x1c0] sm:$0xff]  ;;  %v358_v21 = vld [vmem:[#allocation5 + $0x1b0] sm:$0xff] }
  0x38   :  { %211 = vmatpush.msra.mxu1 %v184_v25  ;;  %v359_v20 = vld [vmem:[#allocation5 + $0x1b8] sm:$0xff]  ;;  %v357_v22 = vld [vmem:[#allocation5 + $0x1a8] sm:$0xff]  ;;  %v356_v23 = vld [vmem:[#allocation5 + $0x1a0] sm:$0xff] }
  0x39   :  { %171 = vmatpush.msra.mxu0 %v144_v28  ;;  %v355_v24 = vld [vmem:[#allocation5 + $0x198] sm:$0xff]  ;;  %v354_v25 = vld [vmem:[#allocation5 + $0x190] sm:$0xff]  ;;  %v353_v26 = vld [vmem:[#allocation5 + $0x188] sm:$0xff] }
  0x3a   :  { %212 = vmatpush.msra.mxu1 %v183_v27  ;;  %v352_v27 = vld [vmem:[#allocation5 + $0x180] sm:$0xff]  ;;  %v580_v28 = vld [vmem:[#allocation5 + $0x378] sm:$0xff] }
  0x3b   :  { %172 = vmatpush.msra.mxu0 %v143_v30 }
  0x3c   :  { %213 = vmatpush.msra.mxu1 %v182_v29  ;;  %v2134_v29 = vld [vmem:[%s2741_s1 + $0x40] sm:$0xff] }
  0x3d   :  { %214 = vmatmul.f32.vlgmr.msra.gmra.mxu1 %v2526_v31  ;;  %173 = vmatpush.msra.mxu0 %v142_v32 }
  0x3e   :  { %174 = vmatmul.f32.vlgmr.msra.gmra.mxu0 %v2526_v31  ;;  %439 = vmatpush.msrb.mxu1 %v438_v55  ;;  %v508_v55 = vld [vmem:[#allocation5 + $0x2f0] sm:$0xff] }
  0x40   :  { %440 = vmatpush.msrb.mxu1 %v437_v56  ;;  %v507_v56 = vld [vmem:[#allocation5 + $0x2e8] sm:$0xff] }
  0x42   :  { %441 = vmatpush.msrb.mxu1 %v436_v57  ;;  %v506_v57 = vld [vmem:[#allocation5 + $0x2e0] sm:$0xff] }
  0x44   :  { %442 = vmatpush.msrb.mxu1 %v435_v58  ;;  %v2131_v58 = vld [vmem:[%s2741_s1 + $0x38] sm:$0xff] }
  0x46   :  { %443 = vmatpush.msrb.mxu1 %v434_v60  ;;  %v505_v60 = vld [vmem:[#allocation5 + $0x2d8] sm:$0xff] }
  0x48   :  { %444 = vmatpush.msrb.mxu1 %v433_v61  ;;  %v504_v61 = vld [vmem:[#allocation5 + $0x2d0] sm:$0xff] }
  0x4a   :  { %445 = vmatpush.msrb.mxu1 %v432_v62  ;;  %v503_v62 = vld [vmem:[#allocation5 + $0x2c8] sm:$0xff] }
  0x4c   :  { %446 = vmatpush.msrb.mxu1 %v431_v63  ;;  %v502_v63 = vld [vmem:[#allocation5 + $0x2c0] sm:$0xff] }
  0x4e   :  { %447 = vmatpush.msrb.mxu1 %v430_v0  ;;  %v501_v0 = vld [vmem:[#allocation5 + $0x2b8] sm:$0xff] }
  0x50   :  { %448 = vmatpush.msrb.mxu1 %v429_v2  ;;  %v500_v2 = vld [vmem:[#allocation5 + $0x2b0] sm:$0xff] }
  0x52   :  { %449 = vmatpush.msrb.mxu1 %v428_v3  ;;  %v499_v3 = vld [vmem:[#allocation5 + $0x2a8] sm:$0xff] }
  0x54   :  { %450 = vmatpush.msrb.mxu1 %v427_v4  ;;  %v498_v4 = vld [vmem:[#allocation5 + $0x2a0] sm:$0xff] }
  0x56   :  { %451 = vmatpush.msrb.mxu1 %v426_v5  ;;  %v497_v5 = vld [vmem:[#allocation5 + $0x298] sm:$0xff] }
  0x58   :  { %452 = vmatpush.msrb.mxu1 %v425_v6  ;;  %v496_v6 = vld [vmem:[#allocation5 + $0x290] sm:$0xff] }
  0x5a   :  { %453 = vmatpush.msrb.mxu1 %v424_v10 }
  0x5c   :  { %454 = vmatpush.msrb.mxu1 %v423_v12 }
  0x5d   :  { %455 = vmatmul.f32.vlgmr.msrb.gmra.mxu1 %v2526_v31 }
  0xba   :  { %v215_v34 = vpop.f32.mrf.mxu1 }
  0xbb   :  { %240 = vmatpush.msra.mxu2 %v215_v34  ;;  %v175_v38 = vpop.f32.mrf.mxu0  ;;  %v578_v34 = vld [vmem:[#allocation5 + $0x368] sm:$0xff] }
  0xbc   :  { %269 = vmatpush.msra.mxu3 %v175_v38  ;;  %2122 = vmatmul.msk.f32.vlgmr.msra.gmra.mxu2 %vm218_vm0, %v2120_v35  ;;  %v577_v35 = vld [vmem:[#allocation5 + $0x360] sm:$0xff]  ;;  %v576_v38 = vld [vmem:[#allocation5 + $0x358] sm:$0xff] }
  0xbd   :  { %297 = vmatpush.msrb.mxu2 %v296_v33  ;;  %2124 = vmatmul.msk.f32.vlgmr.msra.gmra.mxu3 %vm218_vm0, %v140_v37  ;;  %v579_v33 = vld [vmem:[#allocation5 + $0x370] sm:$0xff] }
  0xbf   :  { %298 = vmatpush.msrb.mxu2 %v295_v36  ;;  %v2135_v36 = vld [vmem:[%s2741_s1 + $0x48] sm:$0xff] }
  0xc1   :  { %299 = vmatpush.msrb.mxu2 %v294_v39  ;;  %v575_v39 = vld [vmem:[#allocation5 + $0x350] sm:$0xff] }
  0xc3   :  { %300 = vmatpush.msrb.mxu2 %v293_v40  ;;  %v574_v40 = vld [vmem:[#allocation5 + $0x348] sm:$0xff] }
  0xc4   :  { %2123 = vmatmul.msk.f32.gmra.mxu2 %vm218_vm0, %v2121_v42 }
  0xc5   :  { %301 = vmatpush.msrb.mxu2 %v292_v41  ;;  %2125 = vmatmul.msk.f32.gmra.mxu3 %vm218_vm0, %v141_v44  ;;  %v573_v41 = vld [vmem:[#allocation5 + $0x340] sm:$0xff]  ;;  %v571_v44 = vld [vmem:[#allocation5 + $0x330] sm:$0xff] }
  0xc7   :  { %302 = vmatpush.msrb.mxu2 %v291_v43  ;;  %v572_v43 = vld [vmem:[#allocation5 + $0x338] sm:$0xff] }
  0xc9   :  { %303 = vmatpush.msrb.mxu2 %v290_v45  ;;  %v570_v45 = vld [vmem:[#allocation5 + $0x328] sm:$0xff] }
  0xcb   :  { %304 = vmatpush.msrb.mxu2 %v289_v46  ;;  %v569_v46 = vld [vmem:[#allocation5 + $0x320] sm:$0xff] }
  0xcd   :  { %305 = vmatpush.msrb.mxu2 %v288_v47  ;;  %v568_v47 = vld [vmem:[#allocation5 + $0x318] sm:$0xff] }
  0xcf   :  { %306 = vmatpush.msrb.mxu2 %v287_v48 }
  0xd1   :  { %307 = vmatpush.msrb.mxu2 %v286_v49  ;;  %v567_v49 = vld [vmem:[#allocation5 + $0x310] sm:$0xff] }
  0xd3   :  { %308 = vmatpush.msrb.mxu2 %v285_v50  ;;  %v566_v50 = vld [vmem:[#allocation5 + $0x308] sm:$0xff] }
  0xd5   :  { %309 = vmatpush.msrb.mxu2 %v284_v51  ;;  %v565_v51 = vld [vmem:[#allocation5 + $0x300] sm:$0xff] }
  0xd7   :  { %310 = vmatpush.msrb.mxu2 %v283_v52  ;;  %v2130_v52 = vld [vmem:[%s2741_s1 + $0x30] sm:$0xff] }
  0xd9   :  { %311 = vmatpush.msrb.mxu2 %v282_v53 }
  0xda   :  { %v456_v32 = vpop.f32.mrf.mxu1 }
  0xdb   :  { %312 = vmatpush.msrb.mxu2 %v281_v54  ;;  %v509_v54 = vld [vmem:[#allocation5 + $0x2f8] sm:$0xff] }
  0xdc   :  { %313 = vmatmul.f32.vlgmr.msrb.gmra.mxu2 %v2526_v31 }
  0xdd   :  { %480 = vmatpush.msra.mxu2 %v456_v32  ;;  %v654_v32 = vld [vmem:[#allocation7 + $0x70] sm:$0xff] }
  0xe4   :  { %2136 = vmatmul.msk.f32.vlgmr.msra.gmra.mxu2 %vm218_vm0, %v2134_v29 }
  0xec   :  { %2137 = vmatmul.msk.f32.gmra.mxu2 %vm218_vm0, %v2135_v36  ;;  %v651_v36 = vld [vmem:[#allocation7 + $0x58] sm:$0xff] }
 0x13f   :  { %v2547_v59 = vpop.f32.mrf.mxu2 }
 0x140   :  { %v2564_v30 = vpop.f32.mrf.mxu3 }
 0x147   :  { %v2549_v1 = vpop.f32.mrf.mxu2 }
 0x148   :  { %v2570_v37 = vpop.f32.mrf.mxu3 }
 0x15f   :  { %v314_v8 = vpop.f32.mrf.mxu2 }
 0x160   :  { %338 = vmatpush.msrb.mxu3 %v314_v8  ;;  %v494_v8 = vld [vmem:[#allocation5 + $0x280] sm:$0xff] }
 0x161   :  { %2128 = vmatmul.msk.f32.vlgmr.msrb.gmra.mxu3 %vm218_vm0, %v2126_v7  ;;  %v495_v7 = vld [vmem:[#allocation5 + $0x288] sm:$0xff] }
 0x162   :  { %368 = vmatpush.msra.mxu3 %v367_v9  ;;  %v272_v9 = vadd.f32 %v2564_v30, %v2547_v59  ;;  %v2143_v59 = vld [vmem:[%s2741_s1 + $0x68] sm:$0xff] }
 0x163   :  { %v655_v30 = vld [vmem:[#allocation7 + $0x78] sm:$0xff] }
 0x164   :  { %369 = vmatpush.msra.mxu3 %v366_v11 }
 0x166   :  { %370 = vmatpush.msra.mxu3 %v365_v13 }
 0x168   :  { %371 = vmatpush.msra.mxu3 %v364_v14  ;;  %v2142_v14 = vld [vmem:[%s2741_s1 + $0x60] sm:$0xff] }
 0x169   :  { %2129 = vmatmul.msk.f32.gmra.mxu3 %vm218_vm0, %v2127_v15  ;;  %v275_v15 = vadd.f32 %v2570_v37, %v2549_v1  ;;  %v693_v1 = vld [vmem:[#allocation7 + $0xd0] sm:$0xff] }
 0x16a   :  { %372 = vmatpush.msra.mxu3 %v363_v16  ;;  %v650_v37 = vld [vmem:[#allocation7 + $0x50] sm:$0xff] }
 0x16c   :  { %373 = vmatpush.msra.mxu3 %v362_v17 }
 0x16e   :  { %374 = vmatpush.msra.mxu3 %v361_v18  ;;  %v698_v18 = vld [vmem:[#allocation7 + $0xf8] sm:$0xff] }
 0x170   :  { %375 = vmatpush.msra.mxu3 %v360_v19  ;;  %v697_v19 = vld [vmem:[#allocation7 + $0xf0] sm:$0xff] }
 0x172   :  { %376 = vmatpush.msra.mxu3 %v359_v20  ;;  %v696_v20 = vld [vmem:[#allocation7 + $0xe8] sm:$0xff] }
 0x174   :  { %377 = vmatpush.msra.mxu3 %v358_v21  ;;  %v695_v21 = vld [vmem:[#allocation7 + $0xe0] sm:$0xff] }
 0x176   :  { %378 = vmatpush.msra.mxu3 %v357_v22  ;;  %v694_v22 = vld [vmem:[#allocation7 + $0xd8] sm:$0xff] }
 0x178   :  { %379 = vmatpush.msra.mxu3 %v356_v23  ;;  %v692_v23 = vld [vmem:[#allocation7 + $0xc8] sm:$0xff] }
 0x17a   :  { %380 = vmatpush.msra.mxu3 %v355_v24  ;;  %v691_v24 = vld [vmem:[#allocation7 + $0xc0] sm:$0xff] }
 0x17c   :  { %381 = vmatpush.msra.mxu3 %v354_v25  ;;  %v690_v25 = vld [vmem:[#allocation7 + $0xb8] sm:$0xff] }
 0x17e   :  { %382 = vmatpush.msra.mxu3 %v353_v26  ;;  %v689_v26 = vld [vmem:[#allocation7 + $0xb0] sm:$0xff] }
 0x180   :  { %383 = vmatpush.msra.mxu3 %v352_v27  ;;  %v688_v27 = vld [vmem:[#allocation7 + $0xa8] sm:$0xff] }
 0x181   :  { %384 = vmatmul.f32.vlgmr.msra.gmra.mxu3 %v2526_v31 }
 0x182   :  { %581 = vmatpush.msrb.mxu3 %v580_v28  ;;  %v2138_v28 = vld [vmem:[%s2741_s1 + $0x50] sm:$0xff] }
 0x184   :  { %582 = vmatpush.msrb.mxu3 %v579_v33  ;;  %v653_v33 = vld [vmem:[#allocation7 + $0x68] sm:$0xff] }
 0x186   :  { %583 = vmatpush.msrb.mxu3 %v578_v34  ;;  %v652_v34 = vld [vmem:[#allocation7 + $0x60] sm:$0xff] }
 0x188   :  { %584 = vmatpush.msrb.mxu3 %v577_v35  ;;  %v2139_v35 = vld [vmem:[%s2741_s1 + $0x58] sm:$0xff] }
 0x18a   :  { %585 = vmatpush.msrb.mxu3 %v576_v38  ;;  %v649_v38 = vld [vmem:[#allocation7 + $0x48] sm:$0xff] }
 0x18c   :  { %586 = vmatpush.msrb.mxu3 %v575_v39  ;;  %v648_v39 = vld [vmem:[#allocation7 + $0x40] sm:$0xff] }
 0x18e   :  { %587 = vmatpush.msrb.mxu3 %v574_v40  ;;  %v647_v40 = vld [vmem:[#allocation7 + $0x38] sm:$0xff] }
 0x190   :  { %588 = vmatpush.msrb.mxu3 %v573_v41  ;;  %v646_v41 = vld [vmem:[#allocation7 + $0x30] sm:$0xff] }
 0x192   :  { %589 = vmatpush.msrb.mxu3 %v572_v43  ;;  %v644_v43 = vld [vmem:[#allocation7 + $0x20] sm:$0xff] }
 0x194   :  { %590 = vmatpush.msrb.mxu3 %v571_v44  ;;  %v687_v44 = vld [vmem:[#allocation7 + $0xa0] sm:$0xff] }
 0x196   :  { %591 = vmatpush.msrb.mxu3 %v570_v45  ;;  %v643_v45 = vld [vmem:[#allocation7 + $0x18] sm:$0xff] }
 0x198   :  { %592 = vmatpush.msrb.mxu3 %v569_v46  ;;  %v686_v46 = vld [vmem:[#allocation7 + $0x98] sm:$0xff] }
 0x19a   :  { %593 = vmatpush.msrb.mxu3 %v568_v47  ;;  %v642_v47 = vld [vmem:[#allocation7 + $0x10] sm:$0xff] }
 0x19c   :  { %594 = vmatpush.msrb.mxu3 %v567_v49  ;;  %v641_v49 = vld [vmem:[#allocation7 + $0x8] sm:$0xff] }
 0x19e   :  { %595 = vmatpush.msrb.mxu3 %v566_v50  ;;  %v684_v50 = vld [vmem:[#allocation7 + $0x88] sm:$0xff] }
 0x1a0   :  { %596 = vmatpush.msrb.mxu3 %v565_v51  ;;  %v640_v51 = vld [vmem:[#allocation7] sm:$0xff] }
 0x1a1   :  { %597 = vmatmul.f32.vlgmr.msrb.gmra.mxu3 %v2526_v31 }
 0x1e4   :  { %v340_v42 = vpop.f32.mrf.mxu3 }
 0x1e5   :  { %v346_v10 = vadd.f32 %v340_v42, %v272_v9  ;;  %v645_v42 = vld [vmem:[#allocation7 + $0x28] sm:$0xff] }
 0x1ec   :  { %v343_v48 = vpop.f32.mrf.mxu3 }
 0x1ed   :  { %v347_v16 = vadd.f32 %v343_v48, %v275_v15  ;;  %v685_v48 = vld [vmem:[#allocation7 + $0x90] sm:$0xff]  ;;  %v798_v15 = vld [vmem:[#allocation7 + $0x168] sm:$0xff] }
 0x204   :  { %v385_v53 = vpop.f32.mrf.mxu3 }
 0x205   :  { %409 = vmatpush.msrb.mxu0 %v385_v53  ;;  %v482_v53 = vpop.f32.mrf.mxu2 }
 0x206   :  { %2132 = vmatmul.msk.f32.vlgmr.msrb.gmra.mxu0 %vm218_vm0, %v2130_v52  ;;  %v683_v52 = vld [vmem:[#allocation7 + $0x80] sm:$0xff] }
 0x207   :  { %510 = vmatpush.msra.mxu0 %v509_v54 }
 0x209   :  { %511 = vmatpush.msra.mxu0 %v508_v55 }
 0x20b   :  { %512 = vmatpush.msra.mxu0 %v507_v56 }
 0x20d   :  { %513 = vmatpush.msra.mxu0 %v506_v57  ;;  %v485_v54 = vpop.f32.mrf.mxu2 }
 0x20e   :  { %2133 = vmatmul.msk.f32.gmra.mxu0 %vm218_vm0, %v2131_v58 }
 0x20f   :  { %514 = vmatpush.msra.mxu0 %v505_v60  ;;  %v632_v60 = vld [vmem:[%s2745_s5] sm:$0xff] }
 0x211   :  { %515 = vmatpush.msra.mxu0 %v504_v61 }
 0x213   :  { %516 = vmatpush.msra.mxu0 %v503_v62 }
 0x215   :  { %517 = vmatpush.msra.mxu0 %v502_v63 }
 0x217   :  { %518 = vmatpush.msra.mxu0 %v501_v0 }
 0x219   :  { %519 = vmatpush.msra.mxu0 %v500_v2 }
 0x21b   :  { %520 = vmatpush.msra.mxu0 %v499_v3 }
 0x21d   :  { %521 = vmatpush.msra.mxu0 %v498_v4 }
 0x21f   :  { %522 = vmatpush.msra.mxu0 %v497_v5  ;;  %v633_v5 = vld [vmem:[%s2745_s5 + $0x8] sm:$0xff] }
 0x221   :  { %523 = vmatpush.msra.mxu0 %v496_v6 }
 0x223   :  { %524 = vmatpush.msra.mxu0 %v495_v7 }
 0x224   :  { %v598_v13 = vpop.f32.mrf.mxu3 }
 0x225   :  { %525 = vmatpush.msra.mxu0 %v494_v8  ;;  %622 = vmatpush.msra.mxu3 %v598_v13  ;;  %v680_v13 = vld [vmem:[#allocation2 + $0x10] sm:$0xff] }
 0x226   :  { %526 = vmatmul.f32.vlgmr.msra.gmra.mxu0 %v2526_v31  ;;  %2144 = vmatmul.msk.f32.vlgmr.msra.gmra.mxu3 %vm218_vm0, %v2142_v14  ;;  %v799_v14 = vld [vmem:[#allocation7 + $0x170] sm:$0xff] }
 0x227   :  { %699 = vmatpush.msrb.mxu0 %v698_v18  ;;  %v681_v18 = vld [vmem:[#allocation2 + $0x18] sm:$0xff] }
 0x229   :  { %700 = vmatpush.msrb.mxu0 %v697_v19  ;;  %v795_v19 = vld [vmem:[#allocation7 + $0x150] sm:$0xff] }
 0x22b   :  { %701 = vmatpush.msrb.mxu0 %v696_v20  ;;  %v794_v20 = vld [vmem:[#allocation7 + $0x148] sm:$0xff] }
 0x22d   :  { %702 = vmatpush.msrb.mxu0 %v695_v21  ;;  %v793_v21 = vld [vmem:[#allocation7 + $0x140] sm:$0xff] }
 0x22e   :  { %2145 = vmatmul.msk.f32.gmra.mxu3 %vm218_vm0, %v2143_v59  ;;  %v796_v59 = vld [vmem:[#allocation7 + $0x158] sm:$0xff] }
 0x22f   :  { %703 = vmatpush.msrb.mxu0 %v694_v22  ;;  %v639_v22 = vld [vmem:[#allocation2 + $0x8] sm:$0xff] }
 0x231   :  { %704 = vmatpush.msrb.mxu0 %v693_v1  ;;  %v792_v1 = vld [vmem:[#allocation7 + $0x138] sm:$0xff] }
 0x233   :  { %705 = vmatpush.msrb.mxu0 %v692_v23  ;;  %v791_v23 = vld [vmem:[#allocation7 + $0x130] sm:$0xff] }
 0x235   :  { %706 = vmatpush.msrb.mxu0 %v691_v24  ;;  %v790_v24 = vld [vmem:[#allocation7 + $0x128] sm:$0xff] }
 0x237   :  { %707 = vmatpush.msrb.mxu0 %v690_v25  ;;  %v789_v25 = vld [vmem:[#allocation7 + $0x120] sm:$0xff] }
 0x239   :  { %708 = vmatpush.msrb.mxu0 %v689_v26  ;;  %v788_v26 = vld [vmem:[#allocation7 + $0x118] sm:$0xff] }
 0x23b   :  { %709 = vmatpush.msrb.mxu0 %v688_v27  ;;  %v787_v27 = vld [vmem:[#allocation7 + $0x110] sm:$0xff] }
 0x23d   :  { %710 = vmatpush.msrb.mxu0 %v687_v44  ;;  %v919_v44 = vld [vmem:[#allocation7 + $0x250] sm:$0xff] }
 0x23f   :  { %711 = vmatpush.msrb.mxu0 %v686_v46  ;;  %v918_v46 = vld [vmem:[#allocation7 + $0x248] sm:$0xff] }
 0x241   :  { %712 = vmatpush.msrb.mxu0 %v685_v48  ;;  %v874_v48 = vld [vmem:[#allocation7 + $0x1c0] sm:$0xff] }
 0x243   :  { %713 = vmatpush.msrb.mxu0 %v684_v50  ;;  %v873_v50 = vld [vmem:[#allocation7 + $0x1b8] sm:$0xff] }
 0x245   :  { %714 = vmatpush.msrb.mxu0 %v683_v52  ;;  %v872_v52 = vld [vmem:[#allocation7 + $0x1b0] sm:$0xff] }
 0x283   :  { %v411_v11 = vpop.f32.mrf.mxu0 }
 0x284   :  { %v2585_v12 = vadd.f32 %v411_v11, %v346_v10 }
 0x286   :  { %v488_v56 = vadd.f32 %v482_v53, %v2585_v12  ;;  %v800_v12 = vld [vmem:[#allocation7 + $0x178] sm:$0xff]  ;;  %v915_v53 = vld [vmem:[#allocation7 + $0x230] sm:$0xff] }
 0x28b   :  { %v414_v31 = vpop.f32.mrf.mxu0 }
 0x28c   :  { %v2593_v17 = vadd.f32 %v414_v31, %v347_v16  ;;  %v797_v31 = vld [vmem:[#allocation7 + $0x160] sm:$0xff] }
 0x28e   :  { %v489_v63 = vadd.f32 %v485_v54, %v2593_v17  ;;  %v638_v17 = vld [vmem:[#allocation2] sm:$0xff]  ;;  %v871_v54 = vld [vmem:[#allocation7 + $0x1a8] sm:$0xff] }
 0x2a3   :  { %v527_v29 = vpop.f32.mrf.mxu0 }
 0x2a4   :  { %551 = vmatpush.msrb.mxu2 %v527_v29  ;;  %v785_v29 = vld [vmem:[#allocation7 + $0x100] sm:$0xff] }
 0x2a5   :  { %2140 = vmatmul.msk.f32.vlgmr.msrb.gmra.mxu2 %vm218_vm0, %v2138_v28  ;;  %v786_v28 = vld [vmem:[#allocation7 + $0x108] sm:$0xff] }
 0x2a6   :  { %656 = vmatpush.msra.mxu2 %v655_v30 }
 0x2a8   :  { %657 = vmatpush.msra.mxu2 %v654_v32  ;;  %v881_v32 = vld [vmem:[#allocation7 + $0x1f8] sm:$0xff] }
 0x2a9   :  { %v624_v55 = vpop.f32.mrf.mxu3 }
 0x2aa   :  { %658 = vmatpush.msra.mxu2 %v653_v33  ;;  %v924_v33 = vld [vmem:[#allocation7 + $0x278] sm:$0xff] }
 0x2ab   :  { %925 = vmatpush.msra.mxu0 %v924_v33  ;;  %v1018_v33 = vld [vmem:[#allocation7 + $0x2c0] sm:$0xff] }
 0x2ac   :  { %659 = vmatpush.msra.mxu2 %v652_v34  ;;  %v880_v34 = vld [vmem:[#allocation7 + $0x1f0] sm:$0xff] }
 0x2ad   :  { %2141 = vmatmul.msk.f32.gmra.mxu2 %vm218_vm0, %v2139_v35  ;;  %v923_v35 = vld [vmem:[#allocation7 + $0x270] sm:$0xff] }
 0x2ae   :  { %660 = vmatpush.msra.mxu2 %v651_v36  ;;  %926 = vmatpush.msra.mxu0 %v923_v35  ;;  %v1017_v35 = vld [vmem:[#allocation7 + $0x2b8] sm:$0xff] }
 0x2b0   :  { %661 = vmatpush.msra.mxu2 %v650_v37  ;;  %v879_v37 = vld [vmem:[#allocation7 + $0x1e8] sm:$0xff] }
 0x2b1   :  { %v627_v3 = vpop.f32.mrf.mxu3 }
 0x2b2   :  { %662 = vmatpush.msra.mxu2 %v649_v38  ;;  %v922_v38 = vld [vmem:[#allocation7 + $0x268] sm:$0xff] }
 0x2b3   :  { %927 = vmatpush.msra.mxu0 %v922_v38  ;;  %v1014_v38 = vld [vmem:[#allocation7 + $0x2a0] sm:$0xff] }
 0x2b4   :  { %663 = vmatpush.msra.mxu2 %v648_v39  ;;  %v878_v39 = vld [vmem:[#allocation7 + $0x1e0] sm:$0xff] }
 0x2b6   :  { %664 = vmatpush.msra.mxu2 %v647_v40  ;;  %v921_v40 = vld [vmem:[#allocation7 + $0x260] sm:$0xff] }
 0x2b7   :  { %928 = vmatpush.msra.mxu0 %v921_v40  ;;  %v1012_v40 = vld [vmem:[#allocation7 + $0x290] sm:$0xff] }
 0x2b8   :  { %665 = vmatpush.msra.mxu2 %v646_v41  ;;  %v877_v41 = vld [vmem:[#allocation7 + $0x1d8] sm:$0xff] }
 0x2ba   :  { %666 = vmatpush.msra.mxu2 %v645_v42  ;;  %v920_v42 = vld [vmem:[#allocation7 + $0x258] sm:$0xff] }
 0x2bb   :  { %929 = vmatpush.msra.mxu0 %v920_v42  ;;  %v1010_v42 = vld [vmem:[#allocation7 + $0x280] sm:$0xff] }
 0x2bc   :  { %667 = vmatpush.msra.mxu2 %v644_v43  ;;  %v876_v43 = vld [vmem:[#allocation7 + $0x1d0] sm:$0xff] }
 0x2bd   :  { %930 = vmatpush.msra.mxu0 %v919_v44  ;;  %v1106_v44 = vld [vmem:[#allocation7 + $0x378] sm:$0xff] }
 0x2be   :  { %668 = vmatpush.msra.mxu2 %v643_v45  ;;  %v875_v45 = vld [vmem:[#allocation7 + $0x1c8] sm:$0xff] }
 0x2bf   :  { %931 = vmatpush.msra.mxu0 %v918_v46  ;;  %v1105_v46 = vld [vmem:[#allocation7 + $0x370] sm:$0xff] }
 0x2c0   :  { %669 = vmatpush.msra.mxu2 %v642_v47 }
 0x2c2   :  { %670 = vmatpush.msra.mxu2 %v641_v49  ;;  %v917_v49 = vld [vmem:[#allocation7 + $0x240] sm:$0xff] }
 0x2c3   :  { %932 = vmatpush.msra.mxu0 %v917_v49  ;;  %v1104_v49 = vld [vmem:[#allocation7 + $0x368] sm:$0xff] }
 0x2c4   :  { %671 = vmatpush.msra.mxu2 %v640_v51  ;;  %v916_v51 = vld [vmem:[#allocation7 + $0x238] sm:$0xff] }
 0x2c5   :  { %933 = vmatpush.msra.mxu0 %v916_v51  ;;  %v1103_v51 = vld [vmem:[#allocation7 + $0x360] sm:$0xff] }
 0x2c7   :  { %934 = vmatpush.msra.mxu0 %v915_v53  ;;  %v1102_v53 = vld [vmem:[#allocation7 + $0x358] sm:$0xff] }
 0x328   :  { %v553_v57 = vpop.f32.mrf.mxu2 }
 0x329   :  { %v559_v58 = vadd.f32 %v553_v57, %v488_v56  ;;  %v870_v57 = vld [vmem:[#allocation7 + $0x1a0] sm:$0xff] }
 0x32b   :  { %v630_v61 = vadd.f32 %v624_v55, %v559_v58  ;;  %v914_v55 = vld [vmem:[#allocation7 + $0x228] sm:$0xff]  ;;  %v782_v58 = vld [vmem:[#allocation2 + $0x20] sm:$0xff] }
 0x32c   :  { %935 = vmatpush.msra.mxu0 %v914_v55  ;;  %v1101_v55 = vld [vmem:[#allocation7 + $0x350] sm:$0xff] }
 0x32d   :  { %v634_v62 = vadd.f32 %v632_v60, %v630_v61  ;;  %v913_v60 = vld [vmem:[#allocation7 + $0x220] sm:$0xff]  ;;  %v783_v61 = vld [vmem:[#allocation2 + $0x28] sm:$0xff] }
 0x32e   :  { %936 = vmatpush.msra.mxu0 %v913_v60 }
 0x32f   :  { %v636_v0 = vmax.f32 %v634_v62, 0.0  ;;  %v869_v62 = vld [vmem:[#allocation7 + $0x198] sm:$0xff] }
 0x330   :  { %v556_v2 = vpop.f32.mrf.mxu2 }
 0x331   :  { %v560_v4 = vadd.f32 %v556_v2, %v489_v63  ;;  %672 = vmatmul.f32.vlgmr.msra.gmra.mxu2 %v636_v0  ;;  %715 = vmatmul.f32.vlgmr.msrb.gmra.mxu0 %v636_v0  ;;  %v912_v63 = vld [vmem:[#allocation7 + $0x218] sm:$0xff]  ;;  %v911_v2 = vld [vmem:[#allocation7 + $0x210] sm:$0xff] }
 0x332   :  { %937 = vmatpush.msra.mxu0 %v912_v63  ;;  %v1098_v63 = vld [vmem:[#allocation7 + $0x338] sm:$0xff] }
 0x333   :  { %v631_v6 = vadd.f32 %v627_v3, %v560_v4  ;;  %v867_v3 = vld [vmem:[#allocation7 + $0x188] sm:$0xff] }
 0x334   :  { %938 = vmatpush.msra.mxu0 %v911_v2  ;;  %v910_v4 = vld [vmem:[#allocation7 + $0x208] sm:$0xff]  ;;  %v1097_v2 = vld [vmem:[#allocation7 + $0x330] sm:$0xff] }
 0x335   :  { %v635_v7 = vadd.f32 %v633_v5, %v631_v6  ;;  %v866_v5 = vld [vmem:[#allocation7 + $0x180] sm:$0xff] }
 0x336   :  { %939 = vmatpush.msra.mxu0 %v910_v4  ;;  %v909_v6 = vld [vmem:[#allocation7 + $0x200] sm:$0xff]  ;;  %v1096_v4 = vld [vmem:[#allocation7 + $0x328] sm:$0xff] }
 0x337   :  { %v637_v8 = vmax.f32 %v635_v7, 0.0 }
 0x338   :  { %940 = vmatpush.msra.mxu0 %v909_v6 }
 0x339   :  { %675 = vmatmul.f32.gmra.mxu2 %v637_v8  ;;  %718 = vmatmul.f32.gmra.mxu0 %v637_v8 }
 0x33a   :  { %1107 = vmatpush.msrb.mxu0 %v1106_v44  ;;  %v1245_v44 = vld [vmem:[#allocation7 + $0x450] sm:$0xff] }
 0x33c   :  { %1108 = vmatpush.msrb.mxu0 %v1105_v46  ;;  %v1243_v46 = vld [vmem:[#allocation7 + $0x440] sm:$0xff] }
 0x33e   :  { %1109 = vmatpush.msrb.mxu0 %v1104_v49  ;;  %v1240_v49 = vld [vmem:[#allocation7 + $0x428] sm:$0xff] }
 0x340   :  { %1110 = vmatpush.msrb.mxu0 %v1103_v51  ;;  %v1238_v51 = vld [vmem:[#allocation7 + $0x418] sm:$0xff] }
 0x342   :  { %1111 = vmatpush.msrb.mxu0 %v1102_v53  ;;  %v1236_v53 = vld [vmem:[#allocation7 + $0x408] sm:$0xff] }
 0x344   :  { %1112 = vmatpush.msrb.mxu0 %v1101_v55 }
 0x3ae   :  { %v716_v9 = vpop.f32.mrf.mxu0 }
 0x3b4   :  { %v673_v10 = vpop.f32.mrf.mxu2 }
 0x3b6   :  { %v719_v11 = vpop.f32.mrf.mxu0 }
 0x3b7   :  { %743 = vmatpush.msra.mxu1 %v719_v11 }
 0x3b9   :  { %744 = vmatpush.msra.mxu1 %v716_v9 }
 0x3ba   :  { %2146 = vmatmul.msk.f32.vlgmr.msra.gmra.mxu1 %vm722_vm1, %v680_v13 }
 0x3bb   :  { %801 = vmatpush.msrb.mxu1 %v800_v12 }
 0x3bc   :  { %v676_v16 = vpop.f32.mrf.mxu2 }
 0x3bd   :  { %802 = vmatpush.msrb.mxu1 %v799_v14  ;;  %772 = vmatpush.msrb.mxu3 %v676_v16 }
 0x3bf   :  { %803 = vmatpush.msrb.mxu1 %v798_v15  ;;  %773 = vmatpush.msrb.mxu3 %v673_v10  ;;  %v2152_v10 = vld [vmem:[%s2745_s5 + $0x10] sm:$0xff] }
 0x3c0   :  { %2148 = vmatmul.msk.f32.vlgmr.msrb.gmra.mxu3 %vm722_vm1, %v638_v17 }
 0x3c1   :  { %804 = vmatpush.msrb.mxu1 %v797_v31  ;;  %882 = vmatpush.msra.mxu3 %v881_v32  ;;  %v2153_v31 = vld [vmem:[%s2745_s5 + $0x18] sm:$0xff] }
 0x3c2   :  { %2147 = vmatmul.msk.f32.gmra.mxu1 %vm722_vm1, %v681_v18  ;;  %v1019_v32 = vld [vmem:[#allocation7 + $0x2c8] sm:$0xff] }
 0x3c3   :  { %805 = vmatpush.msrb.mxu1 %v796_v59  ;;  %883 = vmatpush.msra.mxu3 %v880_v34  ;;  %v864_v34 = vld [vmem:[#allocation2 + $0x38] sm:$0xff] }
 0x3c5   :  { %806 = vmatpush.msrb.mxu1 %v795_v19  ;;  %884 = vmatpush.msra.mxu3 %v879_v37  ;;  %v1015_v37 = vld [vmem:[#allocation7 + $0x2a8] sm:$0xff] }
 0x3c7   :  { %807 = vmatpush.msrb.mxu1 %v794_v20  ;;  %885 = vmatpush.msra.mxu3 %v878_v39  ;;  %v1013_v39 = vld [vmem:[#allocation7 + $0x298] sm:$0xff] }
 0x3c8   :  { %2149 = vmatmul.msk.f32.gmra.mxu3 %vm722_vm1, %v639_v22  ;;  %v1025_v22 = vld [vmem:[#allocation7 + $0x2f8] sm:$0xff] }
 0x3c9   :  { %808 = vmatpush.msrb.mxu1 %v793_v21  ;;  %886 = vmatpush.msra.mxu3 %v877_v41  ;;  %v1011_v41 = vld [vmem:[#allocation7 + $0x288] sm:$0xff] }
 0x3cb   :  { %809 = vmatpush.msrb.mxu1 %v792_v1  ;;  %887 = vmatpush.msra.mxu3 %v876_v43  ;;  %v906_v1 = vld [vmem:[#allocation2 + $0x40] sm:$0xff] }
 0x3cd   :  { %810 = vmatpush.msrb.mxu1 %v791_v23  ;;  %888 = vmatpush.msra.mxu3 %v875_v45  ;;  %v1024_v23 = vld [vmem:[#allocation7 + $0x2f0] sm:$0xff]  ;;  %v1149_v45 = vld [vmem:[#allocation7 + $0x3f8] sm:$0xff] }
 0x3cf   :  { %811 = vmatpush.msrb.mxu1 %v790_v24  ;;  %889 = vmatpush.msra.mxu3 %v874_v48  ;;  %v1023_v24 = vld [vmem:[#allocation7 + $0x2e8] sm:$0xff] }
 0x3d1   :  { %812 = vmatpush.msrb.mxu1 %v789_v25  ;;  %890 = vmatpush.msra.mxu3 %v873_v50  ;;  %v1147_v50 = vld [vmem:[#allocation7 + $0x3e8] sm:$0xff] }
 0x3d3   :  { %813 = vmatpush.msrb.mxu1 %v788_v26  ;;  %891 = vmatpush.msra.mxu3 %v872_v52  ;;  %v1022_v26 = vld [vmem:[#allocation7 + $0x2e0] sm:$0xff] }
 0x3d4   :  { %v1146_v52 = vld [vmem:[#allocation7 + $0x3e0] sm:$0xff] }
 0x3d5   :  { %814 = vmatpush.msrb.mxu1 %v787_v27  ;;  %892 = vmatpush.msra.mxu3 %v871_v54  ;;  %v863_v27 = vld [vmem:[#allocation2 + $0x30] sm:$0xff]  ;;  %v1145_v54 = vld [vmem:[#allocation7 + $0x3d8] sm:$0xff] }
 0x3d7   :  { %815 = vmatpush.msrb.mxu1 %v786_v28  ;;  %893 = vmatpush.msra.mxu3 %v870_v57  ;;  %v1021_v28 = vld [vmem:[#allocation7 + $0x2d8] sm:$0xff]  ;;  %v1100_v57 = vld [vmem:[#allocation7 + $0x348] sm:$0xff] }
 0x3d8   :  { %1113 = vmatpush.msrb.mxu0 %v1100_v57  ;;  %v1374_v57 = vld [vmem:[#allocation7 + $0x578] sm:$0xff] }
 0x3d9   :  { %816 = vmatpush.msrb.mxu1 %v785_v29  ;;  %894 = vmatpush.msra.mxu3 %v869_v62  ;;  %v907_v29 = vld [vmem:[#allocation2 + $0x48] sm:$0xff]  ;;  %v1142_v62 = vld [vmem:[#allocation7 + $0x3c0] sm:$0xff] }
 0x3da   :  { %817 = vmatmul.f32.vlgmr.msrb.gmra.mxu1 %v636_v0  ;;  %v868_v0 = vld [vmem:[#allocation7 + $0x190] sm:$0xff] }
 0x3db   :  { %895 = vmatpush.msra.mxu3 %v868_v0  ;;  %v1141_v0 = vld [vmem:[#allocation7 + $0x3b8] sm:$0xff] }
 0x3dd   :  { %896 = vmatpush.msra.mxu3 %v867_v3  ;;  %v1140_v3 = vld [vmem:[#allocation7 + $0x3b0] sm:$0xff] }
 0x3df   :  { %897 = vmatpush.msra.mxu3 %v866_v5  ;;  %v1139_v5 = vld [vmem:[#allocation7 + $0x3a8] sm:$0xff] }
 0x3e2   :  { %820 = vmatmul.f32.gmra.mxu1 %v637_v8 }
 0x437   :  { %v2619_v30 = vpop.f32.mrf.mxu1 }
 0x43f   :  { %v2621_v36 = vpop.f32.mrf.mxu1 }
 0x443   :  { %v775_v7 = vpop.f32.mrf.mxu3 }
 0x444   :  { %v776_v8 = vadd.f32 %v775_v7, %v2619_v30  ;;  %v1020_v30 = vld [vmem:[#allocation7 + $0x2d0] sm:$0xff]  ;;  %v1095_v7 = vld [vmem:[#allocation7 + $0x320] sm:$0xff] }
 0x44b   :  { %v778_v13 = vpop.f32.mrf.mxu3 }
 0x44c   :  { %v779_v15 = vadd.f32 %v778_v13, %v2621_v36  ;;  %v1016_v36 = vld [vmem:[#allocation7 + $0x2b0] sm:$0xff] }
 0x44d   :  { %v1093_v13 = vld [vmem:[#allocation7 + $0x310] sm:$0xff] }
 0x457   :  { %v818_v47 = vpop.f32.mrf.mxu1 }
 0x45f   :  { %v821_v56 = vpop.f32.mrf.mxu1 }
 0x460   :  { %844 = vmatpush.msrb.mxu2 %v821_v56  ;;  %v1144_v56 = vld [vmem:[#allocation7 + $0x3d0] sm:$0xff] }
 0x462   :  { %845 = vmatpush.msrb.mxu2 %v818_v47  ;;  %v1148_v47 = vld [vmem:[#allocation7 + $0x3f0] sm:$0xff] }
 0x463   :  { %2150 = vmatmul.msk.f32.vlgmr.msrb.gmra.mxu2 %vm722_vm1, %v782_v58  ;;  %v1143_v58 = vld [vmem:[#allocation7 + $0x3c8] sm:$0xff] }
 0x46b   :  { %2151 = vmatmul.msk.f32.gmra.mxu2 %vm722_vm1, %v783_v61  ;;  %v1099_v61 = vld [vmem:[#allocation7 + $0x340] sm:$0xff] }
 0x46c   :  { %1114 = vmatpush.msrb.mxu0 %v1099_v61 }
 0x46e   :  { %1115 = vmatpush.msrb.mxu0 %v1098_v63  ;;  %v1372_v63 = vld [vmem:[#allocation7 + $0x568] sm:$0xff] }
 0x470   :  { %1116 = vmatpush.msrb.mxu0 %v1097_v2  ;;  %v1371_v2 = vld [vmem:[#allocation7 + $0x560] sm:$0xff] }
 0x472   :  { %1117 = vmatpush.msrb.mxu0 %v1096_v4  ;;  %v1370_v4 = vld [vmem:[#allocation7 + $0x558] sm:$0xff] }
 0x474   :  { %1118 = vmatpush.msrb.mxu0 %v1095_v7  ;;  %v1325_v7 = vld [vmem:[#allocation7 + $0x4c8] sm:$0xff] }
 0x4e6   :  { %v847_v9 = vpop.f32.mrf.mxu2 }
 0x4e7   :  { %v853_v11 = vadd.f32 %v847_v9, %v776_v8  ;;  %v1007_v8 = vld [vmem:[#allocation2 + $0x50] sm:$0xff] }
 0x4e8   :  { %v1138_v9 = vld [vmem:[#allocation7 + $0x3a0] sm:$0xff] }
 0x4e9   :  { %v858_v12 = vadd.f32 %v2152_v10, %v853_v11  ;;  %v1008_v10 = vld [vmem:[#allocation2 + $0x58] sm:$0xff]  ;;  %v1094_v11 = vld [vmem:[#allocation7 + $0x318] sm:$0xff] }
 0x4ea   :  { %1119 = vmatpush.msrb.mxu0 %v1094_v11  ;;  %v1367_v11 = vld [vmem:[#allocation7 + $0x540] sm:$0xff] }
 0x4eb   :  { %v860_v14 = vmax.f32 %v858_v12, 0.0  ;;  %v1137_v12 = vld [vmem:[#allocation7 + $0x398] sm:$0xff] }
 0x4ec   :  { %1120 = vmatpush.msrb.mxu0 %v1093_v13  ;;  %v1366_v13 = vld [vmem:[#allocation7 + $0x538] sm:$0xff] }
 0x4ed   :  { %898 = vmatmul.f32.vlgmr.msra.gmra.mxu3 %v860_v14  ;;  %941 = vmatmul.f32.vlgmr.msra.gmra.mxu0 %v860_v14 }
 0x4ee   :  { %v850_v16 = vpop.f32.mrf.mxu2 }
 0x4ef   :  { %v854_v17 = vadd.f32 %v850_v16, %v779_v15  ;;  %v1092_v15 = vld [vmem:[#allocation7 + $0x308] sm:$0xff] }
 0x4f0   :  { %v1135_v16 = vld [vmem:[#allocation7 + $0x388] sm:$0xff]  ;;  %1121 = vmatpush.msrb.mxu0 %v1092_v15  ;;  %v1365_v15 = vld [vmem:[#allocation7 + $0x530] sm:$0xff] }
 0x4f1   :  { %v859_v59 = vadd.f32 %v2153_v31, %v854_v17  ;;  %v1091_v31 = vld [vmem:[#allocation7 + $0x300] sm:$0xff] }
 0x4f2   :  { %v1134_v17 = vld [vmem:[#allocation7 + $0x380] sm:$0xff]  ;;  %1122 = vmatpush.msrb.mxu0 %v1091_v31  ;;  %v1364_v31 = vld [vmem:[#allocation7 + $0x528] sm:$0xff] }
 0x4f3   :  { %v861_v18 = vmax.f32 %v859_v59, 0.0 }
 0x4f5   :  { %901 = vmatmul.f32.gmra.mxu3 %v861_v18  ;;  %944 = vmatmul.f32.gmra.mxu0 %v861_v18 }
 0x56a   :  { %v942_v19 = vpop.f32.mrf.mxu0 }
 0x570   :  { %v899_v20 = vpop.f32.mrf.mxu3 }
 0x572   :  { %v945_v21 = vpop.f32.mrf.mxu0 }
 0x573   :  { %968 = vmatpush.msra.mxu2 %v945_v21 }
 0x575   :  { %969 = vmatpush.msra.mxu2 %v942_v19 }
 0x576   :  { %2154 = vmatmul.msk.f32.vlgmr.msra.gmra.mxu2 %vm722_vm1, %v906_v1 }
 0x577   :  { %1026 = vmatpush.msrb.mxu2 %v1025_v22 }
 0x578   :  { %v902_v25 = vpop.f32.mrf.mxu3 }
 0x579   :  { %1027 = vmatpush.msrb.mxu2 %v1024_v23  ;;  %997 = vmatpush.msra.mxu1 %v902_v25 }
 0x57b   :  { %1028 = vmatpush.msrb.mxu2 %v1023_v24  ;;  %998 = vmatpush.msra.mxu1 %v899_v20  ;;  %v2160_v20 = vld [vmem:[%s2745_s5 + $0x20] sm:$0xff] }
 0x57c   :  { %2156 = vmatmul.msk.f32.vlgmr.msra.gmra.mxu1 %vm722_vm1, %v863_v27 }
 0x57d   :  { %1029 = vmatpush.msrb.mxu2 %v1022_v26  ;;  %1150 = vmatpush.msrb.mxu1 %v1149_v45  ;;  %v2161_v26 = vld [vmem:[%s2745_s5 + $0x28] sm:$0xff]  ;;  %v1244_v45 = vld [vmem:[#allocation7 + $0x448] sm:$0xff] }
 0x57e   :  { %2155 = vmatmul.msk.f32.gmra.mxu2 %vm722_vm1, %v907_v29 }
 0x57f   :  { %1030 = vmatpush.msrb.mxu2 %v1021_v28  ;;  %1151 = vmatpush.msrb.mxu1 %v1148_v47  ;;  %v1242_v47 = vld [vmem:[#allocation7 + $0x438] sm:$0xff] }
 0x581   :  { %1031 = vmatpush.msrb.mxu2 %v1020_v30  ;;  %1152 = vmatpush.msrb.mxu1 %v1147_v50  ;;  %v1239_v50 = vld [vmem:[#allocation7 + $0x420] sm:$0xff] }
 0x583   :  { %1032 = vmatpush.msrb.mxu2 %v1019_v32  ;;  %1153 = vmatpush.msrb.mxu1 %v1146_v52  ;;  %v1237_v52 = vld [vmem:[#allocation7 + $0x410] sm:$0xff] }
 0x584   :  { %2157 = vmatmul.msk.f32.gmra.mxu1 %vm722_vm1, %v864_v34 }
 0x585   :  { %1033 = vmatpush.msrb.mxu2 %v1018_v33  ;;  %1154 = vmatpush.msrb.mxu1 %v1145_v54  ;;  %v1235_v54 = vld [vmem:[#allocation7 + $0x400] sm:$0xff] }
 0x587   :  { %1034 = vmatpush.msrb.mxu2 %v1017_v35  ;;  %1155 = vmatpush.msrb.mxu1 %v1144_v56  ;;  %v1250_v35 = vld [vmem:[#allocation7 + $0x478] sm:$0xff] }
 0x588   :  { %v1331_v56 = vld [vmem:[#allocation7 + $0x4f8] sm:$0xff] }
 0x589   :  { %1035 = vmatpush.msrb.mxu2 %v1016_v36  ;;  %1156 = vmatpush.msrb.mxu1 %v1143_v58  ;;  %v1088_v36 = vld [vmem:[#allocation2 + $0x60] sm:$0xff] }
 0x58a   :  { %v1330_v58 = vld [vmem:[#allocation7 + $0x4f0] sm:$0xff] }
 0x58b   :  { %1036 = vmatpush.msrb.mxu2 %v1015_v37  ;;  %1157 = vmatpush.msrb.mxu1 %v1142_v62  ;;  %v1131_v37 = vld [vmem:[#allocation2 + $0x70] sm:$0xff]  ;;  %v1329_v62 = vld [vmem:[#allocation7 + $0x4e8] sm:$0xff] }
 0x58d   :  { %1037 = vmatpush.msrb.mxu2 %v1014_v38  ;;  %1158 = vmatpush.msrb.mxu1 %v1141_v0  ;;  %v1249_v38 = vld [vmem:[#allocation7 + $0x470] sm:$0xff]  ;;  %v1328_v0 = vld [vmem:[#allocation7 + $0x4e0] sm:$0xff] }
 0x58f   :  { %1038 = vmatpush.msrb.mxu2 %v1013_v39  ;;  %1159 = vmatpush.msrb.mxu1 %v1140_v3  ;;  %v1248_v39 = vld [vmem:[#allocation7 + $0x468] sm:$0xff]  ;;  %v1327_v3 = vld [vmem:[#allocation7 + $0x4d8] sm:$0xff] }
 0x591   :  { %1039 = vmatpush.msrb.mxu2 %v1012_v40  ;;  %1160 = vmatpush.msrb.mxu1 %v1139_v5  ;;  %v1247_v40 = vld [vmem:[#allocation7 + $0x460] sm:$0xff]  ;;  %v1326_v5 = vld [vmem:[#allocation7 + $0x4d0] sm:$0xff] }
 0x593   :  { %1040 = vmatpush.msrb.mxu2 %v1011_v41  ;;  %1161 = vmatpush.msrb.mxu1 %v1138_v9  ;;  %v1246_v41 = vld [vmem:[#allocation7 + $0x458] sm:$0xff] }
 0x595   :  { %1041 = vmatpush.msrb.mxu2 %v1010_v42  ;;  %1162 = vmatpush.msrb.mxu1 %v1137_v12  ;;  %v1089_v42 = vld [vmem:[#allocation2 + $0x68] sm:$0xff] }
 0x596   :  { %1042 = vmatmul.f32.vlgmr.msrb.gmra.mxu2 %v860_v14  ;;  %v1136_v14 = vld [vmem:[#allocation7 + $0x390] sm:$0xff]  ;;  %v1323_v12 = vld [vmem:[#allocation7 + $0x4b8] sm:$0xff] }
 0x597   :  { %1163 = vmatpush.msrb.mxu1 %v1136_v14  ;;  %v1322_v14 = vld [vmem:[#allocation7 + $0x4b0] sm:$0xff] }
 0x599   :  { %1164 = vmatpush.msrb.mxu1 %v1135_v16  ;;  %v1321_v16 = vld [vmem:[#allocation7 + $0x4a8] sm:$0xff] }
 0x59b   :  { %1165 = vmatpush.msrb.mxu1 %v1134_v17 }
 0x59d   :  { %1332 = vmatpush.msra.mxu1 %v1331_v56  ;;  %v1470_v56 = vld [vmem:[#allocation7 + $0x5d0] sm:$0xff] }
 0x59e   :  { %1045 = vmatmul.f32.gmra.mxu2 %v861_v18 }
 0x59f   :  { %1333 = vmatpush.msra.mxu1 %v1330_v58  ;;  %v1468_v58 = vld [vmem:[#allocation7 + $0x5c0] sm:$0xff] }
 0x5a1   :  { %1334 = vmatpush.msra.mxu1 %v1329_v62  ;;  %v1465_v62 = vld [vmem:[#allocation7 + $0x5a8] sm:$0xff] }
 0x5a3   :  { %1335 = vmatpush.msra.mxu1 %v1328_v0  ;;  %v1463_v0 = vld [vmem:[#allocation7 + $0x598] sm:$0xff] }
 0x5a5   :  { %1336 = vmatpush.msra.mxu1 %v1327_v3  ;;  %v1461_v3 = vld [vmem:[#allocation7 + $0x588] sm:$0xff] }
 0x5a7   :  { %1337 = vmatpush.msra.mxu1 %v1326_v5 }
 0x5a9   :  { %1338 = vmatpush.msra.mxu1 %v1325_v7  ;;  %v1599_v7 = vld [vmem:[#allocation7 + $0x6f8] sm:$0xff] }
 0x5f9   :  { %v2637_v43 = vpop.f32.mrf.mxu2  ;;  %v1000_v59 = vpop.f32.mrf.mxu1 }
 0x5fa   :  { %v1001_v18 = vadd.f32 %v1000_v59, %v2637_v43  ;;  %v1132_v43 = vld [vmem:[#allocation2 + $0x78] sm:$0xff]  ;;  %v1320_v59 = vld [vmem:[#allocation7 + $0x4a0] sm:$0xff] }
 0x601   :  { %v2639_v48 = vpop.f32.mrf.mxu2  ;;  %v1003_v1 = vpop.f32.mrf.mxu1 }
 0x602   :  { %v1004_v24 = vadd.f32 %v1003_v1, %v2639_v48  ;;  %v1241_v48 = vld [vmem:[#allocation7 + $0x430] sm:$0xff] }
 0x603   :  { %v1318_v1 = vld [vmem:[#allocation7 + $0x490] sm:$0xff] }
 0x619   :  { %v1043_v60 = vpop.f32.mrf.mxu2 }
 0x621   :  { %v1046_v6 = vpop.f32.mrf.mxu2 }
 0x622   :  { %1069 = vmatpush.msrb.mxu3 %v1046_v6  ;;  %v1369_v6 = vld [vmem:[#allocation7 + $0x550] sm:$0xff] }
 0x624   :  { %1070 = vmatpush.msrb.mxu3 %v1043_v60  ;;  %v1373_v60 = vld [vmem:[#allocation7 + $0x570] sm:$0xff] }
 0x625   :  { %2158 = vmatmul.msk.f32.vlgmr.msrb.gmra.mxu3 %vm722_vm1, %v1007_v8  ;;  %v1368_v8 = vld [vmem:[#allocation7 + $0x548] sm:$0xff] }
 0x62d   :  { %2159 = vmatmul.msk.f32.gmra.mxu3 %vm722_vm1, %v1008_v10  ;;  %v1324_v10 = vld [vmem:[#allocation7 + $0x4c0] sm:$0xff] }
 0x62e   :  { %1339 = vmatpush.msra.mxu1 %v1324_v10 }
 0x630   :  { %1340 = vmatpush.msra.mxu1 %v1323_v12  ;;  %v1597_v12 = vld [vmem:[#allocation7 + $0x6e8] sm:$0xff] }
 0x632   :  { %1341 = vmatpush.msra.mxu1 %v1322_v14  ;;  %v1596_v14 = vld [vmem:[#allocation7 + $0x6e0] sm:$0xff] }
 0x634   :  { %1342 = vmatpush.msra.mxu1 %v1321_v16  ;;  %v1595_v16 = vld [vmem:[#allocation7 + $0x6d8] sm:$0xff] }
 0x636   :  { %1343 = vmatpush.msra.mxu1 %v1320_v59  ;;  %v1550_v59 = vld [vmem:[#allocation7 + $0x648] sm:$0xff] }
 0x6a8   :  { %v1072_v19 = vpop.f32.mrf.mxu3 }
 0x6a9   :  { %v1078_v21 = vadd.f32 %v1072_v19, %v1001_v18  ;;  %v1232_v18 = vld [vmem:[#allocation2 + $0x80] sm:$0xff]  ;;  %v1363_v19 = vld [vmem:[#allocation7 + $0x520] sm:$0xff] }
 0x6ab   :  { %v1083_v22 = vadd.f32 %v2160_v20, %v1078_v21  ;;  %v1233_v20 = vld [vmem:[#allocation2 + $0x88] sm:$0xff] }
 0x6ac   :  { %v1319_v21 = vld [vmem:[#allocation7 + $0x498] sm:$0xff] }
 0x6ad   :  { %v1085_v23 = vmax.f32 %v1083_v22, 0.0  ;;  %v1362_v22 = vld [vmem:[#allocation7 + $0x518] sm:$0xff]  ;;  %1344 = vmatpush.msra.mxu1 %v1319_v21  ;;  %v1592_v21 = vld [vmem:[#allocation7 + $0x6c0] sm:$0xff] }
 0x6af   :  { %1123 = vmatmul.f32.vlgmr.msrb.gmra.mxu0 %v1085_v23  ;;  %1166 = vmatmul.f32.vlgmr.msrb.gmra.mxu1 %v1085_v23 }
 0x6b0   :  { %v1075_v25 = vpop.f32.mrf.mxu3  ;;  %1345 = vmatpush.msra.mxu1 %v1318_v1  ;;  %v1591_v1 = vld [vmem:[#allocation7 + $0x6b8] sm:$0xff] }
 0x6b1   :  { %v1079_v27 = vadd.f32 %v1075_v25, %v1004_v24  ;;  %v1317_v24 = vld [vmem:[#allocation7 + $0x488] sm:$0xff] }
 0x6b2   :  { %v1360_v25 = vld [vmem:[#allocation7 + $0x508] sm:$0xff]  ;;  %1346 = vmatpush.msra.mxu1 %v1317_v24  ;;  %v1590_v24 = vld [vmem:[#allocation7 + $0x6b0] sm:$0xff] }
 0x6b3   :  { %v1084_v28 = vadd.f32 %v2161_v26, %v1079_v27  ;;  %v1316_v26 = vld [vmem:[#allocation7 + $0x480] sm:$0xff] }
 0x6b4   :  { %v1359_v27 = vld [vmem:[#allocation7 + $0x500] sm:$0xff]  ;;  %1347 = vmatpush.msra.mxu1 %v1316_v26  ;;  %v1589_v26 = vld [vmem:[#allocation7 + $0x6a8] sm:$0xff] }
 0x6b5   :  { %v1086_v29 = vmax.f32 %v1084_v28, 0.0 }
 0x6b7   :  { %1126 = vmatmul.f32.gmra.mxu0 %v1086_v29  ;;  %1169 = vmatmul.f32.gmra.mxu1 %v1086_v29 }
 0x72c   :  { %v1124_v30 = vpop.f32.mrf.mxu0  ;;  %v1167_v32 = vpop.f32.mrf.mxu1 }
 0x734   :  { %v1127_v33 = vpop.f32.mrf.mxu0  ;;  %v1170_v34 = vpop.f32.mrf.mxu1 }
 0x735   :  { %1193 = vmatpush.msra.mxu3 %v1170_v34  ;;  %1222 = vmatpush.msra.mxu2 %v1127_v33 }
 0x737   :  { %1194 = vmatpush.msra.mxu3 %v1167_v32  ;;  %1223 = vmatpush.msra.mxu2 %v1124_v30  ;;  %v2168_v32 = vld [vmem:[%s2745_s5 + $0x30] sm:$0xff] }
 0x738   :  { %2164 = vmatmul.msk.f32.vlgmr.msra.gmra.mxu2 %vm722_vm1, %v1088_v36  ;;  %2162 = vmatmul.msk.f32.vlgmr.msra.gmra.mxu3 %vm722_vm1, %v1131_v37 }
 0x739   :  { %1251 = vmatpush.msrb.mxu3 %v1250_v35  ;;  %1375 = vmatpush.msrb.mxu2 %v1374_v57  ;;  %v1469_v57 = vld [vmem:[#allocation7 + $0x5c8] sm:$0xff] }
 0x73b   :  { %1252 = vmatpush.msrb.mxu3 %v1249_v38  ;;  %1376 = vmatpush.msrb.mxu2 %v1373_v60  ;;  %v1467_v60 = vld [vmem:[#allocation7 + $0x5b8] sm:$0xff] }
 0x73d   :  { %1253 = vmatpush.msrb.mxu3 %v1248_v39  ;;  %1377 = vmatpush.msrb.mxu2 %v1372_v63  ;;  %v2169_v39 = vld [vmem:[%s2745_s5 + $0x38] sm:$0xff]  ;;  %v1464_v63 = vld [vmem:[#allocation7 + $0x5a0] sm:$0xff] }
 0x73f   :  { %1254 = vmatpush.msrb.mxu3 %v1247_v40  ;;  %1378 = vmatpush.msrb.mxu2 %v1371_v2  ;;  %v1462_v2 = vld [vmem:[#allocation7 + $0x590] sm:$0xff] }
 0x740   :  { %2165 = vmatmul.msk.f32.gmra.mxu2 %vm722_vm1, %v1089_v42  ;;  %2163 = vmatmul.msk.f32.gmra.mxu3 %vm722_vm1, %v1132_v43 }
 0x741   :  { %1255 = vmatpush.msrb.mxu3 %v1246_v41  ;;  %1379 = vmatpush.msrb.mxu2 %v1370_v4  ;;  %v1460_v4 = vld [vmem:[#allocation7 + $0x580] sm:$0xff] }
 0x743   :  { %1256 = vmatpush.msrb.mxu3 %v1245_v44  ;;  %1380 = vmatpush.msrb.mxu2 %v1369_v6  ;;  %v1556_v6 = vld [vmem:[#allocation7 + $0x678] sm:$0xff] }
 0x745   :  { %1257 = vmatpush.msrb.mxu3 %v1244_v45  ;;  %1381 = vmatpush.msrb.mxu2 %v1368_v8  ;;  %v1555_v8 = vld [vmem:[#allocation7 + $0x670] sm:$0xff] }
 0x747   :  { %1258 = vmatpush.msrb.mxu3 %v1243_v46  ;;  %1382 = vmatpush.msrb.mxu2 %v1367_v11  ;;  %v1313_v46 = vld [vmem:[#allocation2 + $0x90] sm:$0xff]  ;;  %v1554_v11 = vld [vmem:[#allocation7 + $0x668] sm:$0xff] }
 0x749   :  { %1259 = vmatpush.msrb.mxu3 %v1242_v47  ;;  %1383 = vmatpush.msrb.mxu2 %v1366_v13  ;;  %v1553_v13 = vld [vmem:[#allocation7 + $0x660] sm:$0xff] }
 0x74b   :  { %1260 = vmatpush.msrb.mxu3 %v1241_v48  ;;  %1384 = vmatpush.msrb.mxu2 %v1365_v15  ;;  %v1475_v48 = vld [vmem:[#allocation7 + $0x5f8] sm:$0xff] }
 0x74c   :  { %v1552_v15 = vld [vmem:[#allocation7 + $0x658] sm:$0xff] }
 0x74d   :  { %1261 = vmatpush.msrb.mxu3 %v1240_v49  ;;  %1385 = vmatpush.msrb.mxu2 %v1364_v31  ;;  %v1356_v49 = vld [vmem:[#allocation2 + $0xa0] sm:$0xff] }
 0x74e   :  { %v1551_v31 = vld [vmem:[#allocation7 + $0x650] sm:$0xff] }
 0x74f   :  { %1262 = vmatpush.msrb.mxu3 %v1239_v50  ;;  %1386 = vmatpush.msrb.mxu2 %v1363_v19  ;;  %v1474_v50 = vld [vmem:[#allocation7 + $0x5f0] sm:$0xff] }
 0x751   :  { %1263 = vmatpush.msrb.mxu3 %v1238_v51  ;;  %1387 = vmatpush.msrb.mxu2 %v1362_v22  ;;  %v1314_v51 = vld [vmem:[#allocation2 + $0x98] sm:$0xff]  ;;  %v1548_v22 = vld [vmem:[#allocation7 + $0x638] sm:$0xff] }
 0x753   :  { %1264 = vmatpush.msrb.mxu3 %v1237_v52  ;;  %v1473_v52 = vld [vmem:[#allocation7 + $0x5e8] sm:$0xff] }
 0x755   :  { %1265 = vmatpush.msrb.mxu3 %v1236_v53  ;;  %v1472_v53 = vld [vmem:[#allocation7 + $0x5e0] sm:$0xff] }
 0x757   :  { %1266 = vmatpush.msrb.mxu3 %v1235_v54  ;;  %v1471_v54 = vld [vmem:[#allocation7 + $0x5d8] sm:$0xff] }
 0x758   :  { %1267 = vmatmul.f32.vlgmr.msrb.gmra.mxu3 %v1085_v23  ;;  %v1361_v23 = vld [vmem:[#allocation7 + $0x510] sm:$0xff] }
 0x759   :  { %1388 = vmatpush.msrb.mxu2 %v1361_v23  ;;  %v1547_v23 = vld [vmem:[#allocation7 + $0x630] sm:$0xff] }
 0x75b   :  { %1389 = vmatpush.msrb.mxu2 %v1360_v25  ;;  %v1546_v25 = vld [vmem:[#allocation7 + $0x628] sm:$0xff] }
 0x75d   :  { %1390 = vmatpush.msrb.mxu2 %v1359_v27 }
 0x75f   :  { %1557 = vmatpush.msra.mxu2 %v1556_v6  ;;  %v1695_v6 = vld [vmem:[#allocation7 + $0x750] sm:$0xff] }
 0x760   :  { %1270 = vmatmul.f32.gmra.mxu3 %v1086_v29 }
 0x761   :  { %1558 = vmatpush.msra.mxu2 %v1555_v8  ;;  %v1693_v8 = vld [vmem:[#allocation7 + $0x740] sm:$0xff] }
 0x763   :  { %1559 = vmatpush.msra.mxu2 %v1554_v11  ;;  %v1690_v11 = vld [vmem:[#allocation7 + $0x728] sm:$0xff] }
 0x765   :  { %1560 = vmatpush.msra.mxu2 %v1553_v13  ;;  %v1688_v13 = vld [vmem:[#allocation7 + $0x718] sm:$0xff] }
 0x767   :  { %1561 = vmatpush.msra.mxu2 %v1552_v15  ;;  %v1686_v15 = vld [vmem:[#allocation7 + $0x708] sm:$0xff] }
 0x769   :  { %1562 = vmatpush.msra.mxu2 %v1551_v31 }
 0x76b   :  { %1563 = vmatpush.msra.mxu2 %v1550_v59  ;;  %v1791_v59 = vld [vmem:[#allocation8 + $0xf8] sm:$0xff] }
 0x7bb   :  { %v2655_v55 = vpop.f32.mrf.mxu3  ;;  %v1225_v28 = vpop.f32.mrf.mxu2 }
 0x7bc   :  { %v1226_v29 = vadd.f32 %v1225_v28, %v2655_v55  ;;  %v1357_v55 = vld [vmem:[#allocation2 + $0xa8] sm:$0xff]  ;;  %v1545_v28 = vld [vmem:[#allocation7 + $0x620] sm:$0xff] }
 0x7c3   :  { %v2657_v61 = vpop.f32.mrf.mxu3  ;;  %v1228_v35 = vpop.f32.mrf.mxu2 }
 0x7c4   :  { %v1229_v37 = vadd.f32 %v1228_v35, %v2657_v61  ;;  %v1466_v61 = vld [vmem:[#allocation7 + $0x5b0] sm:$0xff] }
 0x7c5   :  { %v1543_v35 = vld [vmem:[#allocation7 + $0x610] sm:$0xff] }
 0x7db   :  { %v1268_v9 = vpop.f32.mrf.mxu3 }
 0x7e3   :  { %v1271_v17 = vpop.f32.mrf.mxu3 }
 0x7e4   :  { %1294 = vmatpush.msra.mxu0 %v1271_v17  ;;  %v1594_v17 = vld [vmem:[#allocation7 + $0x6d0] sm:$0xff] }
 0x7e6   :  { %1295 = vmatpush.msra.mxu0 %v1268_v9  ;;  %v1598_v9 = vld [vmem:[#allocation7 + $0x6f0] sm:$0xff] }
 0x7e7   :  { %2166 = vmatmul.msk.f32.vlgmr.msra.gmra.mxu0 %vm722_vm1, %v1232_v18  ;;  %v1593_v18 = vld [vmem:[#allocation7 + $0x6c8] sm:$0xff] }
 0x7ef   :  { %2167 = vmatmul.msk.f32.gmra.mxu0 %vm722_vm1, %v1233_v20  ;;  %v1549_v20 = vld [vmem:[#allocation7 + $0x640] sm:$0xff] }
 0x7f0   :  { %1564 = vmatpush.msra.mxu2 %v1549_v20 }
 0x7f2   :  { %1565 = vmatpush.msra.mxu2 %v1548_v22  ;;  %v1787_v22 = vld [vmem:[#allocation8 + $0xd8] sm:$0xff] }
 0x7f4   :  { %1566 = vmatpush.msra.mxu2 %v1547_v23  ;;  %v1785_v23 = vld [vmem:[#allocation8 + $0xc8] sm:$0xff] }
 0x7f6   :  { %1567 = vmatpush.msra.mxu2 %v1546_v25  ;;  %v1783_v25 = vld [vmem:[#allocation8 + $0xb8] sm:$0xff] }
 0x7f8   :  { %1568 = vmatpush.msra.mxu2 %v1545_v28  ;;  %v1778_v28 = vld [vmem:[#allocation8 + $0x90] sm:$0xff] }
 0x864   :  { %v1297_v30 = vpop.f32.mrf.mxu0 }
 0x865   :  { %v1303_v33 = vadd.f32 %v1297_v30, %v1226_v29  ;;  %v1457_v29 = vld [vmem:[#allocation2 + $0xb0] sm:$0xff] }
 0x866   :  { %v1588_v30 = vld [vmem:[#allocation7 + $0x6a0] sm:$0xff] }
 0x867   :  { %v1308_v34 = vadd.f32 %v2168_v32, %v1303_v33  ;;  %v1458_v32 = vld [vmem:[#allocation2 + $0xb8] sm:$0xff]  ;;  %v1544_v33 = vld [vmem:[#allocation7 + $0x618] sm:$0xff] }
 0x868   :  { %1569 = vmatpush.msra.mxu2 %v1544_v33  ;;  %v1777_v33 = vld [vmem:[#allocation8 + $0x88] sm:$0xff] }
 0x869   :  { %v1310_v36 = vmax.f32 %v1308_v34, 0.0  ;;  %v1587_v34 = vld [vmem:[#allocation7 + $0x698] sm:$0xff] }
 0x86a   :  { %1570 = vmatpush.msra.mxu2 %v1543_v35  ;;  %v1775_v35 = vld [vmem:[#allocation8 + $0x78] sm:$0xff] }
 0x86b   :  { %1348 = vmatmul.f32.vlgmr.msra.gmra.mxu1 %v1310_v36  ;;  %1391 = vmatmul.f32.vlgmr.msrb.gmra.mxu2 %v1310_v36 }
 0x86c   :  { %v1300_v38 = vpop.f32.mrf.mxu0 }
 0x86d   :  { %v1304_v40 = vadd.f32 %v1300_v38, %v1229_v37  ;;  %v1542_v37 = vld [vmem:[#allocation7 + $0x608] sm:$0xff] }
 0x86e   :  { %v1585_v38 = vld [vmem:[#allocation7 + $0x688] sm:$0xff]  ;;  %1571 = vmatpush.msra.mxu2 %v1542_v37 }
 0x86f   :  { %v1309_v41 = vadd.f32 %v2169_v39, %v1304_v40  ;;  %v1541_v39 = vld [vmem:[#allocation7 + $0x600] sm:$0xff]  ;;  %v1773_v37 = vld [vmem:[#allocation8 + $0x68] sm:$0xff] }
 0x870   :  { %v1584_v40 = vld [vmem:[#allocation7 + $0x680] sm:$0xff]  ;;  %1572 = vmatpush.msra.mxu2 %v1541_v39  ;;  %v1771_v39 = vld [vmem:[#allocation8 + $0x58] sm:$0xff] }
 0x871   :  { %v1311_v42 = vmax.f32 %v1309_v41, 0.0 }
 0x873   :  { %1351 = vmatmul.f32.gmra.mxu1 %v1311_v42  ;;  %1394 = vmatmul.f32.gmra.mxu2 %v1311_v42 }
 0x8e8   :  { %v1349_v43 = vpop.f32.mrf.mxu1 }
 0x8ee   :  { %v1392_v44 = vpop.f32.mrf.mxu2 }
 0x8f0   :  { %v1352_v45 = vpop.f32.mrf.mxu1 }
 0x8f1   :  { %1447 = vmatpush.msra.mxu3 %v1352_v45 }
 0x8f3   :  { %1448 = vmatpush.msra.mxu3 %v1349_v43 }
 0x8f4   :  { %2172 = vmatmul.msk.f32.vlgmr.msra.gmra.mxu3 %vm722_vm1, %v1313_v46 }
 0x8f5   :  { %1600 = vmatpush.msrb.mxu3 %v1599_v7  ;;  %v1694_v7 = vld [vmem:[#allocation7 + $0x748] sm:$0xff] }
 0x8f6   :  { %v1395_v47 = vpop.f32.mrf.mxu2 }
 0x8f7   :  { %1418 = vmatpush.msrb.mxu0 %v1395_v47  ;;  %1601 = vmatpush.msrb.mxu3 %v1598_v9  ;;  %v1692_v9 = vld [vmem:[#allocation7 + $0x738] sm:$0xff] }
 0x8f9   :  { %1419 = vmatpush.msrb.mxu0 %v1392_v44  ;;  %1602 = vmatpush.msrb.mxu3 %v1597_v12  ;;  %v2176_v44 = vld [vmem:[%s2745_s5 + $0x40] sm:$0xff]  ;;  %v1689_v12 = vld [vmem:[#allocation7 + $0x720] sm:$0xff] }
 0x8fa   :  { %2170 = vmatmul.msk.f32.vlgmr.msrb.gmra.mxu0 %vm722_vm1, %v1356_v49 }
 0x8fb   :  { %1476 = vmatpush.msra.mxu0 %v1475_v48  ;;  %1603 = vmatpush.msrb.mxu3 %v1596_v14  ;;  %v1687_v14 = vld [vmem:[#allocation7 + $0x710] sm:$0xff] }
 0x8fc   :  { %2173 = vmatmul.msk.f32.gmra.mxu3 %vm722_vm1, %v1314_v51  ;;  %v2177_v51 = vld [vmem:[%s2745_s5 + $0x48] sm:$0xff] }
 0x8fd   :  { %1477 = vmatpush.msra.mxu0 %v1474_v50  ;;  %1604 = vmatpush.msrb.mxu3 %v1595_v16  ;;  %v1685_v16 = vld [vmem:[#allocation7 + $0x700] sm:$0xff] }
 0x8ff   :  { %1478 = vmatpush.msra.mxu0 %v1473_v52  ;;  %1605 = vmatpush.msrb.mxu3 %v1594_v17  ;;  %v1790_v17 = vld [vmem:[#allocation8 + $0xf0] sm:$0xff] }
 0x901   :  { %1479 = vmatpush.msra.mxu0 %v1472_v53  ;;  %1606 = vmatpush.msrb.mxu3 %v1593_v18  ;;  %v1788_v18 = vld [vmem:[#allocation8 + $0xe0] sm:$0xff] }
 0x902   :  { %2171 = vmatmul.msk.f32.gmra.mxu0 %vm722_vm1, %v1357_v55 }
 0x903   :  { %1480 = vmatpush.msra.mxu0 %v1471_v54  ;;  %1607 = vmatpush.msrb.mxu3 %v1592_v21  ;;  %v1786_v21 = vld [vmem:[#allocation8 + $0xd0] sm:$0xff] }
 0x905   :  { %1481 = vmatpush.msra.mxu0 %v1470_v56  ;;  %1608 = vmatpush.msrb.mxu3 %v1591_v1  ;;  %v1784_v1 = vld [vmem:[#allocation8 + $0xc0] sm:$0xff] }
 0x907   :  { %1482 = vmatpush.msra.mxu0 %v1469_v57  ;;  %1609 = vmatpush.msrb.mxu3 %v1590_v24  ;;  %v1782_v24 = vld [vmem:[#allocation8 + $0xb0] sm:$0xff] }
 0x909   :  { %1483 = vmatpush.msra.mxu0 %v1468_v58  ;;  %1610 = vmatpush.msrb.mxu3 %v1589_v26  ;;  %v1780_v26 = vld [vmem:[#allocation8 + $0xa0] sm:$0xff] }
 0x90b   :  { %1484 = vmatpush.msra.mxu0 %v1467_v60  ;;  %1611 = vmatpush.msrb.mxu3 %v1588_v30  ;;  %v1700_v60 = vld [vmem:[#allocation7 + $0x778] sm:$0xff] }
 0x90d   :  { %1485 = vmatpush.msra.mxu0 %v1466_v61  ;;  %1612 = vmatpush.msrb.mxu3 %v1587_v34  ;;  %v1538_v61 = vld [vmem:[#allocation2 + $0xc0] sm:$0xff] }
 0x90e   :  { %v1774_v34 = vld [vmem:[#allocation8 + $0x70] sm:$0xff] }
 0x90f   :  { %1486 = vmatpush.msra.mxu0 %v1465_v62  ;;  %v1581_v62 = vld [vmem:[#allocation2 + $0xd0] sm:$0xff] }
 0x911   :  { %1487 = vmatpush.msra.mxu0 %v1464_v63  ;;  %v1699_v63 = vld [vmem:[#allocation7 + $0x770] sm:$0xff] }
 0x913   :  { %1488 = vmatpush.msra.mxu0 %v1463_v0  ;;  %v1698_v0 = vld [vmem:[#allocation7 + $0x768] sm:$0xff] }
 0x915   :  { %1489 = vmatpush.msra.mxu0 %v1462_v2  ;;  %v1697_v2 = vld [vmem:[#allocation7 + $0x760] sm:$0xff] }
 0x917   :  { %1490 = vmatpush.msra.mxu0 %v1461_v3  ;;  %v1696_v3 = vld [vmem:[#allocation7 + $0x758] sm:$0xff] }
 0x919   :  { %1491 = vmatpush.msra.mxu0 %v1460_v4  ;;  %v1539_v4 = vld [vmem:[#allocation2 + $0xc8] sm:$0xff] }
 0x91a   :  { %1492 = vmatmul.f32.vlgmr.msra.gmra.mxu0 %v1310_v36  ;;  %v1586_v36 = vld [vmem:[#allocation7 + $0x690] sm:$0xff] }
 0x91b   :  { %1613 = vmatpush.msrb.mxu3 %v1586_v36  ;;  %v1772_v36 = vld [vmem:[#allocation8 + $0x60] sm:$0xff] }
 0x91d   :  { %1614 = vmatpush.msrb.mxu3 %v1585_v38  ;;  %v1770_v38 = vld [vmem:[#allocation8 + $0x50] sm:$0xff] }
 0x91f   :  { %1615 = vmatpush.msrb.mxu3 %v1584_v40 }
 0x921   :  { %1792 = vmatpush.msra.mxu3 %v1790_v17  ;;  %v1899_v17 = vld [vmem:[#allocation10 + $0x48] sm:$0xff] }
 0x922   :  { %1495 = vmatmul.f32.gmra.mxu0 %v1311_v42 }
 0x923   :  { %1793 = vmatpush.msra.mxu3 %v1788_v18  ;;  %v1898_v18 = vld [vmem:[#allocation10 + $0x40] sm:$0xff] }
 0x925   :  { %1794 = vmatpush.msra.mxu3 %v1786_v21  ;;  %v1840_v21 = vld [vmem:[%s2747_s7 + $0x10] sm:$0xff] }
 0x927   :  { %1795 = vmatpush.msra.mxu3 %v1784_v1  ;;  %v1838_v1 = vld [vmem:[%s2747_s7] sm:$0xff] }
 0x929   :  { %1796 = vmatpush.msra.mxu3 %v1782_v24 }
 0x92b   :  { %1797 = vmatpush.msra.mxu3 %v1780_v26 }
 0x92d   :  { %1798 = vmatpush.msra.mxu3 %v1778_v28  ;;  %v1839_v28 = vld [vmem:[%s2747_s7 + $0x8] sm:$0xff] }
 0x977   :  { %v2673_v5 = vpop.f32.mrf.mxu0  ;;  %v1450_v41 = vpop.f32.mrf.mxu3 }
 0x978   :  { %v1451_v42 = vadd.f32 %v1450_v41, %v2673_v5  ;;  %v1582_v5 = vld [vmem:[#allocation2 + $0xd8] sm:$0xff]  ;;  %v1768_v41 = vld [vmem:[#allocation8 + $0x40] sm:$0xff] }
 0x97f   :  { %v2675_v10 = vpop.f32.mrf.mxu0  ;;  %v1453_v47 = vpop.f32.mrf.mxu3 }
 0x980   :  { %v1454_v49 = vadd.f32 %v1453_v47, %v2675_v10  ;;  %v1691_v10 = vld [vmem:[#allocation7 + $0x730] sm:$0xff]  ;;  %v1764_v47 = vld [vmem:[#allocation8 + $0x20] sm:$0xff] }
 0x997   :  { %v1493_v19 = vpop.f32.mrf.mxu0 }
 0x99f   :  { %v1496_v27 = vpop.f32.mrf.mxu0 }
 0x9a0   :  { %1519 = vmatpush.msrb.mxu1 %v1496_v27  ;;  %v1781_v27 = vld [vmem:[#allocation8 + $0xa8] sm:$0xff] }
 0x9a2   :  { %1520 = vmatpush.msrb.mxu1 %v1493_v19  ;;  %v1789_v19 = vld [vmem:[#allocation8 + $0xe8] sm:$0xff] }
 0x9a3   :  { %2174 = vmatmul.msk.f32.vlgmr.msrb.gmra.mxu1 %vm722_vm1, %v1457_v29  ;;  %v1779_v29 = vld [vmem:[#allocation8 + $0x98] sm:$0xff] }
 0x9ab   :  { %2175 = vmatmul.msk.f32.gmra.mxu1 %vm722_vm1, %v1458_v32  ;;  %v1776_v32 = vld [vmem:[#allocation8 + $0x80] sm:$0xff] }
 0x9ac   :  { %1799 = vmatpush.msra.mxu3 %v1776_v32  ;;  %v1846_v32 = vld [vmem:[%s2748_s8] sm:$0x3] }
 0x9ae   :  { %1800 = vmatpush.msra.mxu3 %v1774_v34  ;;  %v1896_v34 = vld [vmem:[#allocation10 + $0x30] sm:$0xff] }
 0x9b0   :  { %1801 = vmatpush.msra.mxu3 %v1772_v36  ;;  %v1894_v36 = vld [vmem:[#allocation10 + $0x20] sm:$0xff] }
 0x9b2   :  { %1802 = vmatpush.msra.mxu3 %v1770_v38  ;;  %v1892_v38 = vld [vmem:[#allocation10 + $0x10] sm:$0xff] }
 0x9b4   :  { %1803 = vmatpush.msra.mxu3 %v1768_v41  ;;  %v1890_v41 = vld [vmem:[#allocation10] sm:$0xff] }
 0xa20   :  { %v1522_v43 = vpop.f32.mrf.mxu1 }
 0xa21   :  { %v1528_v45 = vadd.f32 %v1522_v43, %v1451_v42  ;;  %v1682_v42 = vld [vmem:[#allocation2 + $0xe0] sm:$0xff]  ;;  %v1769_v43 = vld [vmem:[#allocation8 + $0x48] sm:$0xff] }
 0xa23   :  { %v1533_v46 = vadd.f32 %v2176_v44, %v1528_v45  ;;  %v1766_v44 = vld [vmem:[#allocation8 + $0x30] sm:$0xff]  ;;  %v1767_v45 = vld [vmem:[#allocation8 + $0x38] sm:$0xff] }
 0xa24   :  { %1804 = vmatpush.msra.mxu3 %v1766_v44  ;;  %v1907_v44 = vld [vmem:[#allocation10 + $0x88] sm:$0xff] }
 0xa25   :  { %v1535_v48 = vmax.f32 %v1533_v46, 0.0  ;;  %v1683_v46 = vld [vmem:[#allocation2 + $0xe8] sm:$0xff] }
 0xa26   :  { %1805 = vmatpush.msra.mxu3 %v1764_v47  ;;  %v1979_v47 = vld [vmem:[#allocation11 + $0x70] sm:$0xff] }
 0xa27   :  { %1573 = vmatmul.f32.vlgmr.msra.gmra.mxu2 %v1535_v48  ;;  %1616 = vmatmul.f32.vlgmr.msrb.gmra.mxu3 %v1535_v48 }
 0xa28   :  { %v1525_v50 = vpop.f32.mrf.mxu1 }
 0xa29   :  { %v1529_v52 = vadd.f32 %v1525_v50, %v1454_v49  ;;  %v1762_v49 = vld [vmem:[#allocation8 + $0x10] sm:$0xff]  ;;  %v1763_v50 = vld [vmem:[#allocation8 + $0x18] sm:$0xff] }
 0xa2a   :  { %1806 = vmatpush.msra.mxu3 %v1762_v49  ;;  %v1977_v49 = vld [vmem:[#allocation11 + $0x60] sm:$0xff] }
 0xa2b   :  { %v1534_v53 = vadd.f32 %v2177_v51, %v1529_v52  ;;  %v1760_v51 = vld [vmem:[#allocation8] sm:$0xff]  ;;  %v1761_v52 = vld [vmem:[#allocation8 + $0x8] sm:$0xff] }
 0xa2c   :  { %1807 = vmatpush.msra.mxu3 %v1760_v51  ;;  %v1975_v51 = vld [vmem:[#allocation11 + $0x50] sm:$0xff] }
 0xa2d   :  { %v1536_v54 = vmax.f32 %v1534_v53, 0.0 }
 0xa2f   :  { %1576 = vmatmul.f32.gmra.mxu2 %v1536_v54  ;;  %1619 = vmatmul.f32.gmra.mxu3 %v1536_v54 }
 0xaaa   :  { %v1574_v55 = vpop.f32.mrf.mxu2  ;;  %v1617_v56 = vpop.f32.mrf.mxu3 }
 0xab2   :  { %v1577_v57 = vpop.f32.mrf.mxu2  ;;  %v1620_v58 = vpop.f32.mrf.mxu3 }
 0xab3   :  { %1643 = vmatpush.msra.mxu1 %v1620_v58  ;;  %1672 = vmatpush.msrb.mxu0 %v1577_v57 }
 0xab5   :  { %1644 = vmatpush.msra.mxu1 %v1617_v56  ;;  %1673 = vmatpush.msrb.mxu0 %v1574_v55  ;;  %v2184_v56 = vld [vmem:[%s2745_s5 + $0x50] sm:$0xff] }
 0xab6   :  { %2180 = vmatmul.msk.f32.vlgmr.msrb.gmra.mxu0 %vm722_vm1, %v1538_v61  ;;  %2178 = vmatmul.msk.f32.vlgmr.msra.gmra.mxu1 %vm722_vm1, %v1581_v62 }
 0xab7   :  { %1701 = vmatpush.msrb.mxu1 %v1700_v60  ;;  %1815 = vmatpush.msra.mxu0 %v1791_v59  ;;  %v1914_v59 = vld [vmem:[#allocation10 + $0xc0] sm:$0xff] }
 0xab9   :  { %1702 = vmatpush.msrb.mxu1 %v1699_v63  ;;  %1816 = vmatpush.msra.mxu0 %v1789_v19  ;;  %v2185_v63 = vld [vmem:[%s2745_s5 + $0x58] sm:$0xff]  ;;  %v1913_v19 = vld [vmem:[#allocation10 + $0xb8] sm:$0xff] }
 0xabb   :  { %1703 = vmatpush.msrb.mxu1 %v1698_v0  ;;  %1817 = vmatpush.msra.mxu0 %v1787_v22  ;;  %v1912_v22 = vld [vmem:[#allocation10 + $0xb0] sm:$0xff] }
 0xabd   :  { %1704 = vmatpush.msrb.mxu1 %v1697_v2  ;;  %1818 = vmatpush.msra.mxu0 %v1785_v23 }
 0xabe   :  { %2181 = vmatmul.msk.f32.gmra.mxu0 %vm722_vm1, %v1539_v4  ;;  %2179 = vmatmul.msk.f32.gmra.mxu1 %vm722_vm1, %v1582_v5  ;;  %v1920_v4 = vld [vmem:[#allocation10 + $0xf0] sm:$0xff]  ;;  %v1905_v5 = vld [vmem:[#allocation10 + $0x78] sm:$0xff] }
 0xabf   :  { %1705 = vmatpush.msrb.mxu1 %v1696_v3  ;;  %1819 = vmatpush.msra.mxu0 %v1783_v25  ;;  %v1921_v3 = vld [vmem:[#allocation10 + $0xf8] sm:$0xff]  ;;  %v1841_v25 = vld [vmem:[%s2747_s7 + $0x18] sm:$0xff] }
 0xac0   :  { %1944 = vmatpush.msrb.mxu3 %v1921_v3  ;;  %v2019_v3 = vld [vmem:[#allocation11 + $0xf0] sm:$0xff] }
 0xac1   :  { %1706 = vmatpush.msrb.mxu1 %v1695_v6  ;;  %1820 = vmatpush.msra.mxu0 %v1781_v27  ;;  %v1904_v6 = vld [vmem:[#allocation10 + $0x70] sm:$0xff]  ;;  %v1911_v27 = vld [vmem:[#allocation10 + $0xa8] sm:$0xff] }
 0xac2   :  { %1945 = vmatpush.msrb.mxu3 %v1920_v4  ;;  %v2018_v4 = vld [vmem:[#allocation11 + $0xe8] sm:$0xff] }
 0xac3   :  { %1707 = vmatpush.msrb.mxu1 %v1694_v7  ;;  %1821 = vmatpush.msra.mxu0 %v1779_v29  ;;  %v1919_v7 = vld [vmem:[#allocation10 + $0xe8] sm:$0xff] }
 0xac4   :  { %1946 = vmatpush.msrb.mxu3 %v1919_v7  ;;  %v2015_v7 = vld [vmem:[#allocation11 + $0xd0] sm:$0xff] }
 0xac5   :  { %1708 = vmatpush.msrb.mxu1 %v1693_v8  ;;  %1822 = vmatpush.msra.mxu0 %v1777_v33  ;;  %v1903_v8 = vld [vmem:[#allocation10 + $0x68] sm:$0xff] }
 0xac7   :  { %1709 = vmatpush.msrb.mxu1 %v1692_v9  ;;  %1823 = vmatpush.msra.mxu0 %v1775_v35  ;;  %v1918_v9 = vld [vmem:[#allocation10 + $0xe0] sm:$0xff]  ;;  %v1895_v35 = vld [vmem:[#allocation10 + $0x28] sm:$0xff] }
 0xac8   :  { %1947 = vmatpush.msrb.mxu3 %v1918_v9  ;;  %v2013_v9 = vld [vmem:[#allocation11 + $0xc0] sm:$0xff] }
 0xac9   :  { %1710 = vmatpush.msrb.mxu1 %v1691_v10  ;;  %1824 = vmatpush.msra.mxu0 %v1773_v37  ;;  %v1902_v10 = vld [vmem:[#allocation10 + $0x60] sm:$0xff]  ;;  %v1893_v37 = vld [vmem:[#allocation10 + $0x18] sm:$0xff] }
 0xacb   :  { %1711 = vmatpush.msrb.mxu1 %v1690_v11  ;;  %1825 = vmatpush.msra.mxu0 %v1771_v39  ;;  %v1917_v11 = vld [vmem:[#allocation10 + $0xd8] sm:$0xff]  ;;  %v1891_v39 = vld [vmem:[#allocation10 + $0x8] sm:$0xff] }
 0xacc   :  { %1948 = vmatpush.msrb.mxu3 %v1917_v11  ;;  %v2011_v11 = vld [vmem:[#allocation11 + $0xb0] sm:$0xff] }
 0xacd   :  { %1712 = vmatpush.msrb.mxu1 %v1689_v12  ;;  %1826 = vmatpush.msra.mxu0 %v1769_v43  ;;  %v1901_v12 = vld [vmem:[#allocation10 + $0x58] sm:$0xff]  ;;  %v1908_v43 = vld [vmem:[#allocation10 + $0x90] sm:$0xff] }
 0xacf   :  { %1713 = vmatpush.msrb.mxu1 %v1688_v13  ;;  %1827 = vmatpush.msra.mxu0 %v1767_v45  ;;  %v1906_v45 = vld [vmem:[#allocation10 + $0x80] sm:$0xff] }
 0xad1   :  { %1714 = vmatpush.msrb.mxu1 %v1687_v14  ;;  %v1916_v14 = vld [vmem:[#allocation10 + $0xd0] sm:$0xff] }
 0xad2   :  { %1949 = vmatpush.msrb.mxu3 %v1916_v14  ;;  %v2008_v14 = vld [vmem:[#allocation11 + $0x98] sm:$0xff] }
 0xad3   :  { %1715 = vmatpush.msrb.mxu1 %v1686_v15  ;;  %v1900_v15 = vld [vmem:[#allocation10 + $0x50] sm:$0xff] }
 0xad5   :  { %1716 = vmatpush.msrb.mxu1 %v1685_v16 }
 0xad6   :  { %1717 = vmatmul.f32.vlgmr.msrb.gmra.mxu1 %v1535_v48  ;;  %v1765_v48 = vld [vmem:[#allocation8 + $0x28] sm:$0xff] }
 0xad7   :  { %1828 = vmatpush.msra.mxu0 %v1765_v48  ;;  %1924 = vmatpush.msra.mxu1 %v1905_v5  ;;  %v1978_v48 = vld [vmem:[#allocation11 + $0x68] sm:$0xff]  ;;  %v2017_v5 = vld [vmem:[#allocation11 + $0xe0] sm:$0xff] }
 0xad9   :  { %1829 = vmatpush.msra.mxu0 %v1763_v50  ;;  %1925 = vmatpush.msra.mxu1 %v1904_v6  ;;  %v1976_v50 = vld [vmem:[#allocation11 + $0x58] sm:$0xff] }
 0xada   :  { %v2016_v6 = vld [vmem:[#allocation11 + $0xd8] sm:$0xff] }
 0xadb   :  { %1830 = vmatpush.msra.mxu0 %v1761_v52  ;;  %1926 = vmatpush.msra.mxu1 %v1903_v8  ;;  %v1974_v52 = vld [vmem:[#allocation11 + $0x48] sm:$0xff] }
 0xadc   :  { %v2014_v8 = vld [vmem:[#allocation11 + $0xc8] sm:$0xff] }
 0xadd   :  { %1927 = vmatpush.msra.mxu1 %v1902_v10  ;;  %v2012_v10 = vld [vmem:[#allocation11 + $0xb8] sm:$0xff] }
 0xade   :  { %1720 = vmatmul.f32.gmra.mxu1 %v1536_v54 }
 0xadf   :  { %1928 = vmatpush.msra.mxu1 %v1901_v12  ;;  %v2010_v12 = vld [vmem:[#allocation11 + $0xa8] sm:$0xff] }
 0xae1   :  { %1929 = vmatpush.msra.mxu1 %v1900_v15  ;;  %v2200_v15 = vld [vmem:[%s2751_s11] ss:$0 sm:$0xff] }
 0xae3   :  { %1930 = vmatpush.msra.mxu1 %v1899_v17 }
 0xae5   :  { %1931 = vmatpush.msra.mxu1 %v1898_v18  ;;  %v2007_v18 = vld [vmem:[#allocation11 + $0x90] sm:$0xff] }
 0xb33   :  { %v2691_v31 = vpop.f32.mrf.mxu1  ;;  %v1675_v53 = vpop.f32.mrf.mxu0 }
 0xb34   :  { %v1676_v54 = vadd.f32 %v1675_v53, %v2691_v31  ;;  %v1915_v31 = vld [vmem:[#allocation10 + $0xc8] sm:$0xff]  ;;  %v1973_v53 = vld [vmem:[#allocation11 + $0x40] sm:$0xff] }
 0xb35   :  { %1950 = vmatpush.msrb.mxu3 %v1915_v31 }
 0xb37   :  { %1951 = vmatpush.msrb.mxu3 %v1914_v59 }
 0xb39   :  { %1952 = vmatpush.msrb.mxu3 %v1913_v19  ;;  %v2006_v19 = vld [vmem:[#allocation11 + $0x88] sm:$0xff] }
 0xb3b   :  { %v2693_v20 = vpop.f32.mrf.mxu1  ;;  %v1678_v60 = vpop.f32.mrf.mxu0  ;;  %1953 = vmatpush.msrb.mxu3 %v1912_v22  ;;  %v2059_v22 = vld [vmem:[#allocation11 + $0x170] sm:$0xff] }
 0xb3c   :  { %v1679_v61 = vadd.f32 %v1678_v60, %v2693_v20  ;;  %v1897_v20 = vld [vmem:[#allocation10 + $0x38] sm:$0xff] }
 0xb3d   :  { %1932 = vmatpush.msra.mxu1 %v1897_v20  ;;  %1954 = vmatpush.msrb.mxu3 %v1911_v27  ;;  %v2005_v20 = vld [vmem:[#allocation11 + $0x80] sm:$0xff] }
 0xb3e   :  { %v2053_v27 = vld [vmem:[#allocation11 + $0x140] sm:$0xff] }
 0xb3f   :  { %1933 = vmatpush.msra.mxu1 %v1896_v34  ;;  %v2201_v34 = vld [vmem:[%s2751_s11 + $0x1] ss:$0 sm:$0xff] }
 0xb41   :  { %1934 = vmatpush.msra.mxu1 %v1895_v35 }
 0xb43   :  { %1935 = vmatpush.msra.mxu1 %v1894_v36 }
 0xb45   :  { %1936 = vmatpush.msra.mxu1 %v1893_v37 }
 0xb47   :  { %1937 = vmatpush.msra.mxu1 %v1892_v38  ;;  %v2047_v38 = vld [vmem:[#allocation11 + $0x110] sm:$0xff] }
 0xb49   :  { %1938 = vmatpush.msra.mxu1 %v1891_v39  ;;  %v2046_v39 = vld [vmem:[#allocation11 + $0x108] sm:$0xff] }
 0xb4b   :  { %1939 = vmatpush.msra.mxu1 %v1890_v41  ;;  %v2202_v41 = vld [vmem:[%s2751_s11 + $0x2] ss:$0 sm:$0xff] }
 0xb53   :  { %v1718_v30 = vpop.f32.mrf.mxu1 }
 0xb5b   :  { %v1721_v40 = vpop.f32.mrf.mxu1 }
 0xb5c   :  { %1744 = vmatpush.msrb.mxu2 %v1721_v40  ;;  %v1910_v40 = vld [vmem:[#allocation10 + $0xa0] sm:$0xff] }
 0xb5d   :  { %1955 = vmatpush.msrb.mxu3 %v1910_v40  ;;  %v2045_v40 = vld [vmem:[#allocation11 + $0x100] sm:$0xff] }
 0xb5e   :  { %1745 = vmatpush.msrb.mxu2 %v1718_v30 }
 0xb5f   :  { %2182 = vmatmul.msk.f32.vlgmr.msrb.gmra.mxu2 %vm722_vm1, %v1682_v42  ;;  %v1909_v42 = vld [vmem:[#allocation10 + $0x98] sm:$0xff] }
 0xb60   :  { %1956 = vmatpush.msrb.mxu3 %v1909_v42 }
 0xb62   :  { %1957 = vmatpush.msrb.mxu3 %v1908_v43 }
 0xb64   :  { %1958 = vmatpush.msrb.mxu3 %v1907_v44 }
 0xb66   :  { %1959 = vmatpush.msrb.mxu3 %v1906_v45  ;;  %v2203_v45 = vld [vmem:[%s2751_s11 + $0x3] ss:$0 sm:$0xff] }
 0xb67   :  { %2183 = vmatmul.msk.f32.gmra.mxu2 %vm722_vm1, %v1683_v46  ;;  %v1980_v46 = vld [vmem:[#allocation11 + $0x78] sm:$0xff] }
 0xbe2   :  { %v1747_v55 = vpop.f32.mrf.mxu2 }
 0xbe3   :  { %v1753_v57 = vadd.f32 %v1747_v55, %v1676_v54  ;;  %v1972_v54 = vld [vmem:[#allocation11 + $0x38] sm:$0xff]  ;;  %v1971_v55 = vld [vmem:[#allocation11 + $0x30] sm:$0xff] }
 0xbe5   :  { %v1758_v58 = vadd.f32 %v2184_v56, %v1753_v57  ;;  %v1970_v56 = vld [vmem:[#allocation11 + $0x28] sm:$0xff]  ;;  %v1969_v57 = vld [vmem:[#allocation11 + $0x20] sm:$0xff] }
 0xbe7   :  { %1808 = vmatmul.f32.vlgmr.msra.gmra.mxu3 %v1758_v58  ;;  %1831 = vmatmul.f32.vlgmr.msra.gmra.mxu0 %v1758_v58  ;;  %v1968_v58 = vld [vmem:[#allocation11 + $0x18] sm:$0xff] }
 0xbea   :  { %v1750_v62 = vpop.f32.mrf.mxu2 }
 0xbeb   :  { %v1754_v0 = vadd.f32 %v1750_v62, %v1679_v61  ;;  %v1967_v62 = vld [vmem:[#allocation11 + $0x10] sm:$0xff] }
 0xbed   :  { %v1759_v2 = vadd.f32 %v2185_v63, %v1754_v0  ;;  %v1966_v63 = vld [vmem:[#allocation11 + $0x8] sm:$0xff]  ;;  %v1965_v0 = vld [vmem:[#allocation11] sm:$0xff] }
 0xbef   :  { %1811 = vmatmul.f32.gmra.mxu3 %v1759_v2  ;;  %1834 = vmatmul.f32.gmra.mxu0 %v1759_v2  ;;  %v2020_v2 = vld [vmem:[#allocation11 + $0xf8] sm:$0xff] }
 0xbf0   :  { %2023 = vmatpush.msrb.mxu0 %v2020_v2 }
 0xbf2   :  { %2024 = vmatpush.msrb.mxu0 %v2019_v3 }
 0xbf4   :  { %2025 = vmatpush.msrb.mxu0 %v2018_v4 }
 0xbf6   :  { %2026 = vmatpush.msrb.mxu0 %v2017_v5 }
 0xbf8   :  { %2027 = vmatpush.msrb.mxu0 %v2016_v6 }
 0xbfa   :  { %2028 = vmatpush.msrb.mxu0 %v2015_v7 }
 0xbfc   :  { %2029 = vmatpush.msrb.mxu0 %v2014_v8 }
 0xbfe   :  { %2030 = vmatpush.msrb.mxu0 %v2013_v9 }
 0xc00   :  { %2031 = vmatpush.msrb.mxu0 %v2012_v10 }
 0xc02   :  { %2032 = vmatpush.msrb.mxu0 %v2011_v11 }
 0xc04   :  { %2033 = vmatpush.msrb.mxu0 %v2010_v12 }
 0xc64   :  { %v1832_v13 = vpop.f32.mrf.mxu0 }
 0xc65   :  { %v1843_v33 = vmul.f32 %v1839_v28, %v1832_v13  ;;  %v2009_v13 = vld [vmem:[#allocation11 + $0xa0] sm:$0xff]  ;;  %v2052_v28 = vld [vmem:[#allocation11 + $0x138] sm:$0xff] }
 0xc66   :  { %2034 = vmatpush.msrb.mxu0 %v2009_v13 }
 0xc68   :  { %2035 = vmatpush.msrb.mxu0 %v2008_v14 }
 0xc6a   :  { %v1809_v16 = vpop.f32.mrf.mxu3  ;;  %2036 = vmatpush.msrb.mxu0 %v2007_v18 }
 0xc6b   :  { %v1842_v29 = vmul.f32 %v1838_v1, %v1809_v16  ;;  %v2058_v1 = vld [vmem:[#allocation11 + $0x168] sm:$0xff] }
 0xc6c   :  { %v1835_v24 = vpop.f32.mrf.mxu0  ;;  %2037 = vmatpush.msrb.mxu0 %v2006_v19 }
 0xc6d   :  { %v1845_v30 = vmul.f32 %v1841_v25, %v1835_v24  ;;  %v2056_v24 = vld [vmem:[#allocation11 + $0x158] sm:$0xff]  ;;  %v2055_v25 = vld [vmem:[#allocation11 + $0x150] sm:$0xff] }
 0xc6e   :  { %2038 = vmatpush.msrb.mxu0 %v2005_v20 }
 0xc72   :  { %v1812_v23 = vpop.f32.mrf.mxu3 }
 0xc73   :  { %v1844_v26 = vmul.f32 %v1840_v21, %v1812_v23  ;;  %v2060_v21 = vld [vmem:[#allocation11 + $0x178] sm:$0xff]  ;;  %v2057_v23 = vld [vmem:[#allocation11 + $0x160] sm:$0xff] }
 0xc74   :  { %2063 = vmatpush.msrb.mxu1 %v2060_v21 }
 0xc75   :  { %1864 = vmatpush.msra.mxu2 %v1844_v26  ;;  %v2054_v26 = vld [vmem:[#allocation11 + $0x148] sm:$0xff] }
 0xc76   :  { %2064 = vmatpush.msrb.mxu1 %v2059_v22 }
 0xc77   :  { %1865 = vmatpush.msra.mxu2 %v1842_v29  ;;  %v2051_v29 = vld [vmem:[#allocation11 + $0x130] sm:$0xff] }
 0xc78   :  { %2186 = vmatmul.msk.f32.vlgmr.msra.gmra.mxu2 %vm722_vm1, %v1846_v32  ;;  %2065 = vmatpush.msrb.mxu1 %v2058_v1 }
 0xc79   :  { %1884 = vmatpush.msrb.mxu2 %v1845_v30  ;;  %v2050_v30 = vld [vmem:[#allocation11 + $0x128] sm:$0xff] }
 0xc7a   :  { %2066 = vmatpush.msrb.mxu1 %v2057_v23 }
 0xc7b   :  { %1885 = vmatpush.msrb.mxu2 %v1843_v33  ;;  %v2048_v33 = vld [vmem:[#allocation11 + $0x118] sm:$0xff] }
 0xc7c   :  { %2067 = vmatpush.msrb.mxu1 %v2056_v24 }
 0xc7d   :  { %1983 = vmatpush.msra.mxu2 %v1980_v46 }
 0xc7e   :  { %2068 = vmatpush.msrb.mxu1 %v2055_v25 }
 0xc7f   :  { %1984 = vmatpush.msra.mxu2 %v1979_v47 }
 0xc80   :  { %2187 = vmatmul.msk.f32.vlgmr.msrb.gmra.mxu2 %vm722_vm1, %v1846_v32  ;;  %2069 = vmatpush.msrb.mxu1 %v2054_v26  ;;  %v2049_v32 = vld [vmem:[#allocation11 + $0x120] sm:$0xff] }
 0xc81   :  { %1985 = vmatpush.msra.mxu2 %v1978_v48 }
 0xc82   :  { %2070 = vmatpush.msrb.mxu1 %v2053_v27 }
 0xc83   :  { %1986 = vmatpush.msra.mxu2 %v1977_v49 }
 0xc84   :  { %2071 = vmatpush.msrb.mxu1 %v2052_v28 }
 0xc85   :  { %1987 = vmatpush.msra.mxu2 %v1976_v50 }
 0xc86   :  { %2072 = vmatpush.msrb.mxu1 %v2051_v29 }
 0xc87   :  { %1988 = vmatpush.msra.mxu2 %v1975_v51 }
 0xc88   :  { %2073 = vmatpush.msrb.mxu1 %v2050_v30 }
 0xc89   :  { %1989 = vmatpush.msra.mxu2 %v1974_v52 }
 0xc8a   :  { %2074 = vmatpush.msrb.mxu1 %v2049_v32 }
 0xc8b   :  { %1990 = vmatpush.msra.mxu2 %v1973_v53 }
 0xc8c   :  { %2075 = vmatpush.msrb.mxu1 %v2048_v33 }
 0xc8d   :  { %1991 = vmatpush.msra.mxu2 %v1972_v54 }
 0xc8e   :  { %2076 = vmatpush.msrb.mxu1 %v2047_v38 }
 0xc8f   :  { %1992 = vmatpush.msra.mxu2 %v1971_v55 }
 0xc90   :  { %2077 = vmatpush.msrb.mxu1 %v2046_v39 }
 0xc91   :  { %1993 = vmatpush.msra.mxu2 %v1970_v56 }
 0xc92   :  { %2078 = vmatpush.msrb.mxu1 %v2045_v40 }
 0xc93   :  { %1994 = vmatpush.msra.mxu2 %v1969_v57 }
 0xc95   :  { %1995 = vmatpush.msra.mxu2 %v1968_v58 }
 0xc97   :  { %1996 = vmatpush.msra.mxu2 %v1967_v62 }
 0xc99   :  { %1997 = vmatpush.msra.mxu2 %v1966_v63 }
 0xc9b   :  { %1998 = vmatpush.msra.mxu2 %v1965_v0 }
 0xcfb   :  { %v1867_v60 = vpop.f32.mrf.mxu2 }
 0xcfc   :  { %1940 = vmatmul.f32.vlgmr.msra.gmra.mxu1 %v1867_v60 }
 0xd03   :  { %v1887_v61 = vpop.f32.mrf.mxu2 }
 0xd04   :  { %1960 = vmatmul.f32.vlgmr.msrb.gmra.mxu3 %v1887_v61 }
 0xd79   :  { %v1941_v16 = vpop.f32.mrf.mxu1 }
 0xd7a   :  { %v1942_v31 = vadd.f32 %v2200_v15, %v1941_v16 }
 0xd87   :  { %v1961_v17 = vpop.f32.mrf.mxu3 }
 0xd88   :  { %v1962_v59 = vadd.f32 %v1961_v17, %v1942_v31 }
 0xd8a   :  { %1964 = vst [vmem:[#allocation14] sm:$0x3] %v1962_v59  ;;  %1999 = vmatmul.f32.vlgmr.msra.gmra.mxu2 %v1962_v59 }
 0xd8b   :  { %2105 = dma.vmem_to_hbm [thread:$0]  %s2101_s18, 32, %s2103_s20, [#allocation15]  }
 0xe0d   :  { %v2000_v35 = vpop.f32.mrf.mxu2 }
 0xe0e   :  { %v2001_v36 = vadd.f32 %v2201_v34, %v2000_v35 }
 0xe10   :  { %v2003_v37 = vmax.f32 %v2001_v36, 0.0 }
 0xe12   :  { %2039 = vmatmul.f32.vlgmr.msrb.gmra.mxu0 %v2003_v37 }
 0xe8f   :  { %v2040_v42 = vpop.f32.mrf.mxu0 }
 0xe90   :  { %v2041_v43 = vadd.f32 %v2202_v41, %v2040_v42 }
 0xe92   :  { %v2043_v44 = vmax.f32 %v2041_v43, 0.0 }
 0xe94   :  { %2079 = vmatmul.f32.vlgmr.msrb.gmra.mxu1 %v2043_v44 }
 0xf11   :  { %v2080_v46 = vpop.f32.mrf.mxu1 }
 0xf12   :  { %v2081_v47 = vadd.f32 %v2203_v45, %v2080_v46 }
 0xf14   :  { %2083 = vst [vmem:[#allocation13] sm:$0x3] %v2081_v47 }
 0xf15   :  { %2094 = dma.vmem_to_hbm [thread:$0]  %s2090_s16, 32, %s2092_s0, [#allocation4]  }
 0xf16   :  { %2404 = dma.done.wait [#allocation4], 32  }
 0xf17   :  { %2405 = vsyncadd [#allocation4], 4294967264 }
 0xf18   :  { %2406 = dma.done.wait [#allocation15], 32  }
 0xf19   :  { %2407 = vsyncadd [#allocation15], 4294967264 }
 0xf1a   :  { %2114 = vsyncpa [#allocation3], 1 }
 0xf1b   :  { %2115 = vsyncpa [#allocation6], 1 }
 0xf1c   :  { %2116 = vsyncpa [#allocation9], 1 }
 0xf1d   :  { %2117 = vsyncpa [#allocation12], 1 }
 0xf1e   :  { %2118 = vsyncpa [#allocation4], 1 }
 0xf1f   :  { %2119 = vsyncpa [#allocation15], 1 }

</bundles_post_ra>
